<compile_context>
chip_gen: v7x
topology: tpu7x:2x2x1
jax: 0.10.0
libtpu: 0.0.40
codegen_flags: <defaults>
</compile_context>

<pallas_src>
import functools

import jax
import jax.numpy as jnp
from jax import lax
from jax.experimental import pallas as pl
from jax.experimental.pallas import tpu as pltpu

# ----- model hyperparameters (matching the torch module) -----
VOCAB = 50                      # len(ws)
MAX_LEN = 8                     # max_len
EMB = 100                       # embedding dim
NUM_CLASSES = 2
FEAT = MAX_LEN * EMB            # 800 (torch flatten width)

# ----- kernel layout constants -----
K = MAX_LEN * VOCAB             # 400 flattened (position, token) table rows
K_PAD = 512                     # contraction depth padded to a multiple of 128
C_PAD = 8                       # class rows padded to a full sublane tile
TILE_B = 256                    # batch rows per grid step (multiple of 128)


def _kernel(flat_ids_ref, s_ref, o_ref):
    # flat_ids_ref : VMEM int32 [MAX_LEN, TILE_B]  flat (pos, token) idx in [0, K)
    # s_ref        : VMEM f32   [C_PAD, K_PAD]     score table (rows >= 2 are zero)
    # o_ref        : VMEM f32   [NUM_CLASSES, TILE_B]
    flat = flat_ids_ref[...]
    kiota = lax.broadcasted_iota(jnp.int32, (K_PAD, TILE_B), 0)

    # Multi-hot selection matrix: mh[k, b] = 1 iff sample b picks table row k.
    mh = (kiota == flat[0:1, :]).astype(jnp.float32)
    for t in range(1, MAX_LEN):                         # static 8-way unroll
        mh = mh + (kiota == flat[t:t + 1, :]).astype(jnp.float32)

    # Selection-and-sum on the MXU; result is lane-dense along the batch.
    logits = jnp.dot(s_ref[...], mh,
                     preferred_element_type=jnp.float32)   # [C_PAD, TILE_B]
    logits = logits[0:NUM_CLASSES, :]                       # [2, TILE_B]

    # numerically-stable log_softmax over the (2-row) class axis
    m = jnp.max(logits, axis=0, keepdims=True)
    shifted = logits - m
    lse = jnp.log(jnp.sum(jnp.exp(shifted), axis=0, keepdims=True))
    o_ref[...] = (shifted - lse).astype(o_ref.dtype)


@functools.lru_cache(maxsize=None)
def _make_fused_forward(num_tiles):
    """Cached per batch-bucket (num_tiles * TILE_B padded rows)."""
    b_pad = num_tiles * TILE_B
    return pl.pallas_call(
        _kernel,
        out_shape=jax.ShapeDtypeStruct((NUM_CLASSES, b_pad), jnp.float32),
        grid_spec=pltpu.PrefetchScalarGridSpec(
            num_scalar_prefetch=0,
            grid=(num_tiles,),
            in_specs=[
                pl.BlockSpec((MAX_LEN, TILE_B), lambda i: (0, i)),   # flat ids
                pl.BlockSpec((C_PAD, K_PAD), lambda i: (0, 0)),      # score table
            ],
            out_specs=pl.BlockSpec((NUM_CLASSES, TILE_B), lambda i: (0, i)),
        ),
        compiler_params=pltpu.CompilerParams(
            dimension_semantics=("parallel",)),
    )


def pack_params(emb_table, fc_w, fc_b):
    """Precompute the per-(position, token) class-score table.

    S[t, v, :] = emb[v] @ fc_w[t*EMB:(t+1)*EMB, :]; the bias is folded into the
    position-0 entries (every sample selects exactly one t=0 row, so the bias
    is added exactly once).  Returned transposed and zero-padded to
    [C_PAD, K_PAD] for a fully lane/sublane-aligned MXU selection matmul.
    """
    emb = emb_table.astype(jnp.float32)
    w3 = fc_w.astype(jnp.float32).reshape(MAX_LEN, EMB, NUM_CLASSES)
    s = jnp.einsum('ve,tec->tvc', emb, w3,
                   precision=lax.Precision.HIGHEST)        # [MAX_LEN, VOCAB, 2]
    s = s.at[0].add(fc_b.astype(jnp.float32))               # fold bias at t = 0
    s_flat = s.reshape(K, NUM_CLASSES)                       # [400, 2]
    s_pad = jnp.zeros((C_PAD, K_PAD), jnp.float32)
    s_pad = s_pad.at[:NUM_CLASSES, :K].set(s_flat.T)
    return s_pad                                             # [8, 512]


def my_model_forward(token_ids, score_table):
    """token_ids: int32 [batch, MAX_LEN] -> log-probs [batch, NUM_CLASSES]."""
    batch = token_ids.shape[0]
    num_tiles = max(1, (batch + TILE_B - 1) // TILE_B)
    b_pad = num_tiles * TILE_B

    # Clamp ids (no runtime bounds check inside the kernel), flatten
    # (position, token) -> single table-row index, pad & transpose so the
    # batch is lane-major for the kernel.
    ids = jnp.clip(token_ids.astype(jnp.int32), 0, VOCAB - 1)
    flat = ids + jnp.arange(MAX_LEN, dtype=jnp.int32)[None, :] * VOCAB
    flat_t = jnp.zeros((MAX_LEN, b_pad), jnp.int32).at[:, :batch].set(flat.T)

    out_t = _make_fused_forward(num_tiles)(flat_t, score_table)  # [2, b_pad]
    return out_t.T[:batch]


def init_params(key):
    k_emb, k_w, k_b = jax.random.split(key, 3)
    # nn.Embedding default init: N(0, 1)
    emb_table = jax.random.normal(k_emb, (VOCAB, EMB), dtype=jnp.float32)
    # nn.Linear default init: U(-1/sqrt(fan_in), 1/sqrt(fan_in))
    bound = 1.0 / (FEAT ** 0.5)
    fc_w = jax.random.uniform(k_w, (FEAT, NUM_CLASSES), jnp.float32,
                              minval=-bound, maxval=bound)
    fc_b = jax.random.uniform(k_b, (NUM_CLASSES,), jnp.float32,
                              minval=-bound, maxval=bound)
    return emb_table, fc_w, fc_b


if __name__ == "__main__":
    key = jax.random.PRNGKey(0)
    k_params, k_ids = jax.random.split(key)
    emb_table, fc_w, fc_b = init_params(k_params)
    score_table = pack_params(emb_table, fc_w, fc_b)

    batch = 2
    token_ids = jax.random.randint(k_ids, (batch, MAX_LEN), 0, VOCAB,
                                   dtype=jnp.int32)

    out = my_model_forward(token_ids, score_table)
    out = jax.block_until_ready(out)

    # plain-JAX reference (mirrors the torch forward, full f32 precision)
    x = jnp.take(emb_table, token_ids, axis=0).reshape(batch, FEAT)
    logits_ref = jnp.dot(x, fc_w, precision=lax.Precision.HIGHEST) + fc_b
    ref = jax.nn.log_softmax(logits_ref, axis=-1)

    assert out.shape == (batch, NUM_CLASSES)
    assert jnp.allclose(out, ref, atol=1e-5), (out, ref)

    print("KERNEL_OK")
</pallas_src>

<mosaic_0001>
module attributes {stable_mosaic.version = 11 : i64} {
  func.func @_kernel(%arg0: i32, %arg1: memref<8x256xi32, #tpu.memory_space<vmem>>, %arg2: memref<8x512xf32, #tpu.memory_space<vmem>>, %arg3: memref<2x256xf32, #tpu.memory_space<vmem>>) attributes {dimension_semantics = [#tpu.dimension_semantics<parallel>], iteration_bounds = array<i64: 1>, scalar_prefetch = 0 : i64, scratch_operands = 0 : i64, tpu.core_type = #tpu.core_type<tc>, window_params = [{transform_indices = @transform_0, window_bounds = array<i64: 8, 256>}, {pipeline_mode = #tpu.pipeline_mode<synchronous>, transform_indices = @transform_1, window_bounds = array<i64: 8, 512>}, {transform_indices = @transform_2, window_bounds = array<i64: 2, 256>}]} {
    %c0 = arith.constant 0 : index
    %c0_0 = arith.constant 0 : index
    %0 = vector.load %arg1[%c0, %c0_0] : memref<8x256xi32, #tpu.memory_space<vmem>>, vector<8x256xi32>
    %1 = tpu.iota {dimensions = array<i32: 0>} : vector<512x256xi32>
    %2 = vector.extract_strided_slice %0 {offsets = [0, 0], sizes = [1, 256], strides = [1, 1]} : vector<8x256xi32> to vector<1x256xi32>
    %3 = vector.broadcast %2 : vector<1x256xi32> to vector<512x256xi32>
    %4 = arith.cmpi eq, %1, %3 : vector<512x256xi32>
    %5 = arith.extui %4 : vector<512x256xi1> to vector<512x256xi32>
    %6 = arith.sitofp %5 : vector<512x256xi32> to vector<512x256xf32>
    %7 = vector.extract_strided_slice %0 {offsets = [1, 0], sizes = [1, 256], strides = [1, 1]} : vector<8x256xi32> to vector<1x256xi32>
    %8 = vector.broadcast %7 : vector<1x256xi32> to vector<512x256xi32>
    %9 = arith.cmpi eq, %1, %8 : vector<512x256xi32>
    %10 = arith.extui %9 : vector<512x256xi1> to vector<512x256xi32>
    %11 = arith.sitofp %10 : vector<512x256xi32> to vector<512x256xf32>
    %12 = arith.addf %6, %11 : vector<512x256xf32>
    %13 = vector.extract_strided_slice %0 {offsets = [2, 0], sizes = [1, 256], strides = [1, 1]} : vector<8x256xi32> to vector<1x256xi32>
    %14 = vector.broadcast %13 : vector<1x256xi32> to vector<512x256xi32>
    %15 = arith.cmpi eq, %1, %14 : vector<512x256xi32>
    %16 = arith.extui %15 : vector<512x256xi1> to vector<512x256xi32>
    %17 = arith.sitofp %16 : vector<512x256xi32> to vector<512x256xf32>
    %18 = arith.addf %12, %17 : vector<512x256xf32>
    %19 = vector.extract_strided_slice %0 {offsets = [3, 0], sizes = [1, 256], strides = [1, 1]} : vector<8x256xi32> to vector<1x256xi32>
    %20 = vector.broadcast %19 : vector<1x256xi32> to vector<512x256xi32>
    %21 = arith.cmpi eq, %1, %20 : vector<512x256xi32>
    %22 = arith.extui %21 : vector<512x256xi1> to vector<512x256xi32>
    %23 = arith.sitofp %22 : vector<512x256xi32> to vector<512x256xf32>
    %24 = arith.addf %18, %23 : vector<512x256xf32>
    %25 = vector.extract_strided_slice %0 {offsets = [4, 0], sizes = [1, 256], strides = [1, 1]} : vector<8x256xi32> to vector<1x256xi32>
    %26 = vector.broadcast %25 : vector<1x256xi32> to vector<512x256xi32>
    %27 = arith.cmpi eq, %1, %26 : vector<512x256xi32>
    %28 = arith.extui %27 : vector<512x256xi1> to vector<512x256xi32>
    %29 = arith.sitofp %28 : vector<512x256xi32> to vector<512x256xf32>
    %30 = arith.addf %24, %29 : vector<512x256xf32>
    %31 = vector.extract_strided_slice %0 {offsets = [5, 0], sizes = [1, 256], strides = [1, 1]} : vector<8x256xi32> to vector<1x256xi32>
    %32 = vector.broadcast %31 : vector<1x256xi32> to vector<512x256xi32>
    %33 = arith.cmpi eq, %1, %32 : vector<512x256xi32>
    %34 = arith.extui %33 : vector<512x256xi1> to vector<512x256xi32>
    %35 = arith.sitofp %34 : vector<512x256xi32> to vector<512x256xf32>
    %36 = arith.addf %30, %35 : vector<512x256xf32>
    %37 = vector.extract_strided_slice %0 {offsets = [6, 0], sizes = [1, 256], strides = [1, 1]} : vector<8x256xi32> to vector<1x256xi32>
    %38 = vector.broadcast %37 : vector<1x256xi32> to vector<512x256xi32>
    %39 = arith.cmpi eq, %1, %38 : vector<512x256xi32>
    %40 = arith.extui %39 : vector<512x256xi1> to vector<512x256xi32>
    %41 = arith.sitofp %40 : vector<512x256xi32> to vector<512x256xf32>
    %42 = arith.addf %36, %41 : vector<512x256xf32>
    %43 = vector.extract_strided_slice %0 {offsets = [7, 0], sizes = [1, 256], strides = [1, 1]} : vector<8x256xi32> to vector<1x256xi32>
    %44 = vector.broadcast %43 : vector<1x256xi32> to vector<512x256xi32>
    %45 = arith.cmpi eq, %1, %44 : vector<512x256xi32>
    %46 = arith.extui %45 : vector<512x256xi1> to vector<512x256xi32>
    %47 = arith.sitofp %46 : vector<512x256xi32> to vector<512x256xf32>
    %48 = arith.addf %42, %47 : vector<512x256xf32>
    %c0_1 = arith.constant 0 : index
    %c0_2 = arith.constant 0 : index
    %49 = vector.load %arg2[%c0_1, %c0_2] : memref<8x512xf32, #tpu.memory_space<vmem>>, vector<8x512xf32>
    %cst = arith.constant dense<0.000000e+00> : vector<8x256xf32>
    %50 = tpu.matmul %49, %48, %cst {dimension_numbers = #tpu.dot_dimension_numbers<[1], [0], [0], [1], [0, 0, 1, 1], [], []>} : vector<8x512xf32>, vector<512x256xf32>, vector<8x256xf32> -> vector<8x256xf32>
    %51 = vector.extract_strided_slice %50 {offsets = [0, 0], sizes = [2, 256], strides = [1, 1]} : vector<8x256xf32> to vector<2x256xf32>
    %cst_3 = arith.constant dense<0xFF800000> : vector<256xf32>
    %52 = vector.multi_reduction <maximumf>, %51, %cst_3 [0] : vector<2x256xf32> to vector<256xf32>
    %53 = vector.shape_cast %52 : vector<256xf32> to vector<1x256xf32>
    %54 = vector.broadcast %53 : vector<1x256xf32> to vector<2x256xf32>
    %55 = arith.subf %51, %54 : vector<2x256xf32>
    %56 = math.exp %55 : vector<2x256xf32>
    %cst_4 = arith.constant dense<0.000000e+00> : vector<256xf32>
    %57 = vector.multi_reduction <add>, %56, %cst_4 [0] : vector<2x256xf32> to vector<256xf32>
    %58 = vector.shape_cast %57 : vector<256xf32> to vector<1x256xf32>
    %59 = math.log %58 : vector<1x256xf32>
    %60 = vector.broadcast %59 : vector<1x256xf32> to vector<2x256xf32>
    %61 = arith.subf %55, %60 : vector<2x256xf32>
    %c0_5 = arith.constant 0 : index
    %c0_6 = arith.constant 0 : index
    %62 = vector.load %arg3[%c0_5, %c0_6] : memref<2x256xf32, #tpu.memory_space<vmem>>, vector<2x256xf32>
    tpu.vector_store %arg3[%c0_5, %c0_6], %61 {strides = array<i32>} : memref<2x256xf32, #tpu.memory_space<vmem>>, vector<2x256xf32>,
    return
  }
  func.func @transform_0(%arg0: i32) -> (i32, i32) {
    %c0_i32 = arith.constant 0 : i32
    %c0_i32_0 = arith.constant 0 : i32
    return %c0_i32, %arg0 : i32, i32
  }
  func.func @transform_1(%arg0: i32) -> (i32, i32) {
    %c0_i32 = arith.constant 0 : i32
    %c0_i32_0 = arith.constant 0 : i32
    %c0_i32_1 = arith.constant 0 : i32
    return %c0_i32, %c0_i32_0 : i32, i32
  }
  func.func @transform_2(%arg0: i32) -> (i32, i32) {
    %c0_i32 = arith.constant 0 : i32
    %c0_i32_0 = arith.constant 0 : i32
    return %c0_i32, %arg0 : i32, i32
  }
}

</mosaic_0001>

<bundles_post_ra>
// kernel: tpu_custom_call.1
= control target key start
LH: loop header
LB: loop body
LE: loop exit
PB: predicated region body
PF: predicated region fallthrough
CT: control target
= control target key end

     0   :  { %7 = vsyncpa [#allocation3], 0  ;;  %s8951_s0 = inlined_call_operand.hbm [shape: s32[8,256], index: 0, kind: input, shape index: {}]   ;;  %s8952_s1 = inlined_call_operand.hbm [shape: f32[8,512], index: 1, kind: input, shape index: {}]   ;;  %s8953_s2 = inlined_call_operand.hbm [shape: f32[2,256], index: 2, kind: output, shape index: {}]  }
   0x1   :  { %8 = vsyncpa [#allocation6], 0 }
   0x2   :  { %9 = vsyncpa [#allocation4], 0  ;;  %s5589_s9 = smov [#allocation2]   ;;  %s5590_s11 = smov [#allocation5]  }
   0x3   :  { %s16_s10 = sshll.u32 %s5589_s9, 4  ;;  %s26_s12 = sshll.u32 %s5590_s11, 4  ;;  %s17_s10 = int_to_ptr.vmem [resolvable:$true] %s16_s10  ;;  %s27_s12 = int_to_ptr.vmem [resolvable:$true] %s26_s12 }
   0x4   :  { %s5517_s15 = scalar_lea.hbm %s8951_s0, 256 }
   0x5   :  { %p5518_p0 = scmp.ne.s32.totalorder %s8951_s0, %s5517_s15  ;;  %p5521_p1 = scmp.lt.u32.totalorder %s5517_s15, %s8951_s0 }
   0x7   :  { %p5523_p2 = pnand %p5521_p1, %p5518_p0 }
   0x9   :  { %5526 = shalt.err (!%p5523_p2)
}
   0xa   :  { %s5527_s20 = scalar_lea.vmem %s17_s10, 256  ;;  %p5532_p4 = scmp.lt.s32.totalorder %s17_s10, %s17_s10 }
   0xb   :  { %p5528_p3 = scmp.ne.s32.totalorder %s17_s10, %s5527_s20  ;;  %p5533_p5 = scmp.lt.s32.totalorder %s5527_s20, %s5527_s20 }
   0xd   :  { %p5534_p6 = por %p5533_p5, %p5532_p4 }
   0xf   :  { %p5535_p7 = pnand %p5534_p6, %p5528_p3 }
  0x11   :  { %5538 = shalt.err (!%p5535_p7)
}
  0x12   :  { %19 = dma.hbm_to_vmem [thread:$0]  %s8951_s0, 256, %s17_s10, [#allocation3]  }
  0x13   :  { %s5539_s25 = scalar_lea.hbm %s8952_s1, 512 }
  0x14   :  { %p5540_p8 = scmp.ne.s32.totalorder %s8952_s1, %s5539_s25  ;;  %p5543_p9 = scmp.lt.u32.totalorder %s5539_s25, %s8952_s1 }
  0x16   :  { %p5545_p10 = pnand %p5543_p9, %p5540_p8 }
  0x18   :  { %5548 = shalt.err (!%p5545_p10)
}
  0x19   :  { %s5549_s30 = scalar_lea.vmem %s27_s12, 512  ;;  %p5554_p12 = scmp.lt.s32.totalorder %s27_s12, %s27_s12 }
  0x1a   :  { %p5550_p11 = scmp.ne.s32.totalorder %s27_s12, %s5549_s30  ;;  %p5555_p13 = scmp.lt.s32.totalorder %s5549_s30, %s5549_s30 }
  0x1c   :  { %p5556_p0 = por %p5555_p13, %p5554_p12 }
  0x1e   :  { %p5557_p1 = pnand %p5556_p0, %p5550_p11 }
  0x20   :  { %5560 = shalt.err (!%p5557_p1)
}
  0x21   :  { %29 = dma.hbm_to_vmem [thread:$0]  %s8952_s1, 512, %s27_s12, [#allocation6]  }
  0x22   :  { %5583 = dma.done.wait [#allocation3], 256  }
  0x23   :  { %5584 = vsyncadd [#allocation3], 4294967040 }
  0x24   :  { %5585 = dma.done.wait [#allocation6], 512  }
  0x25   :  { %5586 = vsyncadd [#allocation6], 4294966784  ;;  %v38_v0 = vlaneseq  ;;  %v36_v14 = vld [vmem:[#allocation2] sm:$0xff]  ;;  %v37_v15 = vld [vmem:[#allocation2 + $0x8] sm:$0xff]  ;;  %v5591_v36 = vmov 0.0   ;;  %s5592_s1 = smov [#allocation7]  }
  0x26   :  { %s4340_s4 = sshll.u32 %s5592_s1, 4  ;;  %s4341_s4 = int_to_ptr.vmem [resolvable:$true] %s4340_s4 }
  0x27   :  { %v5632_v1 = vshrl.u32 %v38_v0, 7  ;;  %s5561_s5 = scalar_lea.vmem %s4341_s4, 64  ;;  %p5566_p3 = scmp.lt.s32.totalorder %s4341_s4, %s4341_s4 }
  0x28   :  { %p5562_p2 = scmp.ne.s32.totalorder %s4341_s4, %s5561_s5  ;;  %p5567_p4 = scmp.lt.s32.totalorder %s5561_s5, %s5561_s5 }
  0x29   :  { %v105_v2 = vsub.s32 0, %v5632_v1  ;;  %v497_v3 = vsub.s32 1, %v5632_v1  ;;  %v1017_v4 = vsub.s32 2, %v5632_v1  ;;  %v1537_v5 = vsub.s32 3, %v5632_v1 }
  0x2a   :  { %v2057_v6 = vsub.s32 4, %v5632_v1  ;;  %v2577_v7 = vsub.s32 5, %v5632_v1  ;;  %v3097_v8 = vsub.s32 6, %v5632_v1  ;;  %v3617_v9 = vsub.s32 7, %v5632_v1  ;;  %p5568_p5 = por %p5567_p4, %p5566_p3 }
  0x2b   :  { %v5643_v10 = vadd.s32 8, %v5632_v1  ;;  %v5646_v11 = vadd.s32 256, %v5632_v1  ;;  %v5649_v12 = vadd.s32 264, %v5632_v1  ;;  %v5652_v13 = vadd.s32 16, %v5632_v1 }
  0x2c   :  { %v5655_v16 = vadd.s32 24, %v5632_v1  ;;  %v5658_v17 = vadd.s32 272, %v5632_v1  ;;  %v5661_v18 = vadd.s32 280, %v5632_v1  ;;  %v5664_v19 = vadd.s32 32, %v5632_v1  ;;  %p5569_p6 = pnand %p5568_p5, %p5562_p2 }
  0x2d   :  { %v5666_v20 = vrot.slane %v36_v14, %v105_v2  ;;  %v5668_v21 = vrot.slane %v37_v15, %v105_v2  ;;  %v5670_v22 = vrot.slane %v36_v14, %v497_v3  ;;  %v5672_v23 = vrot.slane %v37_v15, %v497_v3 }
  0x2e   :  { %v5674_v24 = vrot.slane %v36_v14, %v1017_v4  ;;  %v5676_v25 = vrot.slane %v37_v15, %v1017_v4  ;;  %v5678_v26 = vrot.slane %v36_v14, %v1537_v5  ;;  %v5680_v27 = vrot.slane %v37_v15, %v1537_v5 }
  0x2f   :  { %v5682_v28 = vrot.slane %v36_v14, %v2057_v6  ;;  %v5684_v29 = vrot.slane %v37_v15, %v2057_v6  ;;  %v5686_v30 = vrot.slane %v36_v14, %v2577_v7  ;;  %v5688_v31 = vrot.slane %v37_v15, %v2577_v7 }
  0x30   :  { %v5690_v32 = vrot.slane %v36_v14, %v3097_v8  ;;  %v5692_v33 = vrot.slane %v37_v15, %v3097_v8  ;;  %v5694_v34 = vrot.slane %v36_v14, %v3617_v9  ;;  %v5696_v35 = vrot.slane %v37_v15, %v3617_v9 }
  0x31   :  { %vm112_vm0 = vcmp.eq.s32.totalorder %v5632_v1, %v5668_v21  ;;  %vm114_vm1 = vcmp.eq.s32.totalorder %v5643_v10, %v5668_v21  ;;  %vm504_vm2 = vcmp.eq.s32.totalorder %v5632_v1, %v5672_v23  ;;  %vm506_vm3 = vcmp.eq.s32.totalorder %v5643_v10, %v5672_v23 }
  0x32   :  { %v4351_v37 = vsel %vm112_vm0, 1.0, %v5591_v36  ;;  %v4353_v38 = vsel %vm114_vm1, 1.0, %v5591_v36  ;;  %v4479_v39 = vsel %vm504_vm2, 1.0, %v5591_v36  ;;  %v4481_v40 = vsel %vm506_vm3, 1.0, %v5591_v36 }
  0x33   :  { %v888_v41 = vadd.f32 %v4479_v39, %v4351_v37  ;;  %v890_v42 = vadd.f32 %v4481_v40, %v4353_v38  ;;  %vm1024_vm4 = vcmp.eq.s32.totalorder %v5632_v1, %v5676_v25  ;;  %vm1026_vm5 = vcmp.eq.s32.totalorder %v5643_v10, %v5676_v25 }
  0x34   :  { %v4607_v43 = vsel %vm1024_vm4, 1.0, %v5591_v36  ;;  %v4609_v44 = vsel %vm1026_vm5, 1.0, %v5591_v36  ;;  %vm1544_vm6 = vcmp.eq.s32.totalorder %v5632_v1, %v5680_v27  ;;  %vm1546_vm7 = vcmp.eq.s32.totalorder %v5643_v10, %v5680_v27 }
  0x35   :  { %v1408_v45 = vadd.f32 %v4607_v43, %v888_v41  ;;  %v1410_v46 = vadd.f32 %v4609_v44, %v890_v42  ;;  %v4735_v47 = vsel %vm1544_vm6, 1.0, %v5591_v36  ;;  %v4737_v48 = vsel %vm1546_vm7, 1.0, %v5591_v36 }
  0x36   :  { %vm2064_vm8 = vcmp.eq.s32.totalorder %v5632_v1, %v5684_v29  ;;  %vm2066_vm9 = vcmp.eq.s32.totalorder %v5643_v10, %v5684_v29  ;;  %vm2584_vm10 = vcmp.eq.s32.totalorder %v5632_v1, %v5688_v31  ;;  %vm2586_vm11 = vcmp.eq.s32.totalorder %v5643_v10, %v5688_v31 }
  0x37   :  { %v1928_v49 = vadd.f32 %v4735_v47, %v1408_v45  ;;  %v1930_v50 = vadd.f32 %v4737_v48, %v1410_v46  ;;  %v4863_v51 = vsel %vm2064_vm8, 1.0, %v5591_v36  ;;  %v4865_v52 = vsel %vm2066_vm9, 1.0, %v5591_v36 }
  0x38   :  { %v4991_v53 = vsel %vm2584_vm10, 1.0, %v5591_v36  ;;  %v4993_v54 = vsel %vm2586_vm11, 1.0, %v5591_v36  ;;  %vm3104_vm12 = vcmp.eq.s32.totalorder %v5632_v1, %v5692_v33  ;;  %vm3106_vm13 = vcmp.eq.s32.totalorder %v5643_v10, %v5692_v33 }
  0x39   :  { %v2448_v55 = vadd.f32 %v4863_v51, %v1928_v49  ;;  %v2450_v56 = vadd.f32 %v4865_v52, %v1930_v50  ;;  %v5119_v57 = vsel %vm3104_vm12, 1.0, %v5591_v36  ;;  %v5121_v58 = vsel %vm3106_vm13, 1.0, %v5591_v36 }
  0x3a   :  { %vm3624_vm14 = vcmp.eq.s32.totalorder %v5632_v1, %v5696_v35  ;;  %vm3626_vm15 = vcmp.eq.s32.totalorder %v5643_v10, %v5696_v35  ;;  %vm176_vm0 = vcmp.eq.s32.totalorder %v5646_v11, %v5668_v21  ;;  %vm178_vm1 = vcmp.eq.s32.totalorder %v5649_v12, %v5668_v21 }
  0x3b   :  { %v2968_v59 = vadd.f32 %v4991_v53, %v2448_v55  ;;  %v2970_v60 = vadd.f32 %v4993_v54, %v2450_v56  ;;  %v5247_v61 = vsel %vm3624_vm14, 1.0, %v5591_v36  ;;  %v5249_v62 = vsel %vm3626_vm15, 1.0, %v5591_v36 }
  0x3c   :  { %v4415_v63 = vsel %vm176_vm0, 1.0, %v5591_v36  ;;  %v4417_v0 = vsel %vm178_vm1, 1.0, %v5591_v36  ;;  %vm568_vm2 = vcmp.eq.s32.totalorder %v5646_v11, %v5672_v23  ;;  %vm570_vm3 = vcmp.eq.s32.totalorder %v5649_v12, %v5672_v23 }
  0x3d   :  { %v3488_v2 = vadd.f32 %v5119_v57, %v2968_v59  ;;  %v3490_v3 = vadd.f32 %v5121_v58, %v2970_v60  ;;  %v4543_v4 = vsel %vm568_vm2, 1.0, %v5591_v36  ;;  %v4545_v5 = vsel %vm570_vm3, 1.0, %v5591_v36 }
  0x3e   :  { %v952_v6 = vadd.f32 %v4543_v4, %v4415_v63  ;;  %v954_v7 = vadd.f32 %v4545_v5, %v4417_v0  ;;  %vm1088_vm4 = vcmp.eq.s32.totalorder %v5646_v11, %v5676_v25  ;;  %vm1090_vm5 = vcmp.eq.s32.totalorder %v5649_v12, %v5676_v25 }
  0x3f   :  { %v4008_v8 = vadd.f32 %v5247_v61, %v3488_v2  ;;  %v4010_v9 = vadd.f32 %v5249_v62, %v3490_v3  ;;  %v4671_v14 = vsel %vm1088_vm4, 1.0, %v5591_v36  ;;  %v4673_v15 = vsel %vm1090_vm5, 1.0, %v5591_v36 }
  0x40   :  { %v1472_v37 = vadd.f32 %v4671_v14, %v952_v6  ;;  %v1474_v38 = vadd.f32 %v4673_v15, %v954_v7  ;;  %vm1608_vm6 = vcmp.eq.s32.totalorder %v5646_v11, %v5680_v27  ;;  %vm1610_vm7 = vcmp.eq.s32.totalorder %v5649_v12, %v5680_v27 }
  0x41   :  { %v5375_v39 = vpack.c.bf16 %v4010_v9, %v4008_v8  ;;  %v4799_v40 = vsel %vm1608_vm6, 1.0, %v5591_v36  ;;  %v4801_v41 = vsel %vm1610_vm7, 1.0, %v5591_v36  ;;  %vm2128_vm8 = vcmp.eq.s32.totalorder %v5646_v11, %v5684_v29 }
  0x42   :  { %v1992_v42 = vadd.f32 %v4799_v40, %v1472_v37  ;;  %v1994_v43 = vadd.f32 %v4801_v41, %v1474_v38  ;;  %vm2130_vm9 = vcmp.eq.s32.totalorder %v5649_v12, %v5684_v29  ;;  %v4927_v44 = vsel %vm2128_vm8, 1.0, %v5591_v36 }
  0x43   :  { %5376 = vmatprep.subr.bf16.mxu1 %v5375_v39  ;;  %v4929_v45 = vsel %vm2130_vm9, 1.0, %v5591_v36  ;;  %vm2648_vm10 = vcmp.eq.s32.totalorder %v5646_v11, %v5688_v31  ;;  %vm2650_vm11 = vcmp.eq.s32.totalorder %v5649_v12, %v5688_v31  ;;  %vm3168_vm12 = vcmp.eq.s32.totalorder %v5646_v11, %v5692_v33 }
  0x44   :  { %v2512_v46 = vadd.f32 %v4927_v44, %v1992_v42  ;;  %v2514_v47 = vadd.f32 %v4929_v45, %v1994_v43  ;;  %v5055_v48 = vsel %vm2648_vm10, 1.0, %v5591_v36  ;;  %v5057_v49 = vsel %vm2650_vm11, 1.0, %v5591_v36 }
  0x45   :  { %vm3170_vm13 = vcmp.eq.s32.totalorder %v5649_v12, %v5692_v33  ;;  %v5183_v50 = vsel %vm3168_vm12, 1.0, %v5591_v36  ;;  %vm3688_vm14 = vcmp.eq.s32.totalorder %v5646_v11, %v5696_v35  ;;  %vm3690_vm15 = vcmp.eq.s32.totalorder %v5649_v12, %v5696_v35 }
  0x46   :  { %v3032_v51 = vadd.f32 %v5055_v48, %v2512_v46  ;;  %v3034_v52 = vadd.f32 %v5057_v49, %v2514_v47  ;;  %v5185_v53 = vsel %vm3170_vm13, 1.0, %v5591_v36  ;;  %v5311_v54 = vsel %vm3688_vm14, 1.0, %v5591_v36 }
  0x47   :  { %v5313_v55 = vsel %vm3690_vm15, 1.0, %v5591_v36  ;;  %vm111_vm0 = vcmp.eq.s32.totalorder %v5632_v1, %v5666_v20  ;;  %vm113_vm1 = vcmp.eq.s32.totalorder %v5643_v10, %v5666_v20  ;;  %vm503_vm2 = vcmp.eq.s32.totalorder %v5632_v1, %v5670_v22 }
  0x48   :  { %v3552_v56 = vadd.f32 %v5183_v50, %v3032_v51  ;;  %v3554_v57 = vadd.f32 %v5185_v53, %v3034_v52  ;;  %v4350_v58 = vsel %vm111_vm0, 1.0, %v5591_v36  ;;  %v4352_v59 = vsel %vm113_vm1, 1.0, %v5591_v36 }
  0x49   :  { %vm505_vm3 = vcmp.eq.s32.totalorder %v5643_v10, %v5670_v22  ;;  %v4478_v60 = vsel %vm503_vm2, 1.0, %v5591_v36  ;;  %vm1023_vm4 = vcmp.eq.s32.totalorder %v5632_v1, %v5674_v24  ;;  %vm1025_vm5 = vcmp.eq.s32.totalorder %v5643_v10, %v5674_v24 }
  0x4a   :  { %v4072_v61 = vadd.f32 %v5311_v54, %v3552_v56  ;;  %v4074_v62 = vadd.f32 %v5313_v55, %v3554_v57  ;;  %v4480_v63 = vsel %vm505_vm3, 1.0, %v5591_v36  ;;  %v887_v0 = vadd.f32 %v4478_v60, %v4350_v58 }
  0x4b   :  { %v889_v2 = vadd.f32 %v4480_v63, %v4352_v59  ;;  %v4606_v3 = vsel %vm1023_vm4, 1.0, %v5591_v36  ;;  %v4608_v4 = vsel %vm1025_vm5, 1.0, %v5591_v36  ;;  %vm1543_vm6 = vcmp.eq.s32.totalorder %v5632_v1, %v5678_v26 }
  0x4c   :  { %v5439_v5 = vpack.c.bf16 %v4074_v62, %v4072_v61  ;;  %v1407_v6 = vadd.f32 %v4606_v3, %v887_v0  ;;  %vm1545_vm7 = vcmp.eq.s32.totalorder %v5643_v10, %v5678_v26  ;;  %v4734_v7 = vsel %vm1543_vm6, 1.0, %v5591_v36 }
  0x4d   :  { %v1409_v8 = vadd.f32 %v4608_v4, %v889_v2  ;;  %v4736_v9 = vsel %vm1545_vm7, 1.0, %v5591_v36  ;;  %vm2063_vm8 = vcmp.eq.s32.totalorder %v5632_v1, %v5682_v28  ;;  %vm2065_vm9 = vcmp.eq.s32.totalorder %v5643_v10, %v5682_v28 }
  0x4e   :  { %5440 = vmatprep.subr.bf16.mxu0 %v5439_v5  ;;  %v1927_v14 = vadd.f32 %v4734_v7, %v1407_v6  ;;  %v4862_v15 = vsel %vm2063_vm8, 1.0, %v5591_v36  ;;  %v4864_v37 = vsel %vm2065_vm9, 1.0, %v5591_v36  ;;  %vm2583_vm10 = vcmp.eq.s32.totalorder %v5632_v1, %v5686_v30 }
  0x4f   :  { %v1929_v38 = vadd.f32 %v4736_v9, %v1409_v8  ;;  %vm2585_vm11 = vcmp.eq.s32.totalorder %v5643_v10, %v5686_v30  ;;  %v4990_v39 = vsel %vm2583_vm10, 1.0, %v5591_v36  ;;  %vm3103_vm12 = vcmp.eq.s32.totalorder %v5632_v1, %v5690_v32 }
  0x50   :  { %v2447_v40 = vadd.f32 %v4862_v15, %v1927_v14  ;;  %v4992_v41 = vsel %vm2585_vm11, 1.0, %v5591_v36  ;;  %vm3105_vm13 = vcmp.eq.s32.totalorder %v5643_v10, %v5690_v32  ;;  %v5118_v42 = vsel %vm3103_vm12, 1.0, %v5591_v36 }
  0x51   :  { %v2449_v43 = vadd.f32 %v4864_v37, %v1929_v38  ;;  %v5120_v44 = vsel %vm3105_vm13, 1.0, %v5591_v36  ;;  %vm3623_vm14 = vcmp.eq.s32.totalorder %v5632_v1, %v5694_v34  ;;  %vm3625_vm15 = vcmp.eq.s32.totalorder %v5643_v10, %v5694_v34 }
  0x52   :  { %v2967_v45 = vadd.f32 %v4990_v39, %v2447_v40  ;;  %v5246_v46 = vsel %vm3623_vm14, 1.0, %v5591_v36  ;;  %v5248_v47 = vsel %vm3625_vm15, 1.0, %v5591_v36  ;;  %vm175_vm0 = vcmp.eq.s32.totalorder %v5646_v11, %v5666_v20 }
  0x53   :  { %v2969_v48 = vadd.f32 %v4992_v41, %v2449_v43  ;;  %vm177_vm1 = vcmp.eq.s32.totalorder %v5649_v12, %v5666_v20  ;;  %v4414_v49 = vsel %vm175_vm0, 1.0, %v5591_v36  ;;  %vm567_vm2 = vcmp.eq.s32.totalorder %v5646_v11, %v5670_v22 }
  0x54   :  { %v3487_v50 = vadd.f32 %v5118_v42, %v2967_v45  ;;  %v4416_v10 = vsel %vm177_vm1, 1.0, %v5591_v36  ;;  %vm569_vm3 = vcmp.eq.s32.totalorder %v5649_v12, %v5670_v22  ;;  %v4542_v51 = vsel %vm567_vm2, 1.0, %v5591_v36 }
  0x55   :  { %v3489_v52 = vadd.f32 %v5120_v44, %v2969_v48  ;;  %v4544_v53 = vsel %vm569_vm3, 1.0, %v5591_v36  ;;  %v951_v54 = vadd.f32 %v4542_v51, %v4414_v49  ;;  %vm1087_vm4 = vcmp.eq.s32.totalorder %v5646_v11, %v5674_v24 }
  0x56   :  { %v4007_v55 = vadd.f32 %v5246_v46, %v3487_v50  ;;  %v953_v56 = vadd.f32 %v4544_v53, %v4416_v10  ;;  %vm1089_vm5 = vcmp.eq.s32.totalorder %v5649_v12, %v5674_v24  ;;  %v4670_v57 = vsel %vm1087_vm4, 1.0, %v5591_v36 }
  0x57   :  { %v4009_v58 = vadd.f32 %v5248_v47, %v3489_v52  ;;  %v4672_v59 = vsel %vm1089_vm5, 1.0, %v5591_v36  ;;  %v1471_v60 = vadd.f32 %v4670_v57, %v951_v54  ;;  %vm1607_vm6 = vcmp.eq.s32.totalorder %v5646_v11, %v5678_v26 }
  0x58   :  { %v1473_v61 = vadd.f32 %v4672_v59, %v953_v56  ;;  %vm1609_vm7 = vcmp.eq.s32.totalorder %v5649_v12, %v5678_v26  ;;  %v4798_v62 = vsel %vm1607_vm6, 1.0, %v5591_v36  ;;  %vm2127_vm8 = vcmp.eq.s32.totalorder %v5646_v11, %v5682_v28 }
  0x59   :  { %v5377_v63 = vpack.c.bf16 %v4009_v58, %v4007_v55  ;;  %v4800_v0 = vsel %vm1609_vm7, 1.0, %v5591_v36  ;;  %v1991_v2 = vadd.f32 %v4798_v62, %v1471_v60  ;;  %vm2129_vm9 = vcmp.eq.s32.totalorder %v5649_v12, %v5682_v28 }
  0x5a   :  { %v1993_v3 = vadd.f32 %v4800_v0, %v1473_v61  ;;  %v4926_v4 = vsel %vm2127_vm8, 1.0, %v5591_v36  ;;  %v4928_v5 = vsel %vm2129_vm9, 1.0, %v5591_v36  ;;  %vm2647_vm10 = vcmp.eq.s32.totalorder %v5646_v11, %v5686_v30 }
  0x5b   :  { %5378 = vmatpush1.bf16.msra.mxu1 %v5377_v63  ;;  %v2511_v6 = vadd.f32 %v4926_v4, %v1991_v2  ;;  %vm2649_vm11 = vcmp.eq.s32.totalorder %v5649_v12, %v5686_v30  ;;  %v5054_v7 = vsel %vm2647_vm10, 1.0, %v5591_v36  ;;  %vm3167_vm12 = vcmp.eq.s32.totalorder %v5646_v11, %v5690_v32 }
  0x5c   :  { %v2513_v8 = vadd.f32 %v4928_v5, %v1993_v3  ;;  %v5056_v9 = vsel %vm2649_vm11, 1.0, %v5591_v36  ;;  %vm3169_vm13 = vcmp.eq.s32.totalorder %v5649_v12, %v5690_v32  ;;  %v5182_v14 = vsel %vm3167_vm12, 1.0, %v5591_v36 }
  0x5d   :  { %v3031_v15 = vadd.f32 %v5054_v7, %v2511_v6  ;;  %v5184_v37 = vsel %vm3169_vm13, 1.0, %v5591_v36  ;;  %vm3687_vm14 = vcmp.eq.s32.totalorder %v5646_v11, %v5694_v34  ;;  %vm3689_vm15 = vcmp.eq.s32.totalorder %v5649_v12, %v5694_v34 }
  0x5e   :  { %v3033_v38 = vadd.f32 %v5056_v9, %v2513_v8  ;;  %v5310_v39 = vsel %vm3687_vm14, 1.0, %v5591_v36  ;;  %v5312_v40 = vsel %vm3689_vm15, 1.0, %v5591_v36  ;;  %vm116_vm0 = vcmp.eq.s32.totalorder %v5652_v13, %v5668_v21 }
  0x5f   :  { %v3551_v41 = vadd.f32 %v5182_v14, %v3031_v15  ;;  %vm118_vm1 = vcmp.eq.s32.totalorder %v5655_v16, %v5668_v21  ;;  %v4355_v42 = vsel %vm116_vm0, 1.0, %v5591_v36  ;;  %vm508_vm2 = vcmp.eq.s32.totalorder %v5652_v13, %v5672_v23 }
  0x60   :  { %v3553_v11 = vadd.f32 %v5184_v37, %v3033_v38  ;;  %v4357_v12 = vsel %vm118_vm1, 1.0, %v5591_v36  ;;  %vm510_vm3 = vcmp.eq.s32.totalorder %v5655_v16, %v5672_v23  ;;  %v4483_v43 = vsel %vm508_vm2, 1.0, %v5591_v36 }
  0x61   :  { %v4071_v44 = vadd.f32 %v5310_v39, %v3551_v41  ;;  %v4485_v45 = vsel %vm510_vm3, 1.0, %v5591_v36  ;;  %v892_v46 = vadd.f32 %v4483_v43, %v4355_v42  ;;  %vm1028_vm4 = vcmp.eq.s32.totalorder %v5652_v13, %v5676_v25 }
  0x62   :  { %v4073_v47 = vadd.f32 %v5312_v40, %v3553_v11  ;;  %v894_v48 = vadd.f32 %v4485_v45, %v4357_v12  ;;  %vm1030_vm5 = vcmp.eq.s32.totalorder %v5655_v16, %v5676_v25  ;;  %v4611_v49 = vsel %vm1028_vm4, 1.0, %v5591_v36 }
  0x63   :  { %v4613_v50 = vsel %vm1030_vm5, 1.0, %v5591_v36  ;;  %v1412_v10 = vadd.f32 %v4611_v49, %v892_v46  ;;  %vm1548_vm6 = vcmp.eq.s32.totalorder %v5652_v13, %v5680_v27  ;;  %vm1550_vm7 = vcmp.eq.s32.totalorder %v5655_v16, %v5680_v27 }
  0x64   :  { %v5441_v51 = vpack.c.bf16 %v4073_v47, %v4071_v44  ;;  %v1414_v52 = vadd.f32 %v4613_v50, %v894_v48  ;;  %v4739_v53 = vsel %vm1548_vm6, 1.0, %v5591_v36  ;;  %v4741_v54 = vsel %vm1550_vm7, 1.0, %v5591_v36 }
  0x65   :  { %v1932_v55 = vadd.f32 %v4739_v53, %v1412_v10  ;;  %vm2068_vm8 = vcmp.eq.s32.totalorder %v5652_v13, %v5684_v29  ;;  %vm2070_vm9 = vcmp.eq.s32.totalorder %v5655_v16, %v5684_v29  ;;  %vm2588_vm10 = vcmp.eq.s32.totalorder %v5652_v13, %v5688_v31 }
  0x66   :  { %5442 = vmatpush1.bf16.msra.mxu0 %v5441_v51  ;;  %v1934_v56 = vadd.f32 %v4741_v54, %v1414_v52  ;;  %v4867_v57 = vsel %vm2068_vm8, 1.0, %v5591_v36  ;;  %v4869_v58 = vsel %vm2070_vm9, 1.0, %v5591_v36  ;;  %vm2590_vm11 = vcmp.eq.s32.totalorder %v5655_v16, %v5688_v31 }
  0x67   :  { %v2452_v59 = vadd.f32 %v4867_v57, %v1932_v55  ;;  %v4995_v60 = vsel %vm2588_vm10, 1.0, %v5591_v36  ;;  %v4997_v61 = vsel %vm2590_vm11, 1.0, %v5591_v36  ;;  %vm3108_vm12 = vcmp.eq.s32.totalorder %v5652_v13, %v5692_v33 }
  0x68   :  { %v2454_v62 = vadd.f32 %v4869_v58, %v1934_v56  ;;  %vm3110_vm13 = vcmp.eq.s32.totalorder %v5655_v16, %v5692_v33  ;;  %v5123_v63 = vsel %vm3108_vm12, 1.0, %v5591_v36  ;;  %vm3628_vm14 = vcmp.eq.s32.totalorder %v5652_v13, %v5696_v35 }
  0x69   :  { %v2972_v0 = vadd.f32 %v4995_v60, %v2452_v59  ;;  %v5125_v2 = vsel %vm3110_vm13, 1.0, %v5591_v36  ;;  %vm3630_vm15 = vcmp.eq.s32.totalorder %v5655_v16, %v5696_v35  ;;  %v5251_v3 = vsel %vm3628_vm14, 1.0, %v5591_v36 }
  0x6a   :  { %v2974_v4 = vadd.f32 %v4997_v61, %v2454_v62  ;;  %v5253_v5 = vsel %vm3630_vm15, 1.0, %v5591_v36  ;;  %vm180_vm0 = vcmp.eq.s32.totalorder %v5658_v17, %v5668_v21  ;;  %vm182_vm1 = vcmp.eq.s32.totalorder %v5661_v18, %v5668_v21 }
  0x6b   :  { %v3492_v6 = vadd.f32 %v5123_v63, %v2972_v0  ;;  %v4419_v7 = vsel %vm180_vm0, 1.0, %v5591_v36  ;;  %v4421_v8 = vsel %vm182_vm1, 1.0, %v5591_v36  ;;  %vm572_vm2 = vcmp.eq.s32.totalorder %v5658_v17, %v5672_v23 }
  0x6c   :  { %v3494_v9 = vadd.f32 %v5125_v2, %v2974_v4  ;;  %vm574_vm3 = vcmp.eq.s32.totalorder %v5661_v18, %v5672_v23  ;;  %v4547_v14 = vsel %vm572_vm2, 1.0, %v5591_v36  ;;  %vm1092_vm4 = vcmp.eq.s32.totalorder %v5658_v17, %v5676_v25 }
  0x6d   :  { %v4012_v15 = vadd.f32 %v5251_v3, %v3492_v6  ;;  %v4549_v37 = vsel %vm574_vm3, 1.0, %v5591_v36  ;;  %v956_v38 = vadd.f32 %v4547_v14, %v4419_v7  ;;  %vm1094_vm5 = vcmp.eq.s32.totalorder %v5661_v18, %v5676_v25 }
  0x6e   :  { %v4014_v39 = vadd.f32 %v5253_v5, %v3494_v9  ;;  %v958_v40 = vadd.f32 %v4549_v37, %v4421_v8  ;;  %v4675_v41 = vsel %vm1092_vm4, 1.0, %v5591_v36  ;;  %v4677_v42 = vsel %vm1094_vm5, 1.0, %v5591_v36 }
  0x6f   :  { %v1476_v11 = vadd.f32 %v4675_v41, %v956_v38  ;;  %vm1612_vm6 = vcmp.eq.s32.totalorder %v5658_v17, %v5680_v27  ;;  %vm1614_vm7 = vcmp.eq.s32.totalorder %v5661_v18, %v5680_v27  ;;  %vm2132_vm8 = vcmp.eq.s32.totalorder %v5658_v17, %v5684_v29 }
  0x70   :  { %v5379_v12 = vpack.c.bf16 %v4014_v39, %v4012_v15  ;;  %v1478_v43 = vadd.f32 %v4677_v42, %v958_v40  ;;  %v4803_v44 = vsel %vm1612_vm6, 1.0, %v5591_v36  ;;  %v4805_v45 = vsel %vm1614_vm7, 1.0, %v5591_v36 }
  0x71   :  { %v1996_v46 = vadd.f32 %v4803_v44, %v1476_v11  ;;  %vm2134_vm9 = vcmp.eq.s32.totalorder %v5661_v18, %v5684_v29  ;;  %v4931_v47 = vsel %vm2132_vm8, 1.0, %v5591_v36  ;;  %vm2652_vm10 = vcmp.eq.s32.totalorder %v5658_v17, %v5688_v31 }
  0x72   :  { %5380 = vmatprep.subr.bf16.mxu1 %v5379_v12  ;;  %v1998_v48 = vadd.f32 %v4805_v45, %v1478_v43  ;;  %v4933_v49 = vsel %vm2134_vm9, 1.0, %v5591_v36  ;;  %vm2654_vm11 = vcmp.eq.s32.totalorder %v5661_v18, %v5688_v31  ;;  %v5059_v50 = vsel %vm2652_vm10, 1.0, %v5591_v36 }
  0x73   :  { %v2516_v10 = vadd.f32 %v4931_v47, %v1996_v46  ;;  %v5061_v51 = vsel %vm2654_vm11, 1.0, %v5591_v36  ;;  %vm3172_vm12 = vcmp.eq.s32.totalorder %v5658_v17, %v5692_v33  ;;  %vm3174_vm13 = vcmp.eq.s32.totalorder %v5661_v18, %v5692_v33 }
  0x74   :  { %v2518_v52 = vadd.f32 %v4933_v49, %v1998_v48  ;;  %v5187_v53 = vsel %vm3172_vm12, 1.0, %v5591_v36  ;;  %v5189_v54 = vsel %vm3174_vm13, 1.0, %v5591_v36  ;;  %vm3692_vm14 = vcmp.eq.s32.totalorder %v5658_v17, %v5696_v35 }
  0x75   :  { %v3036_v55 = vadd.f32 %v5059_v50, %v2516_v10  ;;  %vm3694_vm15 = vcmp.eq.s32.totalorder %v5661_v18, %v5696_v35  ;;  %v5315_v56 = vsel %vm3692_vm14, 1.0, %v5591_v36  ;;  %vm115_vm0 = vcmp.eq.s32.totalorder %v5652_v13, %v5666_v20 }
  0x76   :  { %v3038_v57 = vadd.f32 %v5061_v51, %v2518_v52  ;;  %v5317_v58 = vsel %vm3694_vm15, 1.0, %v5591_v36  ;;  %vm117_vm1 = vcmp.eq.s32.totalorder %v5655_v16, %v5666_v20  ;;  %v4354_v59 = vsel %vm115_vm0, 1.0, %v5591_v36 }
  0x77   :  { %v3556_v60 = vadd.f32 %v5187_v53, %v3036_v55  ;;  %v4356_v61 = vsel %vm117_vm1, 1.0, %v5591_v36  ;;  %vm507_vm2 = vcmp.eq.s32.totalorder %v5652_v13, %v5670_v22  ;;  %vm509_vm3 = vcmp.eq.s32.totalorder %v5655_v16, %v5670_v22 }
  0x78   :  { %v3558_v62 = vadd.f32 %v5189_v54, %v3038_v57  ;;  %v4482_v63 = vsel %vm507_vm2, 1.0, %v5591_v36  ;;  %v4484_v0 = vsel %vm509_vm3, 1.0, %v5591_v36  ;;  %vm1027_vm4 = vcmp.eq.s32.totalorder %v5652_v13, %v5674_v24 }
  0x79   :  { %v4076_v2 = vadd.f32 %v5315_v56, %v3556_v60  ;;  %v891_v3 = vadd.f32 %v4482_v63, %v4354_v59  ;;  %v893_v4 = vadd.f32 %v4484_v0, %v4356_v61  ;;  %vm1029_vm5 = vcmp.eq.s32.totalorder %v5655_v16, %v5674_v24 }
  0x7a   :  { %v4078_v5 = vadd.f32 %v5317_v58, %v3558_v62  ;;  %v4610_v6 = vsel %vm1027_vm4, 1.0, %v5591_v36  ;;  %v4612_v7 = vsel %vm1029_vm5, 1.0, %v5591_v36  ;;  %vm1547_vm6 = vcmp.eq.s32.totalorder %v5652_v13, %v5678_v26 }
  0x7b   :  { %v1411_v8 = vadd.f32 %v4610_v6, %v891_v3  ;;  %v1413_v9 = vadd.f32 %v4612_v7, %v893_v4  ;;  %vm1549_vm7 = vcmp.eq.s32.totalorder %v5655_v16, %v5678_v26  ;;  %v4738_v14 = vsel %vm1547_vm6, 1.0, %v5591_v36 }
  0x7c   :  { %v5443_v15 = vpack.c.bf16 %v4078_v5, %v4076_v2  ;;  %v4740_v37 = vsel %vm1549_vm7, 1.0, %v5591_v36  ;;  %vm2067_vm8 = vcmp.eq.s32.totalorder %v5652_v13, %v5682_v28  ;;  %vm2069_vm9 = vcmp.eq.s32.totalorder %v5655_v16, %v5682_v28 }
  0x7d   :  { %v1931_v38 = vadd.f32 %v4738_v14, %v1411_v8  ;;  %v1933_v39 = vadd.f32 %v4740_v37, %v1413_v9  ;;  %v4866_v40 = vsel %vm2067_vm8, 1.0, %v5591_v36  ;;  %v4868_v41 = vsel %vm2069_vm9, 1.0, %v5591_v36 }
  0x7e   :  { %5444 = vmatprep.subr.bf16.mxu0 %v5443_v15  ;;  %vm2587_vm10 = vcmp.eq.s32.totalorder %v5652_v13, %v5686_v30  ;;  %vm2589_vm11 = vcmp.eq.s32.totalorder %v5655_v16, %v5686_v30  ;;  %vm3107_vm12 = vcmp.eq.s32.totalorder %v5652_v13, %v5690_v32  ;;  %vm3109_vm13 = vcmp.eq.s32.totalorder %v5655_v16, %v5690_v32 }
  0x7f   :  { %v2451_v42 = vadd.f32 %v4866_v40, %v1931_v38  ;;  %v2453_v11 = vadd.f32 %v4868_v41, %v1933_v39  ;;  %v4994_v12 = vsel %vm2587_vm10, 1.0, %v5591_v36  ;;  %v4996_v43 = vsel %vm2589_vm11, 1.0, %v5591_v36 }
  0x80   :  { %v5122_v44 = vsel %vm3107_vm12, 1.0, %v5591_v36  ;;  %v5124_v45 = vsel %vm3109_vm13, 1.0, %v5591_v36  ;;  %vm3627_vm14 = vcmp.eq.s32.totalorder %v5652_v13, %v5694_v34  ;;  %vm3629_vm15 = vcmp.eq.s32.totalorder %v5655_v16, %v5694_v34 }
  0x81   :  { %v2971_v46 = vadd.f32 %v4994_v12, %v2451_v42  ;;  %v2973_v47 = vadd.f32 %v4996_v43, %v2453_v11  ;;  %v5250_v48 = vsel %vm3627_vm14, 1.0, %v5591_v36  ;;  %v5252_v49 = vsel %vm3629_vm15, 1.0, %v5591_v36 }
  0x82   :  { %vm179_vm0 = vcmp.eq.s32.totalorder %v5658_v17, %v5666_v20  ;;  %vm181_vm1 = vcmp.eq.s32.totalorder %v5661_v18, %v5666_v20  ;;  %vm571_vm2 = vcmp.eq.s32.totalorder %v5658_v17, %v5670_v22  ;;  %vm573_vm3 = vcmp.eq.s32.totalorder %v5661_v18, %v5670_v22 }
  0x83   :  { %v3491_v13 = vadd.f32 %v5122_v44, %v2971_v46  ;;  %v3493_v16 = vadd.f32 %v5124_v45, %v2973_v47  ;;  %v4418_v50 = vsel %vm179_vm0, 1.0, %v5591_v36  ;;  %v4420_v10 = vsel %vm181_vm1, 1.0, %v5591_v36 }
  0x84   :  { %v4546_v51 = vsel %vm571_vm2, 1.0, %v5591_v36  ;;  %v4548_v52 = vsel %vm573_vm3, 1.0, %v5591_v36  ;;  %vm1091_vm4 = vcmp.eq.s32.totalorder %v5658_v17, %v5674_v24  ;;  %vm1093_vm5 = vcmp.eq.s32.totalorder %v5661_v18, %v5674_v24 }
  0x85   :  { %v4011_v53 = vadd.f32 %v5250_v48, %v3491_v13  ;;  %v4013_v54 = vadd.f32 %v5252_v49, %v3493_v16  ;;  %v955_v55 = vadd.f32 %v4546_v51, %v4418_v50  ;;  %v957_v56 = vadd.f32 %v4548_v52, %v4420_v10 }
  0x86   :  { %v4674_v57 = vsel %vm1091_vm4, 1.0, %v5591_v36  ;;  %v4676_v58 = vsel %vm1093_vm5, 1.0, %v5591_v36  ;;  %vm1611_vm6 = vcmp.eq.s32.totalorder %v5658_v17, %v5678_v26  ;;  %vm1613_vm7 = vcmp.eq.s32.totalorder %v5661_v18, %v5678_v26 }
  0x87   :  { %v5381_v59 = vpack.c.bf16 %v4013_v54, %v4011_v53  ;;  %v1475_v60 = vadd.f32 %v4674_v57, %v955_v55  ;;  %v1477_v61 = vadd.f32 %v4676_v58, %v957_v56  ;;  %v4802_v62 = vsel %vm1611_vm6, 1.0, %v5591_v36 }
  0x88   :  { %v4804_v63 = vsel %vm1613_vm7, 1.0, %v5591_v36  ;;  %vm2131_vm8 = vcmp.eq.s32.totalorder %v5658_v17, %v5682_v28  ;;  %vm2133_vm9 = vcmp.eq.s32.totalorder %v5661_v18, %v5682_v28  ;;  %vm2651_vm10 = vcmp.eq.s32.totalorder %v5658_v17, %v5686_v30 }
  0x89   :  { %5382 = vmatpush1.bf16.msra.mxu1 %v5381_v59  ;;  %v1995_v0 = vadd.f32 %v4802_v62, %v1475_v60  ;;  %v1997_v2 = vadd.f32 %v4804_v63, %v1477_v61  ;;  %v4930_v3 = vsel %vm2131_vm8, 1.0, %v5591_v36  ;;  %v4932_v4 = vsel %vm2133_vm9, 1.0, %v5591_v36 }
  0x8a   :  { %vm2653_vm11 = vcmp.eq.s32.totalorder %v5661_v18, %v5686_v30  ;;  %v5058_v5 = vsel %vm2651_vm10, 1.0, %v5591_v36  ;;  %vm3171_vm12 = vcmp.eq.s32.totalorder %v5658_v17, %v5690_v32  ;;  %vm3173_vm13 = vcmp.eq.s32.totalorder %v5661_v18, %v5690_v32 }
  0x8b   :  { %v2515_v6 = vadd.f32 %v4930_v3, %v1995_v0  ;;  %v2517_v7 = vadd.f32 %v4932_v4, %v1997_v2  ;;  %v5060_v8 = vsel %vm2653_vm11, 1.0, %v5591_v36  ;;  %v5186_v9 = vsel %vm3171_vm12, 1.0, %v5591_v36 }
  0x8c   :  { %v5188_v14 = vsel %vm3173_vm13, 1.0, %v5591_v36  ;;  %vm3691_vm14 = vcmp.eq.s32.totalorder %v5658_v17, %v5694_v34  ;;  %vm3693_vm15 = vcmp.eq.s32.totalorder %v5661_v18, %v5694_v34  ;;  %v6081_v15 = vadd.s32 40, %v5632_v1 }
  0x8d   :  { %v3035_v37 = vadd.f32 %v5058_v5, %v2515_v6  ;;  %v3037_v38 = vadd.f32 %v5060_v8, %v2517_v7  ;;  %v5314_v39 = vsel %vm3691_vm14, 1.0, %v5591_v36  ;;  %v5316_v40 = vsel %vm3693_vm15, 1.0, %v5591_v36 }
  0x8e   :  { %vm120_vm0 = vcmp.eq.s32.totalorder %v5664_v19, %v5668_v21  ;;  %vm122_vm1 = vcmp.eq.s32.totalorder %v6081_v15, %v5668_v21  ;;  %vm512_vm2 = vcmp.eq.s32.totalorder %v5664_v19, %v5672_v23  ;;  %vm514_vm3 = vcmp.eq.s32.totalorder %v6081_v15, %v5672_v23 }
  0x8f   :  { %v3555_v17 = vadd.f32 %v5186_v9, %v3035_v37  ;;  %v3557_v18 = vadd.f32 %v5188_v14, %v3037_v38  ;;  %v4359_v41 = vsel %vm120_vm0, 1.0, %v5591_v36  ;;  %v4361_v42 = vsel %vm122_vm1, 1.0, %v5591_v36 }
  0x90   :  { %v4487_v11 = vsel %vm512_vm2, 1.0, %v5591_v36  ;;  %v4489_v12 = vsel %vm514_vm3, 1.0, %v5591_v36  ;;  %vm1032_vm4 = vcmp.eq.s32.totalorder %v5664_v19, %v5676_v25  ;;  %vm1034_vm5 = vcmp.eq.s32.totalorder %v6081_v15, %v5676_v25 }
  0x91   :  { %v4075_v43 = vadd.f32 %v5314_v39, %v3555_v17  ;;  %v4077_v44 = vadd.f32 %v5316_v40, %v3557_v18  ;;  %v896_v45 = vadd.f32 %v4487_v11, %v4359_v41  ;;  %v898_v46 = vadd.f32 %v4489_v12, %v4361_v42 }
  0x92   :  { %v4615_v47 = vsel %vm1032_vm4, 1.0, %v5591_v36  ;;  %v4617_v48 = vsel %vm1034_vm5, 1.0, %v5591_v36  ;;  %vm1552_vm6 = vcmp.eq.s32.totalorder %v5664_v19, %v5680_v27  ;;  %vm1554_vm7 = vcmp.eq.s32.totalorder %v6081_v15, %v5680_v27 }
  0x93   :  { %v5445_v49 = vpack.c.bf16 %v4077_v44, %v4075_v43  ;;  %v1416_v13 = vadd.f32 %v4615_v47, %v896_v45  ;;  %v1418_v16 = vadd.f32 %v4617_v48, %v898_v46  ;;  %v4743_v50 = vsel %vm1552_vm6, 1.0, %v5591_v36 }
  0x94   :  { %v4745_v10 = vsel %vm1554_vm7, 1.0, %v5591_v36  ;;  %vm2072_vm8 = vcmp.eq.s32.totalorder %v5664_v19, %v5684_v29  ;;  %vm2074_vm9 = vcmp.eq.s32.totalorder %v6081_v15, %v5684_v29  ;;  %vm2592_vm10 = vcmp.eq.s32.totalorder %v5664_v19, %v5688_v31 }
  0x95   :  { %5446 = vmatpush1.bf16.msra.mxu0 %v5445_v49  ;;  %v1936_v51 = vadd.f32 %v4743_v50, %v1416_v13  ;;  %v1938_v52 = vadd.f32 %v4745_v10, %v1418_v16  ;;  %v4871_v53 = vsel %vm2072_vm8, 1.0, %v5591_v36  ;;  %v4873_v54 = vsel %vm2074_vm9, 1.0, %v5591_v36 }
  0x96   :  { %vm2594_vm11 = vcmp.eq.s32.totalorder %v6081_v15, %v5688_v31  ;;  %v4999_v55 = vsel %vm2592_vm10, 1.0, %v5591_v36  ;;  %vm3112_vm12 = vcmp.eq.s32.totalorder %v5664_v19, %v5692_v33  ;;  %vm3114_vm13 = vcmp.eq.s32.totalorder %v6081_v15, %v5692_v33 }
  0x97   :  { %v2456_v56 = vadd.f32 %v4871_v53, %v1936_v51  ;;  %v2458_v57 = vadd.f32 %v4873_v54, %v1938_v52  ;;  %v5001_v58 = vsel %vm2594_vm11, 1.0, %v5591_v36  ;;  %v5127_v59 = vsel %vm3112_vm12, 1.0, %v5591_v36 }
  0x98   :  { %v5129_v60 = vsel %vm3114_vm13, 1.0, %v5591_v36  ;;  %vm3632_vm14 = vcmp.eq.s32.totalorder %v5664_v19, %v5696_v35  ;;  %vm3634_vm15 = vcmp.eq.s32.totalorder %v6081_v15, %v5696_v35  ;;  %v6132_v61 = vadd.s32 288, %v5632_v1 }
  0x99   :  { %v2976_v62 = vadd.f32 %v4999_v55, %v2456_v56  ;;  %v2978_v63 = vadd.f32 %v5001_v58, %v2458_v57  ;;  %v5255_v0 = vsel %vm3632_vm14, 1.0, %v5591_v36  ;;  %v5257_v2 = vsel %vm3634_vm15, 1.0, %v5591_v36 }
  0x9a   :  { %v6137_v3 = vadd.s32 296, %v5632_v1  ;;  %vm184_vm0 = vcmp.eq.s32.totalorder %v6132_v61, %v5668_v21  ;;  %vm576_vm1 = vcmp.eq.s32.totalorder %v6132_v61, %v5672_v23  ;;  %vm1096_vm2 = vcmp.eq.s32.totalorder %v6132_v61, %v5676_v25 }
  0x9b   :  { %v3496_v4 = vadd.f32 %v5127_v59, %v2976_v62  ;;  %v3498_v5 = vadd.f32 %v5129_v60, %v2978_v63  ;;  %v4423_v6 = vsel %vm184_vm0, 1.0, %v5591_v36  ;;  %v4551_v7 = vsel %vm576_vm1, 1.0, %v5591_v36 }
  0x9c   :  { %vm186_vm3 = vcmp.eq.s32.totalorder %v6137_v3, %v5668_v21  ;;  %vm578_vm4 = vcmp.eq.s32.totalorder %v6137_v3, %v5672_v23  ;;  %v960_v8 = vadd.f32 %v4551_v7, %v4423_v6  ;;  %vm1098_vm5 = vcmp.eq.s32.totalorder %v6137_v3, %v5676_v25 }
  0x9d   :  { %v4016_v9 = vadd.f32 %v5255_v0, %v3496_v4  ;;  %v4018_v14 = vadd.f32 %v5257_v2, %v3498_v5  ;;  %v4425_v37 = vsel %vm186_vm3, 1.0, %v5591_v36  ;;  %v4553_v38 = vsel %vm578_vm4, 1.0, %v5591_v36 }
  0x9e   :  { %v962_v39 = vadd.f32 %v4553_v38, %v4425_v37  ;;  %v4679_v40 = vsel %vm1096_vm2, 1.0, %v5591_v36  ;;  %v4681_v17 = vsel %vm1098_vm5, 1.0, %v5591_v36  ;;  %vm1616_vm6 = vcmp.eq.s32.totalorder %v6132_v61, %v5680_v27 }
  0x9f   :  { %v5383_v18 = vpack.c.bf16 %v4018_v14, %v4016_v9  ;;  %v1480_v41 = vadd.f32 %v4679_v40, %v960_v8  ;;  %vm1618_vm7 = vcmp.eq.s32.totalorder %v6137_v3, %v5680_v27  ;;  %v4807_v42 = vsel %vm1616_vm6, 1.0, %v5591_v36 }
  0xa0   :  { %v1482_v11 = vadd.f32 %v4681_v17, %v962_v39  ;;  %v4809_v12 = vsel %vm1618_vm7, 1.0, %v5591_v36  ;;  %vm2136_vm8 = vcmp.eq.s32.totalorder %v6132_v61, %v5684_v29  ;;  %vm2138_vm9 = vcmp.eq.s32.totalorder %v6137_v3, %v5684_v29 }
  0xa1   :  { %5384 = vmatprep.subr.bf16.mxu1 %v5383_v18  ;;  %v2000_v43 = vadd.f32 %v4807_v42, %v1480_v41  ;;  %v4935_v44 = vsel %vm2136_vm8, 1.0, %v5591_v36  ;;  %v4937_v45 = vsel %vm2138_vm9, 1.0, %v5591_v36  ;;  %vm2656_vm10 = vcmp.eq.s32.totalorder %v6132_v61, %v5688_v31 }
  0xa2   :  { %v2002_v46 = vadd.f32 %v4809_v12, %v1482_v11  ;;  %vm2658_vm11 = vcmp.eq.s32.totalorder %v6137_v3, %v5688_v31  ;;  %v5063_v47 = vsel %vm2656_vm10, 1.0, %v5591_v36  ;;  %vm3176_vm12 = vcmp.eq.s32.totalorder %v6132_v61, %v5692_v33 }
  0xa3   :  { %v2520_v48 = vadd.f32 %v4935_v44, %v2000_v43  ;;  %v5065_v49 = vsel %vm2658_vm11, 1.0, %v5591_v36  ;;  %vm3178_vm13 = vcmp.eq.s32.totalorder %v6137_v3, %v5692_v33  ;;  %v5191_v13 = vsel %vm3176_vm12, 1.0, %v5591_v36 }
  0xa4   :  { %v2522_v16 = vadd.f32 %v4937_v45, %v2002_v46  ;;  %v5193_v50 = vsel %vm3178_vm13, 1.0, %v5591_v36  ;;  %vm3696_vm14 = vcmp.eq.s32.totalorder %v6132_v61, %v5696_v35  ;;  %vm3698_vm15 = vcmp.eq.s32.totalorder %v6137_v3, %v5696_v35 }
  0xa5   :  { %v3040_v10 = vadd.f32 %v5063_v47, %v2520_v48  ;;  %v5319_v51 = vsel %vm3696_vm14, 1.0, %v5591_v36  ;;  %v5321_v52 = vsel %vm3698_vm15, 1.0, %v5591_v36  ;;  %vm119_vm0 = vcmp.eq.s32.totalorder %v5664_v19, %v5666_v20 }
  0xa6   :  { %v3042_v53 = vadd.f32 %v5065_v49, %v2522_v16  ;;  %vm121_vm1 = vcmp.eq.s32.totalorder %v6081_v15, %v5666_v20  ;;  %v4358_v54 = vsel %vm119_vm0, 1.0, %v5591_v36  ;;  %vm511_vm2 = vcmp.eq.s32.totalorder %v5664_v19, %v5670_v22 }
  0xa7   :  { %v3560_v55 = vadd.f32 %v5191_v13, %v3040_v10  ;;  %v4360_v56 = vsel %vm121_vm1, 1.0, %v5591_v36  ;;  %vm513_vm3 = vcmp.eq.s32.totalorder %v6081_v15, %v5670_v22  ;;  %v4486_v57 = vsel %vm511_vm2, 1.0, %v5591_v36 }
  0xa8   :  { %v3562_v58 = vadd.f32 %v5193_v50, %v3042_v53  ;;  %v4488_v59 = vsel %vm513_vm3, 1.0, %v5591_v36  ;;  %v895_v60 = vadd.f32 %v4486_v57, %v4358_v54  ;;  %vm1031_vm4 = vcmp.eq.s32.totalorder %v5664_v19, %v5674_v24 }
  0xa9   :  { %v4080_v62 = vadd.f32 %v5319_v51, %v3560_v55  ;;  %v897_v63 = vadd.f32 %v4488_v59, %v4360_v56  ;;  %vm1033_vm5 = vcmp.eq.s32.totalorder %v6081_v15, %v5674_v24  ;;  %v4614_v0 = vsel %vm1031_vm4, 1.0, %v5591_v36 }
  0xaa   :  { %v4082_v2 = vadd.f32 %v5321_v52, %v3562_v58  ;;  %v4616_v4 = vsel %vm1033_vm5, 1.0, %v5591_v36  ;;  %v1415_v5 = vadd.f32 %v4614_v0, %v895_v60  ;;  %vm1551_vm6 = vcmp.eq.s32.totalorder %v5664_v19, %v5678_v26 }
  0xab   :  { %v1417_v6 = vadd.f32 %v4616_v4, %v897_v63  ;;  %vm1553_vm7 = vcmp.eq.s32.totalorder %v6081_v15, %v5678_v26  ;;  %v4742_v7 = vsel %vm1551_vm6, 1.0, %v5591_v36  ;;  %vm2071_vm8 = vcmp.eq.s32.totalorder %v5664_v19, %v5682_v28 }
  0xac   :  { %v5447_v8 = vpack.c.bf16 %v4082_v2, %v4080_v62  ;;  %v4744_v9 = vsel %vm1553_vm7, 1.0, %v5591_v36  ;;  %v1935_v14 = vadd.f32 %v4742_v7, %v1415_v5  ;;  %vm2073_vm9 = vcmp.eq.s32.totalorder %v6081_v15, %v5682_v28 }
  0xad   :  { %v1937_v37 = vadd.f32 %v4744_v9, %v1417_v6  ;;  %v4870_v38 = vsel %vm2071_vm8, 1.0, %v5591_v36  ;;  %v4872_v39 = vsel %vm2073_vm9, 1.0, %v5591_v36  ;;  %vm2591_vm10 = vcmp.eq.s32.totalorder %v5664_v19, %v5686_v30 }
  0xae   :  { %5448 = vmatprep.subr.bf16.mxu0 %v5447_v8  ;;  %v2455_v40 = vadd.f32 %v4870_v38, %v1935_v14  ;;  %vm2593_vm11 = vcmp.eq.s32.totalorder %v6081_v15, %v5686_v30  ;;  %v4998_v17 = vsel %vm2591_vm10, 1.0, %v5591_v36  ;;  %vm3111_vm12 = vcmp.eq.s32.totalorder %v5664_v19, %v5690_v32 }
  0xaf   :  { %v2457_v18 = vadd.f32 %v4872_v39, %v1937_v37  ;;  %v5000_v41 = vsel %vm2593_vm11, 1.0, %v5591_v36  ;;  %vm3113_vm13 = vcmp.eq.s32.totalorder %v6081_v15, %v5690_v32  ;;  %v5126_v42 = vsel %vm3111_vm12, 1.0, %v5591_v36 }
  0xb0   :  { %v2975_v11 = vadd.f32 %v4998_v17, %v2455_v40  ;;  %v5128_v12 = vsel %vm3113_vm13, 1.0, %v5591_v36  ;;  %vm3631_vm14 = vcmp.eq.s32.totalorder %v5664_v19, %v5694_v34  ;;  %vm3633_vm15 = vcmp.eq.s32.totalorder %v6081_v15, %v5694_v34 }
  0xb1   :  { %v2977_v43 = vadd.f32 %v5000_v41, %v2457_v18  ;;  %v5254_v44 = vsel %vm3631_vm14, 1.0, %v5591_v36  ;;  %v5256_v45 = vsel %vm3633_vm15, 1.0, %v5591_v36  ;;  %vm183_vm0 = vcmp.eq.s32.totalorder %v6132_v61, %v5666_v20 }
  0xb2   :  { %v3495_v46 = vadd.f32 %v5126_v42, %v2975_v11  ;;  %vm185_vm1 = vcmp.eq.s32.totalorder %v6137_v3, %v5666_v20  ;;  %v4422_v47 = vsel %vm183_vm0, 1.0, %v5591_v36  ;;  %vm575_vm2 = vcmp.eq.s32.totalorder %v6132_v61, %v5670_v22 }
  0xb3   :  { %v3497_v19 = vadd.f32 %v5128_v12, %v2977_v43  ;;  %v4424_v15 = vsel %vm185_vm1, 1.0, %v5591_v36  ;;  %vm577_vm3 = vcmp.eq.s32.totalorder %v6137_v3, %v5670_v22  ;;  %v4550_v48 = vsel %vm575_vm2, 1.0, %v5591_v36 }
  0xb4   :  { %v4015_v49 = vadd.f32 %v5254_v44, %v3495_v46  ;;  %v4552_v13 = vsel %vm577_vm3, 1.0, %v5591_v36  ;;  %v959_v16 = vadd.f32 %v4550_v48, %v4422_v47  ;;  %vm1095_vm4 = vcmp.eq.s32.totalorder %v6132_v61, %v5674_v24 }
  0xb5   :  { %v4017_v50 = vadd.f32 %v5256_v45, %v3497_v19  ;;  %v961_v10 = vadd.f32 %v4552_v13, %v4424_v15  ;;  %vm1097_vm5 = vcmp.eq.s32.totalorder %v6137_v3, %v5674_v24  ;;  %v4678_v51 = vsel %vm1095_vm4, 1.0, %v5591_v36 }
  0xb6   :  { %v4680_v52 = vsel %vm1097_vm5, 1.0, %v5591_v36  ;;  %v1479_v53 = vadd.f32 %v4678_v51, %v959_v16  ;;  %vm1615_vm6 = vcmp.eq.s32.totalorder %v6132_v61, %v5678_v26  ;;  %vm1617_vm7 = vcmp.eq.s32.totalorder %v6137_v3, %v5678_v26 }
  0xb7   :  { %v5385_v54 = vpack.c.bf16 %v4017_v50, %v4015_v49  ;;  %v1481_v55 = vadd.f32 %v4680_v52, %v961_v10  ;;  %v4806_v56 = vsel %vm1615_vm6, 1.0, %v5591_v36  ;;  %v4808_v57 = vsel %vm1617_vm7, 1.0, %v5591_v36 }
  0xb8   :  { %v1999_v58 = vadd.f32 %v4806_v56, %v1479_v53  ;;  %vm2135_vm8 = vcmp.eq.s32.totalorder %v6132_v61, %v5682_v28  ;;  %vm2137_vm9 = vcmp.eq.s32.totalorder %v6137_v3, %v5682_v28  ;;  %vm2655_vm10 = vcmp.eq.s32.totalorder %v6132_v61, %v5686_v30 }
  0xb9   :  { %5386 = vmatpush1.bf16.msra.mxu1 %v5385_v54  ;;  %v2001_v59 = vadd.f32 %v4808_v57, %v1481_v55  ;;  %v4934_v60 = vsel %vm2135_vm8, 1.0, %v5591_v36  ;;  %v4936_v62 = vsel %vm2137_vm9, 1.0, %v5591_v36  ;;  %vm2657_vm11 = vcmp.eq.s32.totalorder %v6137_v3, %v5686_v30 }
  0xba   :  { %v2519_v63 = vadd.f32 %v4934_v60, %v1999_v58  ;;  %v5062_v0 = vsel %vm2655_vm10, 1.0, %v5591_v36  ;;  %v5064_v2 = vsel %vm2657_vm11, 1.0, %v5591_v36  ;;  %vm3175_vm12 = vcmp.eq.s32.totalorder %v6132_v61, %v5690_v32 }
  0xbb   :  { %v2521_v4 = vadd.f32 %v4936_v62, %v2001_v59  ;;  %vm3177_vm13 = vcmp.eq.s32.totalorder %v6137_v3, %v5690_v32  ;;  %v5190_v5 = vsel %vm3175_vm12, 1.0, %v5591_v36  ;;  %vm3695_vm14 = vcmp.eq.s32.totalorder %v6132_v61, %v5694_v34 }
  0xbc   :  { %v3039_v6 = vadd.f32 %v5062_v0, %v2519_v63  ;;  %v5192_v7 = vsel %vm3177_vm13, 1.0, %v5591_v36  ;;  %vm3697_vm15 = vcmp.eq.s32.totalorder %v6137_v3, %v5694_v34  ;;  %v5318_v8 = vsel %vm3695_vm14, 1.0, %v5591_v36 }
  0xbd   :  { %v3041_v9 = vadd.f32 %v5064_v2, %v2521_v4  ;;  %v5320_v14 = vsel %vm3697_vm15, 1.0, %v5591_v36  ;;  %v6284_v37 = vadd.s32 48, %v5632_v1  ;;  %v6287_v38 = vadd.s32 56, %v5632_v1 }
  0xbe   :  { %v3559_v39 = vadd.f32 %v5190_v5, %v3039_v6  ;;  %v6290_v61 = vadd.s32 304, %v5632_v1  ;;  %v6293_v40 = vadd.s32 312, %v5632_v1  ;;  %v6296_v3 = vadd.s32 64, %v5632_v1 }
  0xbf   :  { %v3561_v17 = vadd.f32 %v5192_v7, %v3041_v9  ;;  %vm124_vm0 = vcmp.eq.s32.totalorder %v6284_v37, %v5668_v21  ;;  %vm126_vm1 = vcmp.eq.s32.totalorder %v6287_v38, %v5668_v21  ;;  %vm516_vm2 = vcmp.eq.s32.totalorder %v6284_v37, %v5672_v23 }
  0xc0   :  { %v4079_v18 = vadd.f32 %v5318_v8, %v3559_v39  ;;  %v4363_v41 = vsel %vm124_vm0, 1.0, %v5591_v36  ;;  %v4365_v42 = vsel %vm126_vm1, 1.0, %v5591_v36  ;;  %vm518_vm3 = vcmp.eq.s32.totalorder %v6287_v38, %v5672_v23 }
  0xc1   :  { %v4081_v11 = vadd.f32 %v5320_v14, %v3561_v17  ;;  %v4491_v12 = vsel %vm516_vm2, 1.0, %v5591_v36  ;;  %v4493_v43 = vsel %vm518_vm3, 1.0, %v5591_v36  ;;  %vm1036_vm4 = vcmp.eq.s32.totalorder %v6284_v37, %v5676_v25 }
  0xc2   :  { %v900_v44 = vadd.f32 %v4491_v12, %v4363_v41  ;;  %v902_v45 = vadd.f32 %v4493_v43, %v4365_v42  ;;  %vm1038_vm5 = vcmp.eq.s32.totalorder %v6287_v38, %v5676_v25  ;;  %v4619_v46 = vsel %vm1036_vm4, 1.0, %v5591_v36 }
  0xc3   :  { %v5449_v47 = vpack.c.bf16 %v4081_v11, %v4079_v18  ;;  %v4621_v19 = vsel %vm1038_vm5, 1.0, %v5591_v36  ;;  %vm1556_vm6 = vcmp.eq.s32.totalorder %v6284_v37, %v5680_v27  ;;  %vm1558_vm7 = vcmp.eq.s32.totalorder %v6287_v38, %v5680_v27 }
  0xc4   :  { %v1420_v15 = vadd.f32 %v4619_v46, %v900_v44  ;;  %v1422_v48 = vadd.f32 %v4621_v19, %v902_v45  ;;  %v4747_v49 = vsel %vm1556_vm6, 1.0, %v5591_v36  ;;  %v4749_v13 = vsel %vm1558_vm7, 1.0, %v5591_v36 }
  0xc5   :  { %5450 = vmatpush1.bf16.msra.mxu0 %v5449_v47  ;;  %vm2076_vm8 = vcmp.eq.s32.totalorder %v6284_v37, %v5684_v29  ;;  %vm2078_vm9 = vcmp.eq.s32.totalorder %v6287_v38, %v5684_v29  ;;  %vm2596_vm10 = vcmp.eq.s32.totalorder %v6284_v37, %v5688_v31  ;;  %vm2598_vm11 = vcmp.eq.s32.totalorder %v6287_v38, %v5688_v31 }
  0xc6   :  { %v1940_v16 = vadd.f32 %v4747_v49, %v1420_v15  ;;  %v1942_v50 = vadd.f32 %v4749_v13, %v1422_v48  ;;  %v4875_v10 = vsel %vm2076_vm8, 1.0, %v5591_v36  ;;  %v4877_v51 = vsel %vm2078_vm9, 1.0, %v5591_v36 }
  0xc7   :  { %v5003_v52 = vsel %vm2596_vm10, 1.0, %v5591_v36  ;;  %v5005_v53 = vsel %vm2598_vm11, 1.0, %v5591_v36  ;;  %vm3116_vm12 = vcmp.eq.s32.totalorder %v6284_v37, %v5692_v33  ;;  %vm3118_vm13 = vcmp.eq.s32.totalorder %v6287_v38, %v5692_v33 }
  0xc8   :  { %v2460_v54 = vadd.f32 %v4875_v10, %v1940_v16  ;;  %v2462_v55 = vadd.f32 %v4877_v51, %v1942_v50  ;;  %v5131_v56 = vsel %vm3116_vm12, 1.0, %v5591_v36  ;;  %v5133_v57 = vsel %vm3118_vm13, 1.0, %v5591_v36 }
  0xc9   :  { %vm3636_vm14 = vcmp.eq.s32.totalorder %v6284_v37, %v5696_v35  ;;  %vm3638_vm15 = vcmp.eq.s32.totalorder %v6287_v38, %v5696_v35  ;;  %vm188_vm0 = vcmp.eq.s32.totalorder %v6290_v61, %v5668_v21  ;;  %vm190_vm1 = vcmp.eq.s32.totalorder %v6293_v40, %v5668_v21 }
  0xca   :  { %v2980_v58 = vadd.f32 %v5003_v52, %v2460_v54  ;;  %v2982_v59 = vadd.f32 %v5005_v53, %v2462_v55  ;;  %v5259_v60 = vsel %vm3636_vm14, 1.0, %v5591_v36  ;;  %v5261_v62 = vsel %vm3638_vm15, 1.0, %v5591_v36 }
  0xcb   :  { %v4427_v63 = vsel %vm188_vm0, 1.0, %v5591_v36  ;;  %v4429_v0 = vsel %vm190_vm1, 1.0, %v5591_v36  ;;  %vm580_vm2 = vcmp.eq.s32.totalorder %v6290_v61, %v5672_v23  ;;  %vm582_vm3 = vcmp.eq.s32.totalorder %v6293_v40, %v5672_v23 }
  0xcc   :  { %v3500_v2 = vadd.f32 %v5131_v56, %v2980_v58  ;;  %v3502_v4 = vadd.f32 %v5133_v57, %v2982_v59  ;;  %v4555_v5 = vsel %vm580_vm2, 1.0, %v5591_v36  ;;  %v4557_v6 = vsel %vm582_vm3, 1.0, %v5591_v36 }
  0xcd   :  { %v964_v7 = vadd.f32 %v4555_v5, %v4427_v63  ;;  %v966_v8 = vadd.f32 %v4557_v6, %v4429_v0  ;;  %vm1100_vm4 = vcmp.eq.s32.totalorder %v6290_v61, %v5676_v25  ;;  %vm1102_vm5 = vcmp.eq.s32.totalorder %v6293_v40, %v5676_v25 }
  0xce   :  { %v4020_v9 = vadd.f32 %v5259_v60, %v3500_v2  ;;  %v4022_v14 = vadd.f32 %v5261_v62, %v3502_v4  ;;  %v4683_v39 = vsel %vm1100_vm4, 1.0, %v5591_v36  ;;  %v4685_v17 = vsel %vm1102_vm5, 1.0, %v5591_v36 }
  0xcf   :  { %v1484_v18 = vadd.f32 %v4683_v39, %v964_v7  ;;  %v1486_v41 = vadd.f32 %v4685_v17, %v966_v8  ;;  %vm1620_vm6 = vcmp.eq.s32.totalorder %v6290_v61, %v5680_v27  ;;  %vm1622_vm7 = vcmp.eq.s32.totalorder %v6293_v40, %v5680_v27 }
  0xd0   :  { %v5387_v42 = vpack.c.bf16 %v4022_v14, %v4020_v9  ;;  %v4811_v11 = vsel %vm1620_vm6, 1.0, %v5591_v36  ;;  %v4813_v12 = vsel %vm1622_vm7, 1.0, %v5591_v36  ;;  %vm2140_vm8 = vcmp.eq.s32.totalorder %v6290_v61, %v5684_v29 }
  0xd1   :  { %v2004_v43 = vadd.f32 %v4811_v11, %v1484_v18  ;;  %v2006_v44 = vadd.f32 %v4813_v12, %v1486_v41  ;;  %vm2142_vm9 = vcmp.eq.s32.totalorder %v6293_v40, %v5684_v29  ;;  %v4939_v45 = vsel %vm2140_vm8, 1.0, %v5591_v36 }
  0xd2   :  { %5388 = vmatprep.subr.bf16.mxu1 %v5387_v42  ;;  %v4941_v46 = vsel %vm2142_vm9, 1.0, %v5591_v36  ;;  %vm2660_vm10 = vcmp.eq.s32.totalorder %v6290_v61, %v5688_v31  ;;  %vm2662_vm11 = vcmp.eq.s32.totalorder %v6293_v40, %v5688_v31  ;;  %vm3180_vm12 = vcmp.eq.s32.totalorder %v6290_v61, %v5692_v33 }
  0xd3   :  { %v2524_v47 = vadd.f32 %v4939_v45, %v2004_v43  ;;  %v2526_v19 = vadd.f32 %v4941_v46, %v2006_v44  ;;  %v5067_v15 = vsel %vm2660_vm10, 1.0, %v5591_v36  ;;  %v5069_v48 = vsel %vm2662_vm11, 1.0, %v5591_v36 }
  0xd4   :  { %vm3182_vm13 = vcmp.eq.s32.totalorder %v6293_v40, %v5692_v33  ;;  %v5195_v49 = vsel %vm3180_vm12, 1.0, %v5591_v36  ;;  %vm3700_vm14 = vcmp.eq.s32.totalorder %v6290_v61, %v5696_v35  ;;  %vm3702_vm15 = vcmp.eq.s32.totalorder %v6293_v40, %v5696_v35 }
  0xd5   :  { %v3044_v13 = vadd.f32 %v5067_v15, %v2524_v47  ;;  %v3046_v16 = vadd.f32 %v5069_v48, %v2526_v19  ;;  %v5197_v50 = vsel %vm3182_vm13, 1.0, %v5591_v36  ;;  %v5323_v10 = vsel %vm3700_vm14, 1.0, %v5591_v36 }
  0xd6   :  { %v5325_v51 = vsel %vm3702_vm15, 1.0, %v5591_v36  ;;  %vm123_vm0 = vcmp.eq.s32.totalorder %v6284_v37, %v5666_v20  ;;  %vm125_vm1 = vcmp.eq.s32.totalorder %v6287_v38, %v5666_v20  ;;  %vm515_vm2 = vcmp.eq.s32.totalorder %v6284_v37, %v5670_v22 }
  0xd7   :  { %v3564_v52 = vadd.f32 %v5195_v49, %v3044_v13  ;;  %v3566_v53 = vadd.f32 %v5197_v50, %v3046_v16  ;;  %v4362_v54 = vsel %vm123_vm0, 1.0, %v5591_v36  ;;  %v4364_v55 = vsel %vm125_vm1, 1.0, %v5591_v36 }
  0xd8   :  { %vm517_vm3 = vcmp.eq.s32.totalorder %v6287_v38, %v5670_v22  ;;  %v4490_v56 = vsel %vm515_vm2, 1.0, %v5591_v36  ;;  %vm1035_vm4 = vcmp.eq.s32.totalorder %v6284_v37, %v5674_v24  ;;  %vm1037_vm5 = vcmp.eq.s32.totalorder %v6287_v38, %v5674_v24 }
  0xd9   :  { %v4084_v57 = vadd.f32 %v5323_v10, %v3564_v52  ;;  %v4086_v58 = vadd.f32 %v5325_v51, %v3566_v53  ;;  %v4492_v59 = vsel %vm517_vm3, 1.0, %v5591_v36  ;;  %v899_v60 = vadd.f32 %v4490_v56, %v4362_v54 }
  0xda   :  { %v901_v62 = vadd.f32 %v4492_v59, %v4364_v55  ;;  %v4618_v63 = vsel %vm1035_vm4, 1.0, %v5591_v36  ;;  %v4620_v0 = vsel %vm1037_vm5, 1.0, %v5591_v36  ;;  %vm1555_vm6 = vcmp.eq.s32.totalorder %v6284_v37, %v5678_v26 }
  0xdb   :  { %v5451_v2 = vpack.c.bf16 %v4086_v58, %v4084_v57  ;;  %v1419_v4 = vadd.f32 %v4618_v63, %v899_v60  ;;  %vm1557_vm7 = vcmp.eq.s32.totalorder %v6287_v38, %v5678_v26  ;;  %v4746_v5 = vsel %vm1555_vm6, 1.0, %v5591_v36 }
  0xdc   :  { %v1421_v6 = vadd.f32 %v4620_v0, %v901_v62  ;;  %v4748_v7 = vsel %vm1557_vm7, 1.0, %v5591_v36  ;;  %vm2075_vm8 = vcmp.eq.s32.totalorder %v6284_v37, %v5682_v28  ;;  %vm2077_vm9 = vcmp.eq.s32.totalorder %v6287_v38, %v5682_v28 }
  0xdd   :  { %5452 = vmatprep.subr.bf16.mxu0 %v5451_v2  ;;  %v1939_v8 = vadd.f32 %v4746_v5, %v1419_v4  ;;  %v4874_v9 = vsel %vm2075_vm8, 1.0, %v5591_v36  ;;  %v4876_v14 = vsel %vm2077_vm9, 1.0, %v5591_v36  ;;  %vm2595_vm10 = vcmp.eq.s32.totalorder %v6284_v37, %v5686_v30 }
  0xde   :  { %v1941_v39 = vadd.f32 %v4748_v7, %v1421_v6  ;;  %vm2597_vm11 = vcmp.eq.s32.totalorder %v6287_v38, %v5686_v30  ;;  %v5002_v17 = vsel %vm2595_vm10, 1.0, %v5591_v36  ;;  %vm3115_vm12 = vcmp.eq.s32.totalorder %v6284_v37, %v5690_v32 }
  0xdf   :  { %v2459_v18 = vadd.f32 %v4874_v9, %v1939_v8  ;;  %v5004_v41 = vsel %vm2597_vm11, 1.0, %v5591_v36  ;;  %vm3117_vm13 = vcmp.eq.s32.totalorder %v6287_v38, %v5690_v32  ;;  %v5130_v42 = vsel %vm3115_vm12, 1.0, %v5591_v36 }
  0xe0   :  { %v2461_v11 = vadd.f32 %v4876_v14, %v1941_v39  ;;  %v5132_v12 = vsel %vm3117_vm13, 1.0, %v5591_v36  ;;  %vm3635_vm14 = vcmp.eq.s32.totalorder %v6284_v37, %v5694_v34  ;;  %vm3637_vm15 = vcmp.eq.s32.totalorder %v6287_v38, %v5694_v34 }
  0xe1   :  { %v2979_v43 = vadd.f32 %v5002_v17, %v2459_v18  ;;  %v5258_v44 = vsel %vm3635_vm14, 1.0, %v5591_v36  ;;  %v5260_v45 = vsel %vm3637_vm15, 1.0, %v5591_v36  ;;  %vm187_vm0 = vcmp.eq.s32.totalorder %v6290_v61, %v5666_v20 }
  0xe2   :  { %v2981_v46 = vadd.f32 %v5004_v41, %v2461_v11  ;;  %vm189_vm1 = vcmp.eq.s32.totalorder %v6293_v40, %v5666_v20  ;;  %v4426_v47 = vsel %vm187_vm0, 1.0, %v5591_v36  ;;  %vm579_vm2 = vcmp.eq.s32.totalorder %v6290_v61, %v5670_v22 }
  0xe3   :  { %v3499_v37 = vadd.f32 %v5130_v42, %v2979_v43  ;;  %v4428_v38 = vsel %vm189_vm1, 1.0, %v5591_v36  ;;  %vm581_vm3 = vcmp.eq.s32.totalorder %v6293_v40, %v5670_v22  ;;  %v4554_v19 = vsel %vm579_vm2, 1.0, %v5591_v36 }
  0xe4   :  { %v3501_v15 = vadd.f32 %v5132_v12, %v2981_v46  ;;  %v4556_v48 = vsel %vm581_vm3, 1.0, %v5591_v36  ;;  %v963_v49 = vadd.f32 %v4554_v19, %v4426_v47  ;;  %vm1099_vm4 = vcmp.eq.s32.totalorder %v6290_v61, %v5674_v24 }
  0xe5   :  { %v4019_v13 = vadd.f32 %v5258_v44, %v3499_v37  ;;  %v965_v16 = vadd.f32 %v4556_v48, %v4428_v38  ;;  %vm1101_vm5 = vcmp.eq.s32.totalorder %v6293_v40, %v5674_v24  ;;  %v4682_v50 = vsel %vm1099_vm4, 1.0, %v5591_v36 }
  0xe6   :  { %v4021_v10 = vadd.f32 %v5260_v45, %v3501_v15  ;;  %v4684_v51 = vsel %vm1101_vm5, 1.0, %v5591_v36  ;;  %v1483_v52 = vadd.f32 %v4682_v50, %v963_v49  ;;  %vm1619_vm6 = vcmp.eq.s32.totalorder %v6290_v61, %v5678_v26 }
  0xe7   :  { %v1485_v53 = vadd.f32 %v4684_v51, %v965_v16  ;;  %vm1621_vm7 = vcmp.eq.s32.totalorder %v6293_v40, %v5678_v26  ;;  %v4810_v54 = vsel %vm1619_vm6, 1.0, %v5591_v36  ;;  %vm2139_vm8 = vcmp.eq.s32.totalorder %v6290_v61, %v5682_v28 }
  0xe8   :  { %v5389_v55 = vpack.c.bf16 %v4021_v10, %v4019_v13  ;;  %v4812_v56 = vsel %vm1621_vm7, 1.0, %v5591_v36  ;;  %v2003_v57 = vadd.f32 %v4810_v54, %v1483_v52  ;;  %vm2141_vm9 = vcmp.eq.s32.totalorder %v6293_v40, %v5682_v28 }
  0xe9   :  { %v2005_v58 = vadd.f32 %v4812_v56, %v1485_v53  ;;  %v4938_v59 = vsel %vm2139_vm8, 1.0, %v5591_v36  ;;  %v4940_v60 = vsel %vm2141_vm9, 1.0, %v5591_v36  ;;  %vm2659_vm10 = vcmp.eq.s32.totalorder %v6290_v61, %v5686_v30 }
  0xea   :  { %5390 = vmatpush1.bf16.msra.mxu1 %v5389_v55  ;;  %v2523_v62 = vadd.f32 %v4938_v59, %v2003_v57  ;;  %vm2661_vm11 = vcmp.eq.s32.totalorder %v6293_v40, %v5686_v30  ;;  %v5066_v63 = vsel %vm2659_vm10, 1.0, %v5591_v36  ;;  %vm3179_vm12 = vcmp.eq.s32.totalorder %v6290_v61, %v5690_v32 }
  0xeb   :  { %v2525_v0 = vadd.f32 %v4940_v60, %v2005_v58  ;;  %v5068_v2 = vsel %vm2661_vm11, 1.0, %v5591_v36  ;;  %vm3181_vm13 = vcmp.eq.s32.totalorder %v6293_v40, %v5690_v32  ;;  %v5194_v4 = vsel %vm3179_vm12, 1.0, %v5591_v36 }
  0xec   :  { %v3043_v5 = vadd.f32 %v5066_v63, %v2523_v62  ;;  %v5196_v6 = vsel %vm3181_vm13, 1.0, %v5591_v36  ;;  %vm3699_vm14 = vcmp.eq.s32.totalorder %v6290_v61, %v5694_v34  ;;  %vm3701_vm15 = vcmp.eq.s32.totalorder %v6293_v40, %v5694_v34 }
  0xed   :  { %v3045_v7 = vadd.f32 %v5068_v2, %v2525_v0  ;;  %v5322_v8 = vsel %vm3699_vm14, 1.0, %v5591_v36  ;;  %v5324_v9 = vsel %vm3701_vm15, 1.0, %v5591_v36  ;;  %v6491_v14 = vadd.s32 72, %v5632_v1 }
  0xee   :  { %v3563_v39 = vadd.f32 %v5194_v4, %v3043_v5  ;;  %vm128_vm0 = vcmp.eq.s32.totalorder %v6296_v3, %v5668_v21  ;;  %vm520_vm1 = vcmp.eq.s32.totalorder %v6296_v3, %v5672_v23  ;;  %vm1040_vm2 = vcmp.eq.s32.totalorder %v6296_v3, %v5676_v25 }
  0xef   :  { %v3565_v61 = vadd.f32 %v5196_v6, %v3045_v7  ;;  %vm130_vm3 = vcmp.eq.s32.totalorder %v6491_v14, %v5668_v21  ;;  %v4367_v40 = vsel %vm128_vm0, 1.0, %v5591_v36  ;;  %vm522_vm4 = vcmp.eq.s32.totalorder %v6491_v14, %v5672_v23 }
  0xf0   :  { %v4083_v17 = vadd.f32 %v5322_v8, %v3563_v39  ;;  %v4369_v18 = vsel %vm130_vm3, 1.0, %v5591_v36  ;;  %v4495_v41 = vsel %vm520_vm1, 1.0, %v5591_v36  ;;  %v4497_v42 = vsel %vm522_vm4, 1.0, %v5591_v36 }
  0xf1   :  { %v4085_v11 = vadd.f32 %v5324_v9, %v3565_v61  ;;  %v904_v12 = vadd.f32 %v4495_v41, %v4367_v40  ;;  %v906_v43 = vadd.f32 %v4497_v42, %v4369_v18  ;;  %vm1042_vm5 = vcmp.eq.s32.totalorder %v6491_v14, %v5676_v25 }
  0xf2   :  { %v4623_v44 = vsel %vm1040_vm2, 1.0, %v5591_v36  ;;  %v4625_v45 = vsel %vm1042_vm5, 1.0, %v5591_v36  ;;  %vm1560_vm6 = vcmp.eq.s32.totalorder %v6296_v3, %v5680_v27  ;;  %vm1562_vm7 = vcmp.eq.s32.totalorder %v6491_v14, %v5680_v27 }
  0xf3   :  { %v5453_v46 = vpack.c.bf16 %v4085_v11, %v4083_v17  ;;  %v1424_v47 = vadd.f32 %v4623_v44, %v904_v12  ;;  %v1426_v37 = vadd.f32 %v4625_v45, %v906_v43  ;;  %v4751_v38 = vsel %vm1560_vm6, 1.0, %v5591_v36 }
  0xf4   :  { %v4753_v19 = vsel %vm1562_vm7, 1.0, %v5591_v36  ;;  %vm2080_vm8 = vcmp.eq.s32.totalorder %v6296_v3, %v5684_v29  ;;  %vm2082_vm9 = vcmp.eq.s32.totalorder %v6491_v14, %v5684_v29  ;;  %vm2600_vm10 = vcmp.eq.s32.totalorder %v6296_v3, %v5688_v31 }
  0xf5   :  { %5454 = vmatpush1.bf16.msra.mxu0 %v5453_v46  ;;  %v1944_v15 = vadd.f32 %v4751_v38, %v1424_v47  ;;  %v1946_v48 = vadd.f32 %v4753_v19, %v1426_v37  ;;  %v4879_v49 = vsel %vm2080_vm8, 1.0, %v5591_v36  ;;  %v4881_v13 = vsel %vm2082_vm9, 1.0, %v5591_v36 }
  0xf6   :  { %vm2602_vm11 = vcmp.eq.s32.totalorder %v6491_v14, %v5688_v31  ;;  %v5007_v16 = vsel %vm2600_vm10, 1.0, %v5591_v36  ;;  %vm3120_vm12 = vcmp.eq.s32.totalorder %v6296_v3, %v5692_v33  ;;  %vm3122_vm13 = vcmp.eq.s32.totalorder %v6491_v14, %v5692_v33 }
  0xf7   :  { %v2464_v50 = vadd.f32 %v4879_v49, %v1944_v15  ;;  %v2466_v10 = vadd.f32 %v4881_v13, %v1946_v48  ;;  %v5009_v51 = vsel %vm2602_vm11, 1.0, %v5591_v36  ;;  %v5135_v52 = vsel %vm3120_vm12, 1.0, %v5591_v36 }
  0xf8   :  { %v5137_v53 = vsel %vm3122_vm13, 1.0, %v5591_v36  ;;  %vm3640_vm14 = vcmp.eq.s32.totalorder %v6296_v3, %v5696_v35  ;;  %vm3642_vm15 = vcmp.eq.s32.totalorder %v6491_v14, %v5696_v35  ;;  %v6540_v54 = vadd.s32 320, %v5632_v1 }
  0xf9   :  { %v2984_v55 = vadd.f32 %v5007_v16, %v2464_v50  ;;  %v2986_v56 = vadd.f32 %v5009_v51, %v2466_v10  ;;  %v5263_v57 = vsel %vm3640_vm14, 1.0, %v5591_v36  ;;  %v5265_v58 = vsel %vm3642_vm15, 1.0, %v5591_v36 }
  0xfa   :  { %v6545_v59 = vadd.s32 328, %v5632_v1  ;;  %vm192_vm0 = vcmp.eq.s32.totalorder %v6540_v54, %v5668_v21  ;;  %vm584_vm1 = vcmp.eq.s32.totalorder %v6540_v54, %v5672_v23  ;;  %vm1104_vm2 = vcmp.eq.s32.totalorder %v6540_v54, %v5676_v25 }
  0xfb   :  { %v3504_v60 = vadd.f32 %v5135_v52, %v2984_v55  ;;  %v3506_v62 = vadd.f32 %v5137_v53, %v2986_v56  ;;  %v4431_v63 = vsel %vm192_vm0, 1.0, %v5591_v36  ;;  %v4559_v0 = vsel %vm584_vm1, 1.0, %v5591_v36 }
  0xfc   :  { %vm194_vm3 = vcmp.eq.s32.totalorder %v6545_v59, %v5668_v21  ;;  %vm586_vm4 = vcmp.eq.s32.totalorder %v6545_v59, %v5672_v23  ;;  %v968_v2 = vadd.f32 %v4559_v0, %v4431_v63  ;;  %vm1106_vm5 = vcmp.eq.s32.totalorder %v6545_v59, %v5676_v25 }
  0xfd   :  { %v4024_v4 = vadd.f32 %v5263_v57, %v3504_v60  ;;  %v4026_v5 = vadd.f32 %v5265_v58, %v3506_v62  ;;  %v4433_v6 = vsel %vm194_vm3, 1.0, %v5591_v36  ;;  %v4561_v7 = vsel %vm586_vm4, 1.0, %v5591_v36 }
  0xfe   :  { %v970_v8 = vadd.f32 %v4561_v7, %v4433_v6  ;;  %v4687_v9 = vsel %vm1104_vm2, 1.0, %v5591_v36  ;;  %v4689_v39 = vsel %vm1106_vm5, 1.0, %v5591_v36  ;;  %vm1624_vm6 = vcmp.eq.s32.totalorder %v6540_v54, %v5680_v27 }
  0xff   :  { %v5391_v61 = vpack.c.bf16 %v4026_v5, %v4024_v4  ;;  %v1488_v40 = vadd.f32 %v4687_v9, %v968_v2  ;;  %vm1626_vm7 = vcmp.eq.s32.totalorder %v6545_v59, %v5680_v27  ;;  %v4815_v17 = vsel %vm1624_vm6, 1.0, %v5591_v36 }
 0x100   :  { %v1490_v18 = vadd.f32 %v4689_v39, %v970_v8  ;;  %v4817_v41 = vsel %vm1626_vm7, 1.0, %v5591_v36  ;;  %vm2144_vm8 = vcmp.eq.s32.totalorder %v6540_v54, %v5684_v29  ;;  %vm2146_vm9 = vcmp.eq.s32.totalorder %v6545_v59, %v5684_v29 }
 0x101   :  { %5392 = vmatprep.subr.bf16.mxu1 %v5391_v61  ;;  %v2008_v42 = vadd.f32 %v4815_v17, %v1488_v40  ;;  %v4943_v11 = vsel %vm2144_vm8, 1.0, %v5591_v36  ;;  %v4945_v12 = vsel %vm2146_vm9, 1.0, %v5591_v36  ;;  %vm2664_vm10 = vcmp.eq.s32.totalorder %v6540_v54, %v5688_v31 }
 0x102   :  { %v2010_v43 = vadd.f32 %v4817_v41, %v1490_v18  ;;  %vm2666_vm11 = vcmp.eq.s32.totalorder %v6545_v59, %v5688_v31  ;;  %v5071_v44 = vsel %vm2664_vm10, 1.0, %v5591_v36  ;;  %vm3184_vm12 = vcmp.eq.s32.totalorder %v6540_v54, %v5692_v33 }
 0x103   :  { %v2528_v45 = vadd.f32 %v4943_v11, %v2008_v42  ;;  %v5073_v46 = vsel %vm2666_vm11, 1.0, %v5591_v36  ;;  %vm3186_vm13 = vcmp.eq.s32.totalorder %v6545_v59, %v5692_v33  ;;  %v5199_v47 = vsel %vm3184_vm12, 1.0, %v5591_v36 }
 0x104   :  { %v2530_v37 = vadd.f32 %v4945_v12, %v2010_v43  ;;  %v5201_v38 = vsel %vm3186_vm13, 1.0, %v5591_v36  ;;  %vm3704_vm14 = vcmp.eq.s32.totalorder %v6540_v54, %v5696_v35  ;;  %vm3706_vm15 = vcmp.eq.s32.totalorder %v6545_v59, %v5696_v35 }
 0x105   :  { %v3048_v19 = vadd.f32 %v5071_v44, %v2528_v45  ;;  %v5327_v15 = vsel %vm3704_vm14, 1.0, %v5591_v36  ;;  %v5329_v48 = vsel %vm3706_vm15, 1.0, %v5591_v36  ;;  %vm127_vm0 = vcmp.eq.s32.totalorder %v6296_v3, %v5666_v20 }
 0x106   :  { %v3050_v49 = vadd.f32 %v5073_v46, %v2530_v37  ;;  %vm129_vm1 = vcmp.eq.s32.totalorder %v6491_v14, %v5666_v20  ;;  %v4366_v13 = vsel %vm127_vm0, 1.0, %v5591_v36  ;;  %vm519_vm2 = vcmp.eq.s32.totalorder %v6296_v3, %v5670_v22 }
 0x107   :  { %v3568_v16 = vadd.f32 %v5199_v47, %v3048_v19  ;;  %v4368_v50 = vsel %vm129_vm1, 1.0, %v5591_v36  ;;  %vm521_vm3 = vcmp.eq.s32.totalorder %v6491_v14, %v5670_v22  ;;  %v4494_v10 = vsel %vm519_vm2, 1.0, %v5591_v36 }
 0x108   :  { %v3570_v51 = vadd.f32 %v5201_v38, %v3050_v49  ;;  %v4496_v52 = vsel %vm521_vm3, 1.0, %v5591_v36  ;;  %v903_v53 = vadd.f32 %v4494_v10, %v4366_v13  ;;  %vm1039_vm4 = vcmp.eq.s32.totalorder %v6296_v3, %v5674_v24 }
 0x109   :  { %v4088_v55 = vadd.f32 %v5327_v15, %v3568_v16  ;;  %v905_v56 = vadd.f32 %v4496_v52, %v4368_v50  ;;  %vm1041_vm5 = vcmp.eq.s32.totalorder %v6491_v14, %v5674_v24  ;;  %v4622_v57 = vsel %vm1039_vm4, 1.0, %v5591_v36 }
 0x10a   :  { %v4090_v58 = vadd.f32 %v5329_v48, %v3570_v51  ;;  %v4624_v60 = vsel %vm1041_vm5, 1.0, %v5591_v36  ;;  %v1423_v62 = vadd.f32 %v4622_v57, %v903_v53  ;;  %vm1559_vm6 = vcmp.eq.s32.totalorder %v6296_v3, %v5678_v26 }
 0x10b   :  { %v1425_v63 = vadd.f32 %v4624_v60, %v905_v56  ;;  %vm1561_vm7 = vcmp.eq.s32.totalorder %v6491_v14, %v5678_v26  ;;  %v4750_v0 = vsel %vm1559_vm6, 1.0, %v5591_v36  ;;  %vm2079_vm8 = vcmp.eq.s32.totalorder %v6296_v3, %v5682_v28 }
 0x10c   :  { %v5455_v2 = vpack.c.bf16 %v4090_v58, %v4088_v55  ;;  %v4752_v4 = vsel %vm1561_vm7, 1.0, %v5591_v36  ;;  %v1943_v5 = vadd.f32 %v4750_v0, %v1423_v62  ;;  %vm2081_vm9 = vcmp.eq.s32.totalorder %v6491_v14, %v5682_v28 }
 0x10d   :  { %v1945_v6 = vadd.f32 %v4752_v4, %v1425_v63  ;;  %v4878_v7 = vsel %vm2079_vm8, 1.0, %v5591_v36  ;;  %v4880_v8 = vsel %vm2081_vm9, 1.0, %v5591_v36  ;;  %vm2599_vm10 = vcmp.eq.s32.totalorder %v6296_v3, %v5686_v30 }
 0x10e   :  { %5456 = vmatprep.subr.bf16.mxu0 %v5455_v2  ;;  %v2463_v9 = vadd.f32 %v4878_v7, %v1943_v5  ;;  %vm2601_vm11 = vcmp.eq.s32.totalorder %v6491_v14, %v5686_v30  ;;  %v5006_v39 = vsel %vm2599_vm10, 1.0, %v5591_v36  ;;  %vm3119_vm12 = vcmp.eq.s32.totalorder %v6296_v3, %v5690_v32 }
 0x10f   :  { %v2465_v61 = vadd.f32 %v4880_v8, %v1945_v6  ;;  %v5008_v40 = vsel %vm2601_vm11, 1.0, %v5591_v36  ;;  %vm3121_vm13 = vcmp.eq.s32.totalorder %v6491_v14, %v5690_v32  ;;  %v5134_v17 = vsel %vm3119_vm12, 1.0, %v5591_v36 }
 0x110   :  { %v2983_v18 = vadd.f32 %v5006_v39, %v2463_v9  ;;  %v5136_v41 = vsel %vm3121_vm13, 1.0, %v5591_v36  ;;  %vm3639_vm14 = vcmp.eq.s32.totalorder %v6296_v3, %v5694_v34  ;;  %vm3641_vm15 = vcmp.eq.s32.totalorder %v6491_v14, %v5694_v34 }
 0x111   :  { %v2985_v42 = vadd.f32 %v5008_v40, %v2465_v61  ;;  %v5262_v11 = vsel %vm3639_vm14, 1.0, %v5591_v36  ;;  %v5264_v12 = vsel %vm3641_vm15, 1.0, %v5591_v36  ;;  %vm191_vm0 = vcmp.eq.s32.totalorder %v6540_v54, %v5666_v20 }
 0x112   :  { %v3503_v43 = vadd.f32 %v5134_v17, %v2983_v18  ;;  %vm193_vm1 = vcmp.eq.s32.totalorder %v6545_v59, %v5666_v20  ;;  %v4430_v44 = vsel %vm191_vm0, 1.0, %v5591_v36  ;;  %vm583_vm2 = vcmp.eq.s32.totalorder %v6540_v54, %v5670_v22 }
 0x113   :  { %v3505_v3 = vadd.f32 %v5136_v41, %v2985_v42  ;;  %v4432_v14 = vsel %vm193_vm1, 1.0, %v5591_v36  ;;  %vm585_vm3 = vcmp.eq.s32.totalorder %v6545_v59, %v5670_v22  ;;  %v4558_v45 = vsel %vm583_vm2, 1.0, %v5591_v36 }
 0x114   :  { %v4023_v46 = vadd.f32 %v5262_v11, %v3503_v43  ;;  %v4560_v47 = vsel %vm585_vm3, 1.0, %v5591_v36  ;;  %v967_v37 = vadd.f32 %v4558_v45, %v4430_v44  ;;  %vm1103_vm4 = vcmp.eq.s32.totalorder %v6540_v54, %v5674_v24 }
 0x115   :  { %v4025_v38 = vadd.f32 %v5264_v12, %v3505_v3  ;;  %v969_v19 = vadd.f32 %v4560_v47, %v4432_v14  ;;  %vm1105_vm5 = vcmp.eq.s32.totalorder %v6545_v59, %v5674_v24  ;;  %v4686_v15 = vsel %vm1103_vm4, 1.0, %v5591_v36 }
 0x116   :  { %v4688_v48 = vsel %vm1105_vm5, 1.0, %v5591_v36  ;;  %v1487_v49 = vadd.f32 %v4686_v15, %v967_v37  ;;  %vm1623_vm6 = vcmp.eq.s32.totalorder %v6540_v54, %v5678_v26  ;;  %vm1625_vm7 = vcmp.eq.s32.totalorder %v6545_v59, %v5678_v26 }
 0x117   :  { %v5393_v13 = vpack.c.bf16 %v4025_v38, %v4023_v46  ;;  %v1489_v16 = vadd.f32 %v4688_v48, %v969_v19  ;;  %v4814_v50 = vsel %vm1623_vm6, 1.0, %v5591_v36  ;;  %v4816_v10 = vsel %vm1625_vm7, 1.0, %v5591_v36 }
 0x118   :  { %v2007_v51 = vadd.f32 %v4814_v50, %v1487_v49  ;;  %vm2143_vm8 = vcmp.eq.s32.totalorder %v6540_v54, %v5682_v28  ;;  %vm2145_vm9 = vcmp.eq.s32.totalorder %v6545_v59, %v5682_v28  ;;  %vm2663_vm10 = vcmp.eq.s32.totalorder %v6540_v54, %v5686_v30 }
 0x119   :  { %5394 = vmatpush1.bf16.msra.mxu1 %v5393_v13  ;;  %v2009_v52 = vadd.f32 %v4816_v10, %v1489_v16  ;;  %v4942_v53 = vsel %vm2143_vm8, 1.0, %v5591_v36  ;;  %v4944_v55 = vsel %vm2145_vm9, 1.0, %v5591_v36  ;;  %vm2665_vm11 = vcmp.eq.s32.totalorder %v6545_v59, %v5686_v30 }
 0x11a   :  { %v2527_v56 = vadd.f32 %v4942_v53, %v2007_v51  ;;  %v5070_v57 = vsel %vm2663_vm10, 1.0, %v5591_v36  ;;  %v5072_v58 = vsel %vm2665_vm11, 1.0, %v5591_v36  ;;  %vm3183_vm12 = vcmp.eq.s32.totalorder %v6540_v54, %v5690_v32 }
 0x11b   :  { %v2529_v60 = vadd.f32 %v4944_v55, %v2009_v52  ;;  %vm3185_vm13 = vcmp.eq.s32.totalorder %v6545_v59, %v5690_v32  ;;  %v5198_v62 = vsel %vm3183_vm12, 1.0, %v5591_v36  ;;  %vm3703_vm14 = vcmp.eq.s32.totalorder %v6540_v54, %v5694_v34 }
 0x11c   :  { %v3047_v63 = vadd.f32 %v5070_v57, %v2527_v56  ;;  %v5200_v0 = vsel %vm3185_vm13, 1.0, %v5591_v36  ;;  %vm3705_vm15 = vcmp.eq.s32.totalorder %v6545_v59, %v5694_v34  ;;  %v5326_v2 = vsel %vm3703_vm14, 1.0, %v5591_v36 }
 0x11d   :  { %v3049_v4 = vadd.f32 %v5072_v58, %v2529_v60  ;;  %v5328_v5 = vsel %vm3705_vm15, 1.0, %v5591_v36  ;;  %v6692_v6 = vadd.s32 80, %v5632_v1  ;;  %v6695_v7 = vadd.s32 88, %v5632_v1 }
 0x11e   :  { %v3567_v8 = vadd.f32 %v5198_v62, %v3047_v63  ;;  %v6698_v54 = vadd.s32 336, %v5632_v1  ;;  %v6701_v9 = vadd.s32 344, %v5632_v1  ;;  %v6704_v59 = vadd.s32 96, %v5632_v1 }
 0x11f   :  { %v3569_v39 = vadd.f32 %v5200_v0, %v3049_v4  ;;  %vm132_vm0 = vcmp.eq.s32.totalorder %v6692_v6, %v5668_v21  ;;  %vm134_vm1 = vcmp.eq.s32.totalorder %v6695_v7, %v5668_v21  ;;  %vm524_vm2 = vcmp.eq.s32.totalorder %v6692_v6, %v5672_v23 }
 0x120   :  { %v4087_v61 = vadd.f32 %v5326_v2, %v3567_v8  ;;  %v4371_v40 = vsel %vm132_vm0, 1.0, %v5591_v36  ;;  %v4373_v17 = vsel %vm134_vm1, 1.0, %v5591_v36  ;;  %vm526_vm3 = vcmp.eq.s32.totalorder %v6695_v7, %v5672_v23 }
 0x121   :  { %v4089_v18 = vadd.f32 %v5328_v5, %v3569_v39  ;;  %v4499_v41 = vsel %vm524_vm2, 1.0, %v5591_v36  ;;  %v4501_v42 = vsel %vm526_vm3, 1.0, %v5591_v36  ;;  %vm1044_vm4 = vcmp.eq.s32.totalorder %v6692_v6, %v5676_v25 }
 0x122   :  { %v908_v11 = vadd.f32 %v4499_v41, %v4371_v40  ;;  %v910_v12 = vadd.f32 %v4501_v42, %v4373_v17  ;;  %vm1046_vm5 = vcmp.eq.s32.totalorder %v6695_v7, %v5676_v25  ;;  %v4627_v43 = vsel %vm1044_vm4, 1.0, %v5591_v36 }
 0x123   :  { %v5457_v44 = vpack.c.bf16 %v4089_v18, %v4087_v61  ;;  %v4629_v3 = vsel %vm1046_vm5, 1.0, %v5591_v36  ;;  %vm1564_vm6 = vcmp.eq.s32.totalorder %v6692_v6, %v5680_v27  ;;  %vm1566_vm7 = vcmp.eq.s32.totalorder %v6695_v7, %v5680_v27 }
 0x124   :  { %v1428_v14 = vadd.f32 %v4627_v43, %v908_v11  ;;  %v1430_v45 = vadd.f32 %v4629_v3, %v910_v12  ;;  %v4755_v46 = vsel %vm1564_vm6, 1.0, %v5591_v36  ;;  %v4757_v47 = vsel %vm1566_vm7, 1.0, %v5591_v36 }
 0x125   :  { %5458 = vmatpush1.bf16.msra.mxu0 %v5457_v44  ;;  %vm2084_vm8 = vcmp.eq.s32.totalorder %v6692_v6, %v5684_v29  ;;  %vm2086_vm9 = vcmp.eq.s32.totalorder %v6695_v7, %v5684_v29  ;;  %vm2604_vm10 = vcmp.eq.s32.totalorder %v6692_v6, %v5688_v31  ;;  %vm2606_vm11 = vcmp.eq.s32.totalorder %v6695_v7, %v5688_v31 }
 0x126   :  { %v1948_v37 = vadd.f32 %v4755_v46, %v1428_v14  ;;  %v1950_v38 = vadd.f32 %v4757_v47, %v1430_v45  ;;  %v4883_v19 = vsel %vm2084_vm8, 1.0, %v5591_v36  ;;  %v4885_v15 = vsel %vm2086_vm9, 1.0, %v5591_v36 }
 0x127   :  { %v5011_v48 = vsel %vm2604_vm10, 1.0, %v5591_v36  ;;  %v5013_v49 = vsel %vm2606_vm11, 1.0, %v5591_v36  ;;  %vm3124_vm12 = vcmp.eq.s32.totalorder %v6692_v6, %v5692_v33  ;;  %vm3126_vm13 = vcmp.eq.s32.totalorder %v6695_v7, %v5692_v33 }
 0x128   :  { %v2468_v13 = vadd.f32 %v4883_v19, %v1948_v37  ;;  %v2470_v16 = vadd.f32 %v4885_v15, %v1950_v38  ;;  %v5139_v50 = vsel %vm3124_vm12, 1.0, %v5591_v36  ;;  %v5141_v10 = vsel %vm3126_vm13, 1.0, %v5591_v36 }
 0x129   :  { %vm3644_vm14 = vcmp.eq.s32.totalorder %v6692_v6, %v5696_v35  ;;  %vm3646_vm15 = vcmp.eq.s32.totalorder %v6695_v7, %v5696_v35  ;;  %vm196_vm0 = vcmp.eq.s32.totalorder %v6698_v54, %v5668_v21  ;;  %vm198_vm1 = vcmp.eq.s32.totalorder %v6701_v9, %v5668_v21 }
 0x12a   :  { %v2988_v51 = vadd.f32 %v5011_v48, %v2468_v13  ;;  %v2990_v52 = vadd.f32 %v5013_v49, %v2470_v16  ;;  %v5267_v53 = vsel %vm3644_vm14, 1.0, %v5591_v36  ;;  %v5269_v55 = vsel %vm3646_vm15, 1.0, %v5591_v36 }
 0x12b   :  { %v4435_v56 = vsel %vm196_vm0, 1.0, %v5591_v36  ;;  %v4437_v57 = vsel %vm198_vm1, 1.0, %v5591_v36  ;;  %vm588_vm2 = vcmp.eq.s32.totalorder %v6698_v54, %v5672_v23  ;;  %vm590_vm3 = vcmp.eq.s32.totalorder %v6701_v9, %v5672_v23 }
 0x12c   :  { %v3508_v58 = vadd.f32 %v5139_v50, %v2988_v51  ;;  %v3510_v60 = vadd.f32 %v5141_v10, %v2990_v52  ;;  %v4563_v62 = vsel %vm588_vm2, 1.0, %v5591_v36  ;;  %v4565_v63 = vsel %vm590_vm3, 1.0, %v5591_v36 }
 0x12d   :  { %v972_v0 = vadd.f32 %v4563_v62, %v4435_v56  ;;  %v974_v2 = vadd.f32 %v4565_v63, %v4437_v57  ;;  %vm1108_vm4 = vcmp.eq.s32.totalorder %v6698_v54, %v5676_v25  ;;  %vm1110_vm5 = vcmp.eq.s32.totalorder %v6701_v9, %v5676_v25 }
 0x12e   :  { %v4028_v4 = vadd.f32 %v5267_v53, %v3508_v58  ;;  %v4030_v5 = vadd.f32 %v5269_v55, %v3510_v60  ;;  %v4691_v8 = vsel %vm1108_vm4, 1.0, %v5591_v36  ;;  %v4693_v39 = vsel %vm1110_vm5, 1.0, %v5591_v36 }
 0x12f   :  { %v1492_v61 = vadd.f32 %v4691_v8, %v972_v0  ;;  %v1494_v40 = vadd.f32 %v4693_v39, %v974_v2  ;;  %vm1628_vm6 = vcmp.eq.s32.totalorder %v6698_v54, %v5680_v27  ;;  %vm1630_vm7 = vcmp.eq.s32.totalorder %v6701_v9, %v5680_v27 }
 0x130   :  { %v5395_v17 = vpack.c.bf16 %v4030_v5, %v4028_v4  ;;  %v4819_v18 = vsel %vm1628_vm6, 1.0, %v5591_v36  ;;  %v4821_v41 = vsel %vm1630_vm7, 1.0, %v5591_v36  ;;  %vm2148_vm8 = vcmp.eq.s32.totalorder %v6698_v54, %v5684_v29 }
 0x131   :  { %v2012_v42 = vadd.f32 %v4819_v18, %v1492_v61  ;;  %v2014_v11 = vadd.f32 %v4821_v41, %v1494_v40  ;;  %vm2150_vm9 = vcmp.eq.s32.totalorder %v6701_v9, %v5684_v29  ;;  %v4947_v12 = vsel %vm2148_vm8, 1.0, %v5591_v36 }
 0x132   :  { %5396 = vmatprep.subr.bf16.mxu1 %v5395_v17  ;;  %v4949_v43 = vsel %vm2150_vm9, 1.0, %v5591_v36  ;;  %vm2668_vm10 = vcmp.eq.s32.totalorder %v6698_v54, %v5688_v31  ;;  %vm2670_vm11 = vcmp.eq.s32.totalorder %v6701_v9, %v5688_v31  ;;  %vm3188_vm12 = vcmp.eq.s32.totalorder %v6698_v54, %v5692_v33 }
 0x133   :  { %v2532_v44 = vadd.f32 %v4947_v12, %v2012_v42  ;;  %v2534_v3 = vadd.f32 %v4949_v43, %v2014_v11  ;;  %v5075_v14 = vsel %vm2668_vm10, 1.0, %v5591_v36  ;;  %v5077_v45 = vsel %vm2670_vm11, 1.0, %v5591_v36 }
 0x134   :  { %vm3190_vm13 = vcmp.eq.s32.totalorder %v6701_v9, %v5692_v33  ;;  %v5203_v46 = vsel %vm3188_vm12, 1.0, %v5591_v36  ;;  %vm3708_vm14 = vcmp.eq.s32.totalorder %v6698_v54, %v5696_v35  ;;  %vm3710_vm15 = vcmp.eq.s32.totalorder %v6701_v9, %v5696_v35 }
 0x135   :  { %v3052_v47 = vadd.f32 %v5075_v14, %v2532_v44  ;;  %v3054_v37 = vadd.f32 %v5077_v45, %v2534_v3  ;;  %v5205_v38 = vsel %vm3190_vm13, 1.0, %v5591_v36  ;;  %v5331_v19 = vsel %vm3708_vm14, 1.0, %v5591_v36 }
 0x136   :  { %v5333_v15 = vsel %vm3710_vm15, 1.0, %v5591_v36  ;;  %vm131_vm0 = vcmp.eq.s32.totalorder %v6692_v6, %v5666_v20  ;;  %vm133_vm1 = vcmp.eq.s32.totalorder %v6695_v7, %v5666_v20  ;;  %vm523_vm2 = vcmp.eq.s32.totalorder %v6692_v6, %v5670_v22 }
 0x137   :  { %v3572_v48 = vadd.f32 %v5203_v46, %v3052_v47  ;;  %v3574_v49 = vadd.f32 %v5205_v38, %v3054_v37  ;;  %v4370_v13 = vsel %vm131_vm0, 1.0, %v5591_v36  ;;  %v4372_v16 = vsel %vm133_vm1, 1.0, %v5591_v36 }
 0x138   :  { %vm525_vm3 = vcmp.eq.s32.totalorder %v6695_v7, %v5670_v22  ;;  %v4498_v50 = vsel %vm523_vm2, 1.0, %v5591_v36  ;;  %vm1043_vm4 = vcmp.eq.s32.totalorder %v6692_v6, %v5674_v24  ;;  %vm1045_vm5 = vcmp.eq.s32.totalorder %v6695_v7, %v5674_v24 }
 0x139   :  { %v4092_v10 = vadd.f32 %v5331_v19, %v3572_v48  ;;  %v4094_v51 = vadd.f32 %v5333_v15, %v3574_v49  ;;  %v4500_v52 = vsel %vm525_vm3, 1.0, %v5591_v36  ;;  %v907_v53 = vadd.f32 %v4498_v50, %v4370_v13 }
 0x13a   :  { %v909_v55 = vadd.f32 %v4500_v52, %v4372_v16  ;;  %v4626_v56 = vsel %vm1043_vm4, 1.0, %v5591_v36  ;;  %v4628_v57 = vsel %vm1045_vm5, 1.0, %v5591_v36  ;;  %vm1563_vm6 = vcmp.eq.s32.totalorder %v6692_v6, %v5678_v26 }
 0x13b   :  { %v5459_v58 = vpack.c.bf16 %v4094_v51, %v4092_v10  ;;  %v1427_v60 = vadd.f32 %v4626_v56, %v907_v53  ;;  %vm1565_vm7 = vcmp.eq.s32.totalorder %v6695_v7, %v5678_v26  ;;  %v4754_v62 = vsel %vm1563_vm6, 1.0, %v5591_v36 }
 0x13c   :  { %v1429_v63 = vadd.f32 %v4628_v57, %v909_v55  ;;  %v4756_v0 = vsel %vm1565_vm7, 1.0, %v5591_v36  ;;  %vm2083_vm8 = vcmp.eq.s32.totalorder %v6692_v6, %v5682_v28  ;;  %vm2085_vm9 = vcmp.eq.s32.totalorder %v6695_v7, %v5682_v28 }
 0x13d   :  { %5460 = vmatprep.subr.bf16.mxu0 %v5459_v58  ;;  %v1947_v2 = vadd.f32 %v4754_v62, %v1427_v60  ;;  %v4882_v4 = vsel %vm2083_vm8, 1.0, %v5591_v36  ;;  %v4884_v5 = vsel %vm2085_vm9, 1.0, %v5591_v36  ;;  %vm2603_vm10 = vcmp.eq.s32.totalorder %v6692_v6, %v5686_v30 }
 0x13e   :  { %v1949_v8 = vadd.f32 %v4756_v0, %v1429_v63  ;;  %vm2605_vm11 = vcmp.eq.s32.totalorder %v6695_v7, %v5686_v30  ;;  %v5010_v39 = vsel %vm2603_vm10, 1.0, %v5591_v36  ;;  %vm3123_vm12 = vcmp.eq.s32.totalorder %v6692_v6, %v5690_v32 }
 0x13f   :  { %v2467_v61 = vadd.f32 %v4882_v4, %v1947_v2  ;;  %v5012_v40 = vsel %vm2605_vm11, 1.0, %v5591_v36  ;;  %vm3125_vm13 = vcmp.eq.s32.totalorder %v6695_v7, %v5690_v32  ;;  %v5138_v17 = vsel %vm3123_vm12, 1.0, %v5591_v36 }
 0x140   :  { %v2469_v18 = vadd.f32 %v4884_v5, %v1949_v8  ;;  %v5140_v41 = vsel %vm3125_vm13, 1.0, %v5591_v36  ;;  %vm3643_vm14 = vcmp.eq.s32.totalorder %v6692_v6, %v5694_v34  ;;  %vm3645_vm15 = vcmp.eq.s32.totalorder %v6695_v7, %v5694_v34 }
 0x141   :  { %v2987_v42 = vadd.f32 %v5010_v39, %v2467_v61  ;;  %v5266_v11 = vsel %vm3643_vm14, 1.0, %v5591_v36  ;;  %v5268_v12 = vsel %vm3645_vm15, 1.0, %v5591_v36  ;;  %vm195_vm0 = vcmp.eq.s32.totalorder %v6698_v54, %v5666_v20 }
 0x142   :  { %v2989_v43 = vadd.f32 %v5012_v40, %v2469_v18  ;;  %vm197_vm1 = vcmp.eq.s32.totalorder %v6701_v9, %v5666_v20  ;;  %v4434_v44 = vsel %vm195_vm0, 1.0, %v5591_v36  ;;  %vm587_vm2 = vcmp.eq.s32.totalorder %v6698_v54, %v5670_v22 }
 0x143   :  { %v3507_v6 = vadd.f32 %v5138_v17, %v2987_v42  ;;  %v4436_v7 = vsel %vm197_vm1, 1.0, %v5591_v36  ;;  %vm589_vm3 = vcmp.eq.s32.totalorder %v6701_v9, %v5670_v22  ;;  %v4562_v3 = vsel %vm587_vm2, 1.0, %v5591_v36 }
 0x144   :  { %v3509_v14 = vadd.f32 %v5140_v41, %v2989_v43  ;;  %v4564_v45 = vsel %vm589_vm3, 1.0, %v5591_v36  ;;  %v971_v46 = vadd.f32 %v4562_v3, %v4434_v44  ;;  %vm1107_vm4 = vcmp.eq.s32.totalorder %v6698_v54, %v5674_v24 }
 0x145   :  { %v4027_v47 = vadd.f32 %v5266_v11, %v3507_v6  ;;  %v973_v37 = vadd.f32 %v4564_v45, %v4436_v7  ;;  %vm1109_vm5 = vcmp.eq.s32.totalorder %v6701_v9, %v5674_v24  ;;  %v4690_v38 = vsel %vm1107_vm4, 1.0, %v5591_v36 }
 0x146   :  { %v4029_v19 = vadd.f32 %v5268_v12, %v3509_v14  ;;  %v4692_v15 = vsel %vm1109_vm5, 1.0, %v5591_v36  ;;  %v1491_v48 = vadd.f32 %v4690_v38, %v971_v46  ;;  %vm1627_vm6 = vcmp.eq.s32.totalorder %v6698_v54, %v5678_v26 }
 0x147   :  { %v1493_v49 = vadd.f32 %v4692_v15, %v973_v37  ;;  %vm1629_vm7 = vcmp.eq.s32.totalorder %v6701_v9, %v5678_v26  ;;  %v4818_v13 = vsel %vm1627_vm6, 1.0, %v5591_v36  ;;  %vm2147_vm8 = vcmp.eq.s32.totalorder %v6698_v54, %v5682_v28 }
 0x148   :  { %v5397_v16 = vpack.c.bf16 %v4029_v19, %v4027_v47  ;;  %v4820_v50 = vsel %vm1629_vm7, 1.0, %v5591_v36  ;;  %v2011_v10 = vadd.f32 %v4818_v13, %v1491_v48  ;;  %vm2149_vm9 = vcmp.eq.s32.totalorder %v6701_v9, %v5682_v28 }
 0x149   :  { %v2013_v51 = vadd.f32 %v4820_v50, %v1493_v49  ;;  %v4946_v52 = vsel %vm2147_vm8, 1.0, %v5591_v36  ;;  %v4948_v53 = vsel %vm2149_vm9, 1.0, %v5591_v36  ;;  %vm2667_vm10 = vcmp.eq.s32.totalorder %v6698_v54, %v5686_v30 }
 0x14a   :  { %5398 = vmatpush1.bf16.msra.mxu1 %v5397_v16  ;;  %v2531_v55 = vadd.f32 %v4946_v52, %v2011_v10  ;;  %vm2669_vm11 = vcmp.eq.s32.totalorder %v6701_v9, %v5686_v30  ;;  %v5074_v56 = vsel %vm2667_vm10, 1.0, %v5591_v36  ;;  %vm3187_vm12 = vcmp.eq.s32.totalorder %v6698_v54, %v5690_v32 }
 0x14b   :  { %v2533_v57 = vadd.f32 %v4948_v53, %v2013_v51  ;;  %v5076_v58 = vsel %vm2669_vm11, 1.0, %v5591_v36  ;;  %vm3189_vm13 = vcmp.eq.s32.totalorder %v6701_v9, %v5690_v32  ;;  %v5202_v60 = vsel %vm3187_vm12, 1.0, %v5591_v36 }
 0x14c   :  { %v3051_v62 = vadd.f32 %v5074_v56, %v2531_v55  ;;  %v5204_v63 = vsel %vm3189_vm13, 1.0, %v5591_v36  ;;  %vm3707_vm14 = vcmp.eq.s32.totalorder %v6698_v54, %v5694_v34  ;;  %vm3709_vm15 = vcmp.eq.s32.totalorder %v6701_v9, %v5694_v34 }
 0x14d   :  { %v3053_v0 = vadd.f32 %v5076_v58, %v2533_v57  ;;  %v5330_v2 = vsel %vm3707_vm14, 1.0, %v5591_v36  ;;  %v5332_v4 = vsel %vm3709_vm15, 1.0, %v5591_v36  ;;  %v6899_v5 = vadd.s32 104, %v5632_v1 }
 0x14e   :  { %v3571_v8 = vadd.f32 %v5202_v60, %v3051_v62  ;;  %vm136_vm0 = vcmp.eq.s32.totalorder %v6704_v59, %v5668_v21  ;;  %vm528_vm1 = vcmp.eq.s32.totalorder %v6704_v59, %v5672_v23  ;;  %vm1048_vm2 = vcmp.eq.s32.totalorder %v6704_v59, %v5676_v25 }
 0x14f   :  { %v3573_v54 = vadd.f32 %v5204_v63, %v3053_v0  ;;  %vm138_vm3 = vcmp.eq.s32.totalorder %v6899_v5, %v5668_v21  ;;  %v4375_v9 = vsel %vm136_vm0, 1.0, %v5591_v36  ;;  %vm530_vm4 = vcmp.eq.s32.totalorder %v6899_v5, %v5672_v23 }
 0x150   :  { %v4091_v39 = vadd.f32 %v5330_v2, %v3571_v8  ;;  %v4377_v61 = vsel %vm138_vm3, 1.0, %v5591_v36  ;;  %v4503_v40 = vsel %vm528_vm1, 1.0, %v5591_v36  ;;  %v4505_v17 = vsel %vm530_vm4, 1.0, %v5591_v36 }
 0x151   :  { %v4093_v18 = vadd.f32 %v5332_v4, %v3573_v54  ;;  %v912_v41 = vadd.f32 %v4503_v40, %v4375_v9  ;;  %v914_v42 = vadd.f32 %v4505_v17, %v4377_v61  ;;  %vm1050_vm5 = vcmp.eq.s32.totalorder %v6899_v5, %v5676_v25 }
 0x152   :  { %v4631_v11 = vsel %vm1048_vm2, 1.0, %v5591_v36  ;;  %v4633_v12 = vsel %vm1050_vm5, 1.0, %v5591_v36  ;;  %vm1568_vm6 = vcmp.eq.s32.totalorder %v6704_v59, %v5680_v27  ;;  %vm1570_vm7 = vcmp.eq.s32.totalorder %v6899_v5, %v5680_v27 }
 0x153   :  { %v5461_v43 = vpack.c.bf16 %v4093_v18, %v4091_v39  ;;  %v1432_v44 = vadd.f32 %v4631_v11, %v912_v41  ;;  %v1434_v6 = vadd.f32 %v4633_v12, %v914_v42  ;;  %v4759_v7 = vsel %vm1568_vm6, 1.0, %v5591_v36 }
 0x154   :  { %v4761_v3 = vsel %vm1570_vm7, 1.0, %v5591_v36  ;;  %vm2088_vm8 = vcmp.eq.s32.totalorder %v6704_v59, %v5684_v29  ;;  %vm2090_vm9 = vcmp.eq.s32.totalorder %v6899_v5, %v5684_v29  ;;  %vm2608_vm10 = vcmp.eq.s32.totalorder %v6704_v59, %v5688_v31 }
 0x155   :  { %5462 = vmatpush1.bf16.msra.mxu0 %v5461_v43  ;;  %v1952_v14 = vadd.f32 %v4759_v7, %v1432_v44  ;;  %v1954_v45 = vadd.f32 %v4761_v3, %v1434_v6  ;;  %v4887_v46 = vsel %vm2088_vm8, 1.0, %v5591_v36  ;;  %v4889_v47 = vsel %vm2090_vm9, 1.0, %v5591_v36 }
 0x156   :  { %vm2610_vm11 = vcmp.eq.s32.totalorder %v6899_v5, %v5688_v31  ;;  %v5015_v37 = vsel %vm2608_vm10, 1.0, %v5591_v36  ;;  %vm3128_vm12 = vcmp.eq.s32.totalorder %v6704_v59, %v5692_v33  ;;  %vm3130_vm13 = vcmp.eq.s32.totalorder %v6899_v5, %v5692_v33 }
 0x157   :  { %v2472_v38 = vadd.f32 %v4887_v46, %v1952_v14  ;;  %v2474_v19 = vadd.f32 %v4889_v47, %v1954_v45  ;;  %v5017_v15 = vsel %vm2610_vm11, 1.0, %v5591_v36  ;;  %v5143_v48 = vsel %vm3128_vm12, 1.0, %v5591_v36 }
 0x158   :  { %v5145_v49 = vsel %vm3130_vm13, 1.0, %v5591_v36  ;;  %vm3648_vm14 = vcmp.eq.s32.totalorder %v6704_v59, %v5696_v35  ;;  %vm3650_vm15 = vcmp.eq.s32.totalorder %v6899_v5, %v5696_v35  ;;  %v6948_v13 = vadd.s32 352, %v5632_v1 }
 0x159   :  { %v2992_v16 = vadd.f32 %v5015_v37, %v2472_v38  ;;  %v2994_v50 = vadd.f32 %v5017_v15, %v2474_v19  ;;  %v5271_v10 = vsel %vm3648_vm14, 1.0, %v5591_v36  ;;  %v5273_v51 = vsel %vm3650_vm15, 1.0, %v5591_v36 }
 0x15a   :  { %v6953_v52 = vadd.s32 360, %v5632_v1  ;;  %vm200_vm0 = vcmp.eq.s32.totalorder %v6948_v13, %v5668_v21  ;;  %vm592_vm1 = vcmp.eq.s32.totalorder %v6948_v13, %v5672_v23  ;;  %vm1112_vm2 = vcmp.eq.s32.totalorder %v6948_v13, %v5676_v25 }
 0x15b   :  { %v3512_v53 = vadd.f32 %v5143_v48, %v2992_v16  ;;  %v3514_v55 = vadd.f32 %v5145_v49, %v2994_v50  ;;  %v4439_v56 = vsel %vm200_vm0, 1.0, %v5591_v36  ;;  %v4567_v57 = vsel %vm592_vm1, 1.0, %v5591_v36 }
 0x15c   :  { %vm202_vm3 = vcmp.eq.s32.totalorder %v6953_v52, %v5668_v21  ;;  %vm594_vm4 = vcmp.eq.s32.totalorder %v6953_v52, %v5672_v23  ;;  %v976_v58 = vadd.f32 %v4567_v57, %v4439_v56  ;;  %vm1114_vm5 = vcmp.eq.s32.totalorder %v6953_v52, %v5676_v25 }
 0x15d   :  { %v4032_v60 = vadd.f32 %v5271_v10, %v3512_v53  ;;  %v4034_v62 = vadd.f32 %v5273_v51, %v3514_v55  ;;  %v4441_v63 = vsel %vm202_vm3, 1.0, %v5591_v36  ;;  %v4569_v0 = vsel %vm594_vm4, 1.0, %v5591_v36 }
 0x15e   :  { %v978_v2 = vadd.f32 %v4569_v0, %v4441_v63  ;;  %v4695_v4 = vsel %vm1112_vm2, 1.0, %v5591_v36  ;;  %v4697_v8 = vsel %vm1114_vm5, 1.0, %v5591_v36  ;;  %vm1632_vm6 = vcmp.eq.s32.totalorder %v6948_v13, %v5680_v27 }
 0x15f   :  { %v5399_v54 = vpack.c.bf16 %v4034_v62, %v4032_v60  ;;  %v1496_v9 = vadd.f32 %v4695_v4, %v976_v58  ;;  %vm1634_vm7 = vcmp.eq.s32.totalorder %v6953_v52, %v5680_v27  ;;  %v4823_v39 = vsel %vm1632_vm6, 1.0, %v5591_v36 }
 0x160   :  { %v1498_v61 = vadd.f32 %v4697_v8, %v978_v2  ;;  %v4825_v40 = vsel %vm1634_vm7, 1.0, %v5591_v36  ;;  %vm2152_vm8 = vcmp.eq.s32.totalorder %v6948_v13, %v5684_v29  ;;  %vm2154_vm9 = vcmp.eq.s32.totalorder %v6953_v52, %v5684_v29 }
 0x161   :  { %5400 = vmatprep.subr.bf16.mxu1 %v5399_v54  ;;  %v2016_v17 = vadd.f32 %v4823_v39, %v1496_v9  ;;  %v4951_v18 = vsel %vm2152_vm8, 1.0, %v5591_v36  ;;  %v4953_v41 = vsel %vm2154_vm9, 1.0, %v5591_v36  ;;  %vm2672_vm10 = vcmp.eq.s32.totalorder %v6948_v13, %v5688_v31 }
 0x162   :  { %v2018_v42 = vadd.f32 %v4825_v40, %v1498_v61  ;;  %vm2674_vm11 = vcmp.eq.s32.totalorder %v6953_v52, %v5688_v31  ;;  %v5079_v11 = vsel %vm2672_vm10, 1.0, %v5591_v36  ;;  %vm3192_vm12 = vcmp.eq.s32.totalorder %v6948_v13, %v5692_v33 }
 0x163   :  { %v2536_v12 = vadd.f32 %v4951_v18, %v2016_v17  ;;  %v5081_v43 = vsel %vm2674_vm11, 1.0, %v5591_v36  ;;  %vm3194_vm13 = vcmp.eq.s32.totalorder %v6953_v52, %v5692_v33  ;;  %v5207_v44 = vsel %vm3192_vm12, 1.0, %v5591_v36 }
 0x164   :  { %v2538_v6 = vadd.f32 %v4953_v41, %v2018_v42  ;;  %v5209_v7 = vsel %vm3194_vm13, 1.0, %v5591_v36  ;;  %vm3712_vm14 = vcmp.eq.s32.totalorder %v6948_v13, %v5696_v35  ;;  %vm3714_vm15 = vcmp.eq.s32.totalorder %v6953_v52, %v5696_v35 }
 0x165   :  { %v3056_v3 = vadd.f32 %v5079_v11, %v2536_v12  ;;  %v5335_v14 = vsel %vm3712_vm14, 1.0, %v5591_v36  ;;  %v5337_v45 = vsel %vm3714_vm15, 1.0, %v5591_v36  ;;  %vm135_vm0 = vcmp.eq.s32.totalorder %v6704_v59, %v5666_v20 }
 0x166   :  { %v3058_v46 = vadd.f32 %v5081_v43, %v2538_v6  ;;  %vm137_vm1 = vcmp.eq.s32.totalorder %v6899_v5, %v5666_v20  ;;  %v4374_v47 = vsel %vm135_vm0, 1.0, %v5591_v36  ;;  %vm527_vm2 = vcmp.eq.s32.totalorder %v6704_v59, %v5670_v22 }
 0x167   :  { %v3576_v37 = vadd.f32 %v5207_v44, %v3056_v3  ;;  %v4376_v38 = vsel %vm137_vm1, 1.0, %v5591_v36  ;;  %vm529_vm3 = vcmp.eq.s32.totalorder %v6899_v5, %v5670_v22  ;;  %v4502_v19 = vsel %vm527_vm2, 1.0, %v5591_v36 }
 0x168   :  { %v3578_v15 = vadd.f32 %v5209_v7, %v3058_v46  ;;  %v4504_v48 = vsel %vm529_vm3, 1.0, %v5591_v36  ;;  %v911_v49 = vadd.f32 %v4502_v19, %v4374_v47  ;;  %vm1047_vm4 = vcmp.eq.s32.totalorder %v6704_v59, %v5674_v24 }
 0x169   :  { %v4096_v16 = vadd.f32 %v5335_v14, %v3576_v37  ;;  %v913_v50 = vadd.f32 %v4504_v48, %v4376_v38  ;;  %vm1049_vm5 = vcmp.eq.s32.totalorder %v6899_v5, %v5674_v24  ;;  %v4630_v10 = vsel %vm1047_vm4, 1.0, %v5591_v36 }
 0x16a   :  { %v4098_v51 = vadd.f32 %v5337_v45, %v3578_v15  ;;  %v4632_v53 = vsel %vm1049_vm5, 1.0, %v5591_v36  ;;  %v1431_v55 = vadd.f32 %v4630_v10, %v911_v49  ;;  %vm1567_vm6 = vcmp.eq.s32.totalorder %v6704_v59, %v5678_v26 }
 0x16b   :  { %v1433_v56 = vadd.f32 %v4632_v53, %v913_v50  ;;  %vm1569_vm7 = vcmp.eq.s32.totalorder %v6899_v5, %v5678_v26  ;;  %v4758_v57 = vsel %vm1567_vm6, 1.0, %v5591_v36  ;;  %vm2087_vm8 = vcmp.eq.s32.totalorder %v6704_v59, %v5682_v28 }
 0x16c   :  { %v5463_v58 = vpack.c.bf16 %v4098_v51, %v4096_v16  ;;  %v4760_v60 = vsel %vm1569_vm7, 1.0, %v5591_v36  ;;  %v1951_v62 = vadd.f32 %v4758_v57, %v1431_v55  ;;  %vm2089_vm9 = vcmp.eq.s32.totalorder %v6899_v5, %v5682_v28 }
 0x16d   :  { %v1953_v63 = vadd.f32 %v4760_v60, %v1433_v56  ;;  %v4886_v0 = vsel %vm2087_vm8, 1.0, %v5591_v36  ;;  %v4888_v2 = vsel %vm2089_vm9, 1.0, %v5591_v36  ;;  %vm2607_vm10 = vcmp.eq.s32.totalorder %v6704_v59, %v5686_v30 }
 0x16e   :  { %5464 = vmatprep.subr.bf16.mxu0 %v5463_v58  ;;  %v2471_v4 = vadd.f32 %v4886_v0, %v1951_v62  ;;  %vm2609_vm11 = vcmp.eq.s32.totalorder %v6899_v5, %v5686_v30  ;;  %v5014_v8 = vsel %vm2607_vm10, 1.0, %v5591_v36  ;;  %vm3127_vm12 = vcmp.eq.s32.totalorder %v6704_v59, %v5690_v32 }
 0x16f   :  { %v2473_v54 = vadd.f32 %v4888_v2, %v1953_v63  ;;  %v5016_v9 = vsel %vm2609_vm11, 1.0, %v5591_v36  ;;  %vm3129_vm13 = vcmp.eq.s32.totalorder %v6899_v5, %v5690_v32  ;;  %v5142_v39 = vsel %vm3127_vm12, 1.0, %v5591_v36 }
 0x170   :  { %v2991_v61 = vadd.f32 %v5014_v8, %v2471_v4  ;;  %v5144_v40 = vsel %vm3129_vm13, 1.0, %v5591_v36  ;;  %vm3647_vm14 = vcmp.eq.s32.totalorder %v6704_v59, %v5694_v34  ;;  %vm3649_vm15 = vcmp.eq.s32.totalorder %v6899_v5, %v5694_v34 }
 0x171   :  { %v2993_v17 = vadd.f32 %v5016_v9, %v2473_v54  ;;  %v5270_v18 = vsel %vm3647_vm14, 1.0, %v5591_v36  ;;  %v5272_v41 = vsel %vm3649_vm15, 1.0, %v5591_v36  ;;  %vm199_vm0 = vcmp.eq.s32.totalorder %v6948_v13, %v5666_v20 }
 0x172   :  { %v3511_v42 = vadd.f32 %v5142_v39, %v2991_v61  ;;  %vm201_vm1 = vcmp.eq.s32.totalorder %v6953_v52, %v5666_v20  ;;  %v4438_v11 = vsel %vm199_vm0, 1.0, %v5591_v36  ;;  %vm591_vm2 = vcmp.eq.s32.totalorder %v6948_v13, %v5670_v22 }
 0x173   :  { %v3513_v59 = vadd.f32 %v5144_v40, %v2993_v17  ;;  %v4440_v5 = vsel %vm201_vm1, 1.0, %v5591_v36  ;;  %vm593_vm3 = vcmp.eq.s32.totalorder %v6953_v52, %v5670_v22  ;;  %v4566_v12 = vsel %vm591_vm2, 1.0, %v5591_v36 }
 0x174   :  { %v4031_v43 = vadd.f32 %v5270_v18, %v3511_v42  ;;  %v4568_v44 = vsel %vm593_vm3, 1.0, %v5591_v36  ;;  %v975_v6 = vadd.f32 %v4566_v12, %v4438_v11  ;;  %vm1111_vm4 = vcmp.eq.s32.totalorder %v6948_v13, %v5674_v24 }
 0x175   :  { %v4033_v7 = vadd.f32 %v5272_v41, %v3513_v59  ;;  %v977_v3 = vadd.f32 %v4568_v44, %v4440_v5  ;;  %vm1113_vm5 = vcmp.eq.s32.totalorder %v6953_v52, %v5674_v24  ;;  %v4694_v14 = vsel %vm1111_vm4, 1.0, %v5591_v36 }
 0x176   :  { %v4696_v45 = vsel %vm1113_vm5, 1.0, %v5591_v36  ;;  %v1495_v46 = vadd.f32 %v4694_v14, %v975_v6  ;;  %vm1631_vm6 = vcmp.eq.s32.totalorder %v6948_v13, %v5678_v26  ;;  %vm1633_vm7 = vcmp.eq.s32.totalorder %v6953_v52, %v5678_v26 }
 0x177   :  { %v5401_v47 = vpack.c.bf16 %v4033_v7, %v4031_v43  ;;  %v1497_v37 = vadd.f32 %v4696_v45, %v977_v3  ;;  %v4822_v38 = vsel %vm1631_vm6, 1.0, %v5591_v36  ;;  %v4824_v19 = vsel %vm1633_vm7, 1.0, %v5591_v36 }
 0x178   :  { %v2015_v15 = vadd.f32 %v4822_v38, %v1495_v46  ;;  %vm2151_vm8 = vcmp.eq.s32.totalorder %v6948_v13, %v5682_v28  ;;  %vm2153_vm9 = vcmp.eq.s32.totalorder %v6953_v52, %v5682_v28  ;;  %vm2671_vm10 = vcmp.eq.s32.totalorder %v6948_v13, %v5686_v30 }
 0x179   :  { %5402 = vmatpush1.bf16.msra.mxu1 %v5401_v47  ;;  %v2017_v48 = vadd.f32 %v4824_v19, %v1497_v37  ;;  %v4950_v49 = vsel %vm2151_vm8, 1.0, %v5591_v36  ;;  %v4952_v16 = vsel %vm2153_vm9, 1.0, %v5591_v36  ;;  %vm2673_vm11 = vcmp.eq.s32.totalorder %v6953_v52, %v5686_v30 }
 0x17a   :  { %v2535_v50 = vadd.f32 %v4950_v49, %v2015_v15  ;;  %v5078_v10 = vsel %vm2671_vm10, 1.0, %v5591_v36  ;;  %v5080_v51 = vsel %vm2673_vm11, 1.0, %v5591_v36  ;;  %vm3191_vm12 = vcmp.eq.s32.totalorder %v6948_v13, %v5690_v32 }
 0x17b   :  { %v2537_v53 = vadd.f32 %v4952_v16, %v2017_v48  ;;  %vm3193_vm13 = vcmp.eq.s32.totalorder %v6953_v52, %v5690_v32  ;;  %v5206_v55 = vsel %vm3191_vm12, 1.0, %v5591_v36  ;;  %vm3711_vm14 = vcmp.eq.s32.totalorder %v6948_v13, %v5694_v34 }
 0x17c   :  { %v3055_v56 = vadd.f32 %v5078_v10, %v2535_v50  ;;  %v5208_v57 = vsel %vm3193_vm13, 1.0, %v5591_v36  ;;  %vm3713_vm15 = vcmp.eq.s32.totalorder %v6953_v52, %v5694_v34  ;;  %v5334_v58 = vsel %vm3711_vm14, 1.0, %v5591_v36 }
 0x17d   :  { %v3057_v60 = vadd.f32 %v5080_v51, %v2537_v53  ;;  %v5336_v62 = vsel %vm3713_vm15, 1.0, %v5591_v36  ;;  %v7100_v63 = vadd.s32 112, %v5632_v1  ;;  %v7103_v0 = vadd.s32 120, %v5632_v1 }
 0x17e   :  { %v3575_v2 = vadd.f32 %v5206_v55, %v3055_v56  ;;  %v7106_v13 = vadd.s32 368, %v5632_v1  ;;  %v7109_v4 = vadd.s32 376, %v5632_v1  ;;  %v7112_v52 = vadd.s32 128, %v5632_v1 }
 0x17f   :  { %v3577_v8 = vadd.f32 %v5208_v57, %v3057_v60  ;;  %vm140_vm0 = vcmp.eq.s32.totalorder %v7100_v63, %v5668_v21  ;;  %vm142_vm1 = vcmp.eq.s32.totalorder %v7103_v0, %v5668_v21  ;;  %vm532_vm2 = vcmp.eq.s32.totalorder %v7100_v63, %v5672_v23 }
 0x180   :  { %v4095_v54 = vadd.f32 %v5334_v58, %v3575_v2  ;;  %v4379_v9 = vsel %vm140_vm0, 1.0, %v5591_v36  ;;  %v4381_v39 = vsel %vm142_vm1, 1.0, %v5591_v36  ;;  %vm534_vm3 = vcmp.eq.s32.totalorder %v7103_v0, %v5672_v23 }
 0x181   :  { %v4097_v61 = vadd.f32 %v5336_v62, %v3577_v8  ;;  %v4507_v40 = vsel %vm532_vm2, 1.0, %v5591_v36  ;;  %v4509_v17 = vsel %vm534_vm3, 1.0, %v5591_v36  ;;  %vm1052_vm4 = vcmp.eq.s32.totalorder %v7100_v63, %v5676_v25 }
 0x182   :  { %v916_v18 = vadd.f32 %v4507_v40, %v4379_v9  ;;  %v918_v41 = vadd.f32 %v4509_v17, %v4381_v39  ;;  %vm1054_vm5 = vcmp.eq.s32.totalorder %v7103_v0, %v5676_v25  ;;  %v4635_v42 = vsel %vm1052_vm4, 1.0, %v5591_v36 }
 0x183   :  { %v5465_v11 = vpack.c.bf16 %v4097_v61, %v4095_v54  ;;  %v4637_v59 = vsel %vm1054_vm5, 1.0, %v5591_v36  ;;  %vm1572_vm6 = vcmp.eq.s32.totalorder %v7100_v63, %v5680_v27  ;;  %vm1574_vm7 = vcmp.eq.s32.totalorder %v7103_v0, %v5680_v27 }
 0x184   :  { %v1436_v5 = vadd.f32 %v4635_v42, %v916_v18  ;;  %v1438_v12 = vadd.f32 %v4637_v59, %v918_v41  ;;  %v4763_v43 = vsel %vm1572_vm6, 1.0, %v5591_v36  ;;  %v4765_v44 = vsel %vm1574_vm7, 1.0, %v5591_v36 }
 0x185   :  { %5466 = vmatpush1.bf16.msra.mxu0 %v5465_v11  ;;  %vm2092_vm8 = vcmp.eq.s32.totalorder %v7100_v63, %v5684_v29  ;;  %vm2094_vm9 = vcmp.eq.s32.totalorder %v7103_v0, %v5684_v29  ;;  %vm2612_vm10 = vcmp.eq.s32.totalorder %v7100_v63, %v5688_v31  ;;  %vm2614_vm11 = vcmp.eq.s32.totalorder %v7103_v0, %v5688_v31 }
 0x186   :  { %v1956_v6 = vadd.f32 %v4763_v43, %v1436_v5  ;;  %v1958_v7 = vadd.f32 %v4765_v44, %v1438_v12  ;;  %v4891_v3 = vsel %vm2092_vm8, 1.0, %v5591_v36  ;;  %v4893_v14 = vsel %vm2094_vm9, 1.0, %v5591_v36 }
 0x187   :  { %v5019_v45 = vsel %vm2612_vm10, 1.0, %v5591_v36  ;;  %v5021_v46 = vsel %vm2614_vm11, 1.0, %v5591_v36  ;;  %vm3132_vm12 = vcmp.eq.s32.totalorder %v7100_v63, %v5692_v33  ;;  %vm3134_vm13 = vcmp.eq.s32.totalorder %v7103_v0, %v5692_v33 }
 0x188   :  { %v2476_v47 = vadd.f32 %v4891_v3, %v1956_v6  ;;  %v2478_v37 = vadd.f32 %v4893_v14, %v1958_v7  ;;  %v5147_v38 = vsel %vm3132_vm12, 1.0, %v5591_v36  ;;  %v5149_v19 = vsel %vm3134_vm13, 1.0, %v5591_v36 }
 0x189   :  { %vm3652_vm14 = vcmp.eq.s32.totalorder %v7100_v63, %v5696_v35  ;;  %vm3654_vm15 = vcmp.eq.s32.totalorder %v7103_v0, %v5696_v35  ;;  %vm204_vm0 = vcmp.eq.s32.totalorder %v7106_v13, %v5668_v21  ;;  %vm206_vm1 = vcmp.eq.s32.totalorder %v7109_v4, %v5668_v21 }
 0x18a   :  { %v2996_v15 = vadd.f32 %v5019_v45, %v2476_v47  ;;  %v2998_v48 = vadd.f32 %v5021_v46, %v2478_v37  ;;  %v5275_v49 = vsel %vm3652_vm14, 1.0, %v5591_v36  ;;  %v5277_v16 = vsel %vm3654_vm15, 1.0, %v5591_v36 }
 0x18b   :  { %v4443_v50 = vsel %vm204_vm0, 1.0, %v5591_v36  ;;  %v4445_v10 = vsel %vm206_vm1, 1.0, %v5591_v36  ;;  %vm596_vm2 = vcmp.eq.s32.totalorder %v7106_v13, %v5672_v23  ;;  %vm598_vm3 = vcmp.eq.s32.totalorder %v7109_v4, %v5672_v23 }
 0x18c   :  { %v3516_v51 = vadd.f32 %v5147_v38, %v2996_v15  ;;  %v3518_v53 = vadd.f32 %v5149_v19, %v2998_v48  ;;  %v4571_v55 = vsel %vm596_vm2, 1.0, %v5591_v36  ;;  %v4573_v56 = vsel %vm598_vm3, 1.0, %v5591_v36 }
 0x18d   :  { %v980_v57 = vadd.f32 %v4571_v55, %v4443_v50  ;;  %v982_v58 = vadd.f32 %v4573_v56, %v4445_v10  ;;  %vm1116_vm4 = vcmp.eq.s32.totalorder %v7106_v13, %v5676_v25  ;;  %vm1118_vm5 = vcmp.eq.s32.totalorder %v7109_v4, %v5676_v25 }
 0x18e   :  { %v4036_v60 = vadd.f32 %v5275_v49, %v3516_v51  ;;  %v4038_v62 = vadd.f32 %v5277_v16, %v3518_v53  ;;  %v4699_v2 = vsel %vm1116_vm4, 1.0, %v5591_v36  ;;  %v4701_v8 = vsel %vm1118_vm5, 1.0, %v5591_v36 }
 0x18f   :  { %v1500_v54 = vadd.f32 %v4699_v2, %v980_v57  ;;  %v1502_v9 = vadd.f32 %v4701_v8, %v982_v58  ;;  %vm1636_vm6 = vcmp.eq.s32.totalorder %v7106_v13, %v5680_v27  ;;  %vm1638_vm7 = vcmp.eq.s32.totalorder %v7109_v4, %v5680_v27 }
 0x190   :  { %v5403_v39 = vpack.c.bf16 %v4038_v62, %v4036_v60  ;;  %v4827_v61 = vsel %vm1636_vm6, 1.0, %v5591_v36  ;;  %v4829_v40 = vsel %vm1638_vm7, 1.0, %v5591_v36  ;;  %vm2156_vm8 = vcmp.eq.s32.totalorder %v7106_v13, %v5684_v29 }
 0x191   :  { %v2020_v17 = vadd.f32 %v4827_v61, %v1500_v54  ;;  %v2022_v18 = vadd.f32 %v4829_v40, %v1502_v9  ;;  %vm2158_vm9 = vcmp.eq.s32.totalorder %v7109_v4, %v5684_v29  ;;  %v4955_v41 = vsel %vm2156_vm8, 1.0, %v5591_v36 }
 0x192   :  { %5404 = vmatprep.subr.bf16.mxu1 %v5403_v39  ;;  %v4957_v42 = vsel %vm2158_vm9, 1.0, %v5591_v36  ;;  %vm2676_vm10 = vcmp.eq.s32.totalorder %v7106_v13, %v5688_v31  ;;  %vm2678_vm11 = vcmp.eq.s32.totalorder %v7109_v4, %v5688_v31  ;;  %vm3196_vm12 = vcmp.eq.s32.totalorder %v7106_v13, %v5692_v33 }
 0x193   :  { %v2540_v11 = vadd.f32 %v4955_v41, %v2020_v17  ;;  %v2542_v59 = vadd.f32 %v4957_v42, %v2022_v18  ;;  %v5083_v5 = vsel %vm2676_vm10, 1.0, %v5591_v36  ;;  %v5085_v12 = vsel %vm2678_vm11, 1.0, %v5591_v36 }
 0x194   :  { %vm3198_vm13 = vcmp.eq.s32.totalorder %v7109_v4, %v5692_v33  ;;  %v5211_v43 = vsel %vm3196_vm12, 1.0, %v5591_v36  ;;  %vm3716_vm14 = vcmp.eq.s32.totalorder %v7106_v13, %v5696_v35  ;;  %vm3718_vm15 = vcmp.eq.s32.totalorder %v7109_v4, %v5696_v35 }
 0x195   :  { %v3060_v44 = vadd.f32 %v5083_v5, %v2540_v11  ;;  %v3062_v6 = vadd.f32 %v5085_v12, %v2542_v59  ;;  %v5213_v7 = vsel %vm3198_vm13, 1.0, %v5591_v36  ;;  %v5339_v3 = vsel %vm3716_vm14, 1.0, %v5591_v36 }
 0x196   :  { %v5341_v14 = vsel %vm3718_vm15, 1.0, %v5591_v36  ;;  %vm139_vm0 = vcmp.eq.s32.totalorder %v7100_v63, %v5666_v20  ;;  %vm141_vm1 = vcmp.eq.s32.totalorder %v7103_v0, %v5666_v20  ;;  %vm531_vm2 = vcmp.eq.s32.totalorder %v7100_v63, %v5670_v22 }
 0x197   :  { %v3580_v45 = vadd.f32 %v5211_v43, %v3060_v44  ;;  %v3582_v46 = vadd.f32 %v5213_v7, %v3062_v6  ;;  %v4378_v47 = vsel %vm139_vm0, 1.0, %v5591_v36  ;;  %v4380_v37 = vsel %vm141_vm1, 1.0, %v5591_v36 }
 0x198   :  { %vm533_vm3 = vcmp.eq.s32.totalorder %v7103_v0, %v5670_v22  ;;  %v4506_v38 = vsel %vm531_vm2, 1.0, %v5591_v36  ;;  %vm1051_vm4 = vcmp.eq.s32.totalorder %v7100_v63, %v5674_v24  ;;  %vm1053_vm5 = vcmp.eq.s32.totalorder %v7103_v0, %v5674_v24 }
 0x199   :  { %v4100_v19 = vadd.f32 %v5339_v3, %v3580_v45  ;;  %v4102_v15 = vadd.f32 %v5341_v14, %v3582_v46  ;;  %v4508_v48 = vsel %vm533_vm3, 1.0, %v5591_v36  ;;  %v915_v49 = vadd.f32 %v4506_v38, %v4378_v47 }
 0x19a   :  { %v917_v16 = vadd.f32 %v4508_v48, %v4380_v37  ;;  %v4634_v50 = vsel %vm1051_vm4, 1.0, %v5591_v36  ;;  %v4636_v10 = vsel %vm1053_vm5, 1.0, %v5591_v36  ;;  %vm1571_vm6 = vcmp.eq.s32.totalorder %v7100_v63, %v5678_v26 }
 0x19b   :  { %v5467_v51 = vpack.c.bf16 %v4102_v15, %v4100_v19  ;;  %v1435_v53 = vadd.f32 %v4634_v50, %v915_v49  ;;  %vm1573_vm7 = vcmp.eq.s32.totalorder %v7103_v0, %v5678_v26  ;;  %v4762_v55 = vsel %vm1571_vm6, 1.0, %v5591_v36 }
 0x19c   :  { %v1437_v56 = vadd.f32 %v4636_v10, %v917_v16  ;;  %v4764_v57 = vsel %vm1573_vm7, 1.0, %v5591_v36  ;;  %vm2091_vm8 = vcmp.eq.s32.totalorder %v7100_v63, %v5682_v28  ;;  %vm2093_vm9 = vcmp.eq.s32.totalorder %v7103_v0, %v5682_v28 }
 0x19d   :  { %5468 = vmatprep.subr.bf16.mxu0 %v5467_v51  ;;  %v1955_v58 = vadd.f32 %v4762_v55, %v1435_v53  ;;  %v4890_v60 = vsel %vm2091_vm8, 1.0, %v5591_v36  ;;  %v4892_v62 = vsel %vm2093_vm9, 1.0, %v5591_v36  ;;  %vm2611_vm10 = vcmp.eq.s32.totalorder %v7100_v63, %v5686_v30 }
 0x19e   :  { %v1957_v2 = vadd.f32 %v4764_v57, %v1437_v56  ;;  %vm2613_vm11 = vcmp.eq.s32.totalorder %v7103_v0, %v5686_v30  ;;  %v5018_v8 = vsel %vm2611_vm10, 1.0, %v5591_v36  ;;  %vm3131_vm12 = vcmp.eq.s32.totalorder %v7100_v63, %v5690_v32 }
 0x19f   :  { %v2475_v54 = vadd.f32 %v4890_v60, %v1955_v58  ;;  %v5020_v9 = vsel %vm2613_vm11, 1.0, %v5591_v36  ;;  %vm3133_vm13 = vcmp.eq.s32.totalorder %v7103_v0, %v5690_v32  ;;  %v5146_v39 = vsel %vm3131_vm12, 1.0, %v5591_v36 }
 0x1a0   :  { %v2477_v61 = vadd.f32 %v4892_v62, %v1957_v2  ;;  %v5148_v40 = vsel %vm3133_vm13, 1.0, %v5591_v36  ;;  %vm3651_vm14 = vcmp.eq.s32.totalorder %v7100_v63, %v5694_v34  ;;  %vm3653_vm15 = vcmp.eq.s32.totalorder %v7103_v0, %v5694_v34 }
 0x1a1   :  { %v2995_v17 = vadd.f32 %v5018_v8, %v2475_v54  ;;  %v5274_v18 = vsel %vm3651_vm14, 1.0, %v5591_v36  ;;  %v5276_v41 = vsel %vm3653_vm15, 1.0, %v5591_v36  ;;  %vm203_vm0 = vcmp.eq.s32.totalorder %v7106_v13, %v5666_v20 }
 0x1a2   :  { %v2997_v42 = vadd.f32 %v5020_v9, %v2477_v61  ;;  %vm205_vm1 = vcmp.eq.s32.totalorder %v7109_v4, %v5666_v20  ;;  %v4442_v11 = vsel %vm203_vm0, 1.0, %v5591_v36  ;;  %vm595_vm2 = vcmp.eq.s32.totalorder %v7106_v13, %v5670_v22 }
 0x1a3   :  { %v3515_v63 = vadd.f32 %v5146_v39, %v2995_v17  ;;  %v4444_v0 = vsel %vm205_vm1, 1.0, %v5591_v36  ;;  %vm597_vm3 = vcmp.eq.s32.totalorder %v7109_v4, %v5670_v22  ;;  %v4570_v59 = vsel %vm595_vm2, 1.0, %v5591_v36 }
 0x1a4   :  { %v3517_v5 = vadd.f32 %v5148_v40, %v2997_v42  ;;  %v4572_v12 = vsel %vm597_vm3, 1.0, %v5591_v36  ;;  %v979_v43 = vadd.f32 %v4570_v59, %v4442_v11  ;;  %vm1115_vm4 = vcmp.eq.s32.totalorder %v7106_v13, %v5674_v24 }
 0x1a5   :  { %v4035_v44 = vadd.f32 %v5274_v18, %v3515_v63  ;;  %v981_v6 = vadd.f32 %v4572_v12, %v4444_v0  ;;  %vm1117_vm5 = vcmp.eq.s32.totalorder %v7109_v4, %v5674_v24  ;;  %v4698_v7 = vsel %vm1115_vm4, 1.0, %v5591_v36 }
 0x1a6   :  { %v4037_v3 = vadd.f32 %v5276_v41, %v3517_v5  ;;  %v4700_v14 = vsel %vm1117_vm5, 1.0, %v5591_v36  ;;  %v1499_v45 = vadd.f32 %v4698_v7, %v979_v43  ;;  %vm1635_vm6 = vcmp.eq.s32.totalorder %v7106_v13, %v5678_v26 }
 0x1a7   :  { %v1501_v46 = vadd.f32 %v4700_v14, %v981_v6  ;;  %vm1637_vm7 = vcmp.eq.s32.totalorder %v7109_v4, %v5678_v26  ;;  %v4826_v47 = vsel %vm1635_vm6, 1.0, %v5591_v36  ;;  %vm2155_vm8 = vcmp.eq.s32.totalorder %v7106_v13, %v5682_v28 }
 0x1a8   :  { %v5405_v37 = vpack.c.bf16 %v4037_v3, %v4035_v44  ;;  %v4828_v38 = vsel %vm1637_vm7, 1.0, %v5591_v36  ;;  %v2019_v19 = vadd.f32 %v4826_v47, %v1499_v45  ;;  %vm2157_vm9 = vcmp.eq.s32.totalorder %v7109_v4, %v5682_v28 }
 0x1a9   :  { %v2021_v15 = vadd.f32 %v4828_v38, %v1501_v46  ;;  %v4954_v48 = vsel %vm2155_vm8, 1.0, %v5591_v36  ;;  %v4956_v49 = vsel %vm2157_vm9, 1.0, %v5591_v36  ;;  %vm2675_vm10 = vcmp.eq.s32.totalorder %v7106_v13, %v5686_v30 }
 0x1aa   :  { %5406 = vmatpush1.bf16.msra.mxu1 %v5405_v37  ;;  %v2539_v16 = vadd.f32 %v4954_v48, %v2019_v19  ;;  %vm2677_vm11 = vcmp.eq.s32.totalorder %v7109_v4, %v5686_v30  ;;  %v5082_v50 = vsel %vm2675_vm10, 1.0, %v5591_v36  ;;  %vm3195_vm12 = vcmp.eq.s32.totalorder %v7106_v13, %v5690_v32 }
 0x1ab   :  { %v2541_v10 = vadd.f32 %v4956_v49, %v2021_v15  ;;  %v5084_v51 = vsel %vm2677_vm11, 1.0, %v5591_v36  ;;  %vm3197_vm13 = vcmp.eq.s32.totalorder %v7109_v4, %v5690_v32  ;;  %v5210_v53 = vsel %vm3195_vm12, 1.0, %v5591_v36 }
 0x1ac   :  { %v3059_v55 = vadd.f32 %v5082_v50, %v2539_v16  ;;  %v5212_v56 = vsel %vm3197_vm13, 1.0, %v5591_v36  ;;  %vm3715_vm14 = vcmp.eq.s32.totalorder %v7106_v13, %v5694_v34  ;;  %vm3717_vm15 = vcmp.eq.s32.totalorder %v7109_v4, %v5694_v34 }
 0x1ad   :  { %v3061_v57 = vadd.f32 %v5084_v51, %v2541_v10  ;;  %v5338_v58 = vsel %vm3715_vm14, 1.0, %v5591_v36  ;;  %v5340_v60 = vsel %vm3717_vm15, 1.0, %v5591_v36  ;;  %v7307_v62 = vadd.s32 136, %v5632_v1 }
 0x1ae   :  { %v3579_v2 = vadd.f32 %v5210_v53, %v3059_v55  ;;  %vm144_vm0 = vcmp.eq.s32.totalorder %v7112_v52, %v5668_v21  ;;  %vm536_vm1 = vcmp.eq.s32.totalorder %v7112_v52, %v5672_v23  ;;  %vm1056_vm2 = vcmp.eq.s32.totalorder %v7112_v52, %v5676_v25 }
 0x1af   :  { %v3581_v13 = vadd.f32 %v5212_v56, %v3061_v57  ;;  %vm146_vm3 = vcmp.eq.s32.totalorder %v7307_v62, %v5668_v21  ;;  %v4383_v4 = vsel %vm144_vm0, 1.0, %v5591_v36  ;;  %vm538_vm4 = vcmp.eq.s32.totalorder %v7307_v62, %v5672_v23 }
 0x1b0   :  { %v4099_v8 = vadd.f32 %v5338_v58, %v3579_v2  ;;  %v4385_v54 = vsel %vm146_vm3, 1.0, %v5591_v36  ;;  %v4511_v9 = vsel %vm536_vm1, 1.0, %v5591_v36  ;;  %v4513_v39 = vsel %vm538_vm4, 1.0, %v5591_v36 }
 0x1b1   :  { %v4101_v61 = vadd.f32 %v5340_v60, %v3581_v13  ;;  %v920_v40 = vadd.f32 %v4511_v9, %v4383_v4  ;;  %v922_v17 = vadd.f32 %v4513_v39, %v4385_v54  ;;  %vm1058_vm5 = vcmp.eq.s32.totalorder %v7307_v62, %v5676_v25 }
 0x1b2   :  { %v4639_v18 = vsel %vm1056_vm2, 1.0, %v5591_v36  ;;  %v4641_v41 = vsel %vm1058_vm5, 1.0, %v5591_v36  ;;  %vm1576_vm6 = vcmp.eq.s32.totalorder %v7112_v52, %v5680_v27  ;;  %vm1578_vm7 = vcmp.eq.s32.totalorder %v7307_v62, %v5680_v27 }
 0x1b3   :  { %v5469_v42 = vpack.c.bf16 %v4101_v61, %v4099_v8  ;;  %v1440_v11 = vadd.f32 %v4639_v18, %v920_v40  ;;  %v1442_v63 = vadd.f32 %v4641_v41, %v922_v17  ;;  %v4767_v0 = vsel %vm1576_vm6, 1.0, %v5591_v36 }
 0x1b4   :  { %v4769_v59 = vsel %vm1578_vm7, 1.0, %v5591_v36  ;;  %vm2096_vm8 = vcmp.eq.s32.totalorder %v7112_v52, %v5684_v29  ;;  %vm2098_vm9 = vcmp.eq.s32.totalorder %v7307_v62, %v5684_v29  ;;  %vm2616_vm10 = vcmp.eq.s32.totalorder %v7112_v52, %v5688_v31 }
 0x1b5   :  { %5470 = vmatpush1.bf16.msra.mxu0 %v5469_v42  ;;  %v1960_v5 = vadd.f32 %v4767_v0, %v1440_v11  ;;  %v1962_v12 = vadd.f32 %v4769_v59, %v1442_v63  ;;  %v4895_v43 = vsel %vm2096_vm8, 1.0, %v5591_v36  ;;  %v4897_v44 = vsel %vm2098_vm9, 1.0, %v5591_v36 }
 0x1b6   :  { %vm2618_vm11 = vcmp.eq.s32.totalorder %v7307_v62, %v5688_v31  ;;  %v5023_v6 = vsel %vm2616_vm10, 1.0, %v5591_v36  ;;  %vm3136_vm12 = vcmp.eq.s32.totalorder %v7112_v52, %v5692_v33  ;;  %vm3138_vm13 = vcmp.eq.s32.totalorder %v7307_v62, %v5692_v33 }
 0x1b7   :  { %v2480_v7 = vadd.f32 %v4895_v43, %v1960_v5  ;;  %v2482_v3 = vadd.f32 %v4897_v44, %v1962_v12  ;;  %v5025_v14 = vsel %vm2618_vm11, 1.0, %v5591_v36  ;;  %v5151_v45 = vsel %vm3136_vm12, 1.0, %v5591_v36 }
 0x1b8   :  { %v5153_v46 = vsel %vm3138_vm13, 1.0, %v5591_v36  ;;  %vm3656_vm14 = vcmp.eq.s32.totalorder %v7112_v52, %v5696_v35  ;;  %vm3658_vm15 = vcmp.eq.s32.totalorder %v7307_v62, %v5696_v35  ;;  %v7356_v47 = vadd.s32 384, %v5632_v1 }
 0x1b9   :  { %v3000_v37 = vadd.f32 %v5023_v6, %v2480_v7  ;;  %v3002_v38 = vadd.f32 %v5025_v14, %v2482_v3  ;;  %v5279_v19 = vsel %vm3656_vm14, 1.0, %v5591_v36  ;;  %v5281_v15 = vsel %vm3658_vm15, 1.0, %v5591_v36 }
 0x1ba   :  { %v7361_v48 = vadd.s32 392, %v5632_v1  ;;  %vm208_vm0 = vcmp.eq.s32.totalorder %v7356_v47, %v5668_v21  ;;  %vm600_vm1 = vcmp.eq.s32.totalorder %v7356_v47, %v5672_v23  ;;  %vm1120_vm2 = vcmp.eq.s32.totalorder %v7356_v47, %v5676_v25 }
 0x1bb   :  { %v3520_v49 = vadd.f32 %v5151_v45, %v3000_v37  ;;  %v3522_v16 = vadd.f32 %v5153_v46, %v3002_v38  ;;  %v4447_v50 = vsel %vm208_vm0, 1.0, %v5591_v36  ;;  %v4575_v10 = vsel %vm600_vm1, 1.0, %v5591_v36 }
 0x1bc   :  { %vm210_vm3 = vcmp.eq.s32.totalorder %v7361_v48, %v5668_v21  ;;  %vm602_vm4 = vcmp.eq.s32.totalorder %v7361_v48, %v5672_v23  ;;  %v984_v51 = vadd.f32 %v4575_v10, %v4447_v50  ;;  %vm1122_vm5 = vcmp.eq.s32.totalorder %v7361_v48, %v5676_v25 }
 0x1bd   :  { %v4040_v53 = vadd.f32 %v5279_v19, %v3520_v49  ;;  %v4042_v55 = vadd.f32 %v5281_v15, %v3522_v16  ;;  %v4449_v56 = vsel %vm210_vm3, 1.0, %v5591_v36  ;;  %v4577_v57 = vsel %vm602_vm4, 1.0, %v5591_v36 }
 0x1be   :  { %v986_v58 = vadd.f32 %v4577_v57, %v4449_v56  ;;  %v4703_v60 = vsel %vm1120_vm2, 1.0, %v5591_v36  ;;  %v4705_v2 = vsel %vm1122_vm5, 1.0, %v5591_v36  ;;  %vm1640_vm6 = vcmp.eq.s32.totalorder %v7356_v47, %v5680_v27 }
 0x1bf   :  { %v5407_v13 = vpack.c.bf16 %v4042_v55, %v4040_v53  ;;  %v1504_v4 = vadd.f32 %v4703_v60, %v984_v51  ;;  %vm1642_vm7 = vcmp.eq.s32.totalorder %v7361_v48, %v5680_v27  ;;  %v4831_v8 = vsel %vm1640_vm6, 1.0, %v5591_v36 }
 0x1c0   :  { %v1506_v54 = vadd.f32 %v4705_v2, %v986_v58  ;;  %v4833_v9 = vsel %vm1642_vm7, 1.0, %v5591_v36  ;;  %vm2160_vm8 = vcmp.eq.s32.totalorder %v7356_v47, %v5684_v29  ;;  %vm2162_vm9 = vcmp.eq.s32.totalorder %v7361_v48, %v5684_v29 }
 0x1c1   :  { %5408 = vmatprep.subr.bf16.mxu1 %v5407_v13  ;;  %v2024_v39 = vadd.f32 %v4831_v8, %v1504_v4  ;;  %v4959_v61 = vsel %vm2160_vm8, 1.0, %v5591_v36  ;;  %v4961_v40 = vsel %vm2162_vm9, 1.0, %v5591_v36  ;;  %vm2680_vm10 = vcmp.eq.s32.totalorder %v7356_v47, %v5688_v31 }
 0x1c2   :  { %v2026_v17 = vadd.f32 %v4833_v9, %v1506_v54  ;;  %vm2682_vm11 = vcmp.eq.s32.totalorder %v7361_v48, %v5688_v31  ;;  %v5087_v18 = vsel %vm2680_vm10, 1.0, %v5591_v36  ;;  %vm3200_vm12 = vcmp.eq.s32.totalorder %v7356_v47, %v5692_v33 }
 0x1c3   :  { %v2544_v41 = vadd.f32 %v4959_v61, %v2024_v39  ;;  %v5089_v42 = vsel %vm2682_vm11, 1.0, %v5591_v36  ;;  %vm3202_vm13 = vcmp.eq.s32.totalorder %v7361_v48, %v5692_v33  ;;  %v5215_v11 = vsel %vm3200_vm12, 1.0, %v5591_v36 }
 0x1c4   :  { %v2546_v63 = vadd.f32 %v4961_v40, %v2026_v17  ;;  %v5217_v0 = vsel %vm3202_vm13, 1.0, %v5591_v36  ;;  %vm3720_vm14 = vcmp.eq.s32.totalorder %v7356_v47, %v5696_v35  ;;  %vm3722_vm15 = vcmp.eq.s32.totalorder %v7361_v48, %v5696_v35 }
 0x1c5   :  { %v3064_v59 = vadd.f32 %v5087_v18, %v2544_v41  ;;  %v5343_v5 = vsel %vm3720_vm14, 1.0, %v5591_v36  ;;  %v5345_v12 = vsel %vm3722_vm15, 1.0, %v5591_v36  ;;  %vm143_vm0 = vcmp.eq.s32.totalorder %v7112_v52, %v5666_v20 }
 0x1c6   :  { %v3066_v43 = vadd.f32 %v5089_v42, %v2546_v63  ;;  %vm145_vm1 = vcmp.eq.s32.totalorder %v7307_v62, %v5666_v20  ;;  %v4382_v44 = vsel %vm143_vm0, 1.0, %v5591_v36  ;;  %vm535_vm2 = vcmp.eq.s32.totalorder %v7112_v52, %v5670_v22 }
 0x1c7   :  { %v3584_v6 = vadd.f32 %v5215_v11, %v3064_v59  ;;  %v4384_v7 = vsel %vm145_vm1, 1.0, %v5591_v36  ;;  %vm537_vm3 = vcmp.eq.s32.totalorder %v7307_v62, %v5670_v22  ;;  %v4510_v3 = vsel %vm535_vm2, 1.0, %v5591_v36 }
 0x1c8   :  { %v3586_v14 = vadd.f32 %v5217_v0, %v3066_v43  ;;  %v4512_v45 = vsel %vm537_vm3, 1.0, %v5591_v36  ;;  %v919_v46 = vadd.f32 %v4510_v3, %v4382_v44  ;;  %vm1055_vm4 = vcmp.eq.s32.totalorder %v7112_v52, %v5674_v24 }
 0x1c9   :  { %v4104_v37 = vadd.f32 %v5343_v5, %v3584_v6  ;;  %v921_v38 = vadd.f32 %v4512_v45, %v4384_v7  ;;  %vm1057_vm5 = vcmp.eq.s32.totalorder %v7307_v62, %v5674_v24  ;;  %v4638_v19 = vsel %vm1055_vm4, 1.0, %v5591_v36 }
 0x1ca   :  { %v4106_v15 = vadd.f32 %v5345_v12, %v3586_v14  ;;  %v4640_v49 = vsel %vm1057_vm5, 1.0, %v5591_v36  ;;  %v1439_v16 = vadd.f32 %v4638_v19, %v919_v46  ;;  %vm1575_vm6 = vcmp.eq.s32.totalorder %v7112_v52, %v5678_v26 }
 0x1cb   :  { %v1441_v50 = vadd.f32 %v4640_v49, %v921_v38  ;;  %vm1577_vm7 = vcmp.eq.s32.totalorder %v7307_v62, %v5678_v26  ;;  %v4766_v10 = vsel %vm1575_vm6, 1.0, %v5591_v36  ;;  %vm2095_vm8 = vcmp.eq.s32.totalorder %v7112_v52, %v5682_v28 }
 0x1cc   :  { %v5471_v51 = vpack.c.bf16 %v4106_v15, %v4104_v37  ;;  %v4768_v53 = vsel %vm1577_vm7, 1.0, %v5591_v36  ;;  %v1959_v55 = vadd.f32 %v4766_v10, %v1439_v16  ;;  %vm2097_vm9 = vcmp.eq.s32.totalorder %v7307_v62, %v5682_v28 }
 0x1cd   :  { %v1961_v56 = vadd.f32 %v4768_v53, %v1441_v50  ;;  %v4894_v57 = vsel %vm2095_vm8, 1.0, %v5591_v36  ;;  %v4896_v58 = vsel %vm2097_vm9, 1.0, %v5591_v36  ;;  %vm2615_vm10 = vcmp.eq.s32.totalorder %v7112_v52, %v5686_v30 }
 0x1ce   :  { %5472 = vmatprep.subr.bf16.mxu0 %v5471_v51  ;;  %v2479_v60 = vadd.f32 %v4894_v57, %v1959_v55  ;;  %vm2617_vm11 = vcmp.eq.s32.totalorder %v7307_v62, %v5686_v30  ;;  %v5022_v2 = vsel %vm2615_vm10, 1.0, %v5591_v36  ;;  %vm3135_vm12 = vcmp.eq.s32.totalorder %v7112_v52, %v5690_v32 }
 0x1cf   :  { %v2481_v13 = vadd.f32 %v4896_v58, %v1961_v56  ;;  %v5024_v4 = vsel %vm2617_vm11, 1.0, %v5591_v36  ;;  %vm3137_vm13 = vcmp.eq.s32.totalorder %v7307_v62, %v5690_v32  ;;  %v5150_v8 = vsel %vm3135_vm12, 1.0, %v5591_v36 }
 0x1d0   :  { %v2999_v54 = vadd.f32 %v5022_v2, %v2479_v60  ;;  %v5152_v9 = vsel %vm3137_vm13, 1.0, %v5591_v36  ;;  %vm3655_vm14 = vcmp.eq.s32.totalorder %v7112_v52, %v5694_v34  ;;  %vm3657_vm15 = vcmp.eq.s32.totalorder %v7307_v62, %v5694_v34 }
 0x1d1   :  { %v3001_v39 = vadd.f32 %v5024_v4, %v2481_v13  ;;  %v5278_v61 = vsel %vm3655_vm14, 1.0, %v5591_v36  ;;  %v5280_v40 = vsel %vm3657_vm15, 1.0, %v5591_v36  ;;  %vm207_vm0 = vcmp.eq.s32.totalorder %v7356_v47, %v5666_v20 }
 0x1d2   :  { %v3519_v17 = vadd.f32 %v5150_v8, %v2999_v54  ;;  %vm209_vm1 = vcmp.eq.s32.totalorder %v7361_v48, %v5666_v20  ;;  %v4446_v18 = vsel %vm207_vm0, 1.0, %v5591_v36  ;;  %vm599_vm2 = vcmp.eq.s32.totalorder %v7356_v47, %v5670_v22 }
 0x1d3   :  { %v3521_v52 = vadd.f32 %v5152_v9, %v3001_v39  ;;  %v4448_v62 = vsel %vm209_vm1, 1.0, %v5591_v36  ;;  %vm601_vm3 = vcmp.eq.s32.totalorder %v7361_v48, %v5670_v22  ;;  %v4574_v41 = vsel %vm599_vm2, 1.0, %v5591_v36 }
 0x1d4   :  { %v4039_v42 = vadd.f32 %v5278_v61, %v3519_v17  ;;  %v4576_v11 = vsel %vm601_vm3, 1.0, %v5591_v36  ;;  %v983_v63 = vadd.f32 %v4574_v41, %v4446_v18  ;;  %vm1119_vm4 = vcmp.eq.s32.totalorder %v7356_v47, %v5674_v24 }
 0x1d5   :  { %v4041_v0 = vadd.f32 %v5280_v40, %v3521_v52  ;;  %v985_v59 = vadd.f32 %v4576_v11, %v4448_v62  ;;  %vm1121_vm5 = vcmp.eq.s32.totalorder %v7361_v48, %v5674_v24  ;;  %v4702_v5 = vsel %vm1119_vm4, 1.0, %v5591_v36 }
 0x1d6   :  { %v4704_v12 = vsel %vm1121_vm5, 1.0, %v5591_v36  ;;  %v1503_v43 = vadd.f32 %v4702_v5, %v983_v63  ;;  %vm1639_vm6 = vcmp.eq.s32.totalorder %v7356_v47, %v5678_v26  ;;  %vm1641_vm7 = vcmp.eq.s32.totalorder %v7361_v48, %v5678_v26 }
 0x1d7   :  { %v5409_v44 = vpack.c.bf16 %v4041_v0, %v4039_v42  ;;  %v1505_v6 = vadd.f32 %v4704_v12, %v985_v59  ;;  %v4830_v7 = vsel %vm1639_vm6, 1.0, %v5591_v36  ;;  %v4832_v3 = vsel %vm1641_vm7, 1.0, %v5591_v36 }
 0x1d8   :  { %v2023_v14 = vadd.f32 %v4830_v7, %v1503_v43  ;;  %vm2159_vm8 = vcmp.eq.s32.totalorder %v7356_v47, %v5682_v28  ;;  %vm2161_vm9 = vcmp.eq.s32.totalorder %v7361_v48, %v5682_v28  ;;  %vm2679_vm10 = vcmp.eq.s32.totalorder %v7356_v47, %v5686_v30 }
 0x1d9   :  { %5410 = vmatpush1.bf16.msra.mxu1 %v5409_v44  ;;  %v2025_v45 = vadd.f32 %v4832_v3, %v1505_v6  ;;  %v4958_v46 = vsel %vm2159_vm8, 1.0, %v5591_v36  ;;  %v4960_v37 = vsel %vm2161_vm9, 1.0, %v5591_v36  ;;  %vm2681_vm11 = vcmp.eq.s32.totalorder %v7361_v48, %v5686_v30 }
 0x1da   :  { %v2543_v38 = vadd.f32 %v4958_v46, %v2023_v14  ;;  %v5086_v19 = vsel %vm2679_vm10, 1.0, %v5591_v36  ;;  %v5088_v15 = vsel %vm2681_vm11, 1.0, %v5591_v36  ;;  %vm3199_vm12 = vcmp.eq.s32.totalorder %v7356_v47, %v5690_v32 }
 0x1db   :  { %v2545_v49 = vadd.f32 %v4960_v37, %v2025_v45  ;;  %vm3201_vm13 = vcmp.eq.s32.totalorder %v7361_v48, %v5690_v32  ;;  %v5214_v16 = vsel %vm3199_vm12, 1.0, %v5591_v36  ;;  %vm3719_vm14 = vcmp.eq.s32.totalorder %v7356_v47, %v5694_v34 }
 0x1dc   :  { %v3063_v50 = vadd.f32 %v5086_v19, %v2543_v38  ;;  %v5216_v10 = vsel %vm3201_vm13, 1.0, %v5591_v36  ;;  %vm3721_vm15 = vcmp.eq.s32.totalorder %v7361_v48, %v5694_v34  ;;  %v5342_v51 = vsel %vm3719_vm14, 1.0, %v5591_v36 }
 0x1dd   :  { %v3065_v53 = vadd.f32 %v5088_v15, %v2545_v49  ;;  %v5344_v55 = vsel %vm3721_vm15, 1.0, %v5591_v36  ;;  %v7508_v56 = vadd.s32 144, %v5632_v1  ;;  %v7511_v57 = vadd.s32 152, %v5632_v1 }
 0x1de   :  { %v3583_v58 = vadd.f32 %v5214_v16, %v3063_v50  ;;  %v7514_v47 = vadd.s32 400, %v5632_v1  ;;  %v7517_v60 = vadd.s32 408, %v5632_v1  ;;  %v7520_v48 = vadd.s32 160, %v5632_v1 }
 0x1df   :  { %v3585_v2 = vadd.f32 %v5216_v10, %v3065_v53  ;;  %vm148_vm0 = vcmp.eq.s32.totalorder %v7508_v56, %v5668_v21  ;;  %vm150_vm1 = vcmp.eq.s32.totalorder %v7511_v57, %v5668_v21  ;;  %vm540_vm2 = vcmp.eq.s32.totalorder %v7508_v56, %v5672_v23 }
 0x1e0   :  { %v4103_v13 = vadd.f32 %v5342_v51, %v3583_v58  ;;  %v4387_v4 = vsel %vm148_vm0, 1.0, %v5591_v36  ;;  %v4389_v8 = vsel %vm150_vm1, 1.0, %v5591_v36  ;;  %vm542_vm3 = vcmp.eq.s32.totalorder %v7511_v57, %v5672_v23 }
 0x1e1   :  { %v4105_v54 = vadd.f32 %v5344_v55, %v3585_v2  ;;  %v4515_v9 = vsel %vm540_vm2, 1.0, %v5591_v36  ;;  %v4517_v39 = vsel %vm542_vm3, 1.0, %v5591_v36  ;;  %vm1060_vm4 = vcmp.eq.s32.totalorder %v7508_v56, %v5676_v25 }
 0x1e2   :  { %v924_v61 = vadd.f32 %v4515_v9, %v4387_v4  ;;  %v926_v40 = vadd.f32 %v4517_v39, %v4389_v8  ;;  %vm1062_vm5 = vcmp.eq.s32.totalorder %v7511_v57, %v5676_v25  ;;  %v4643_v17 = vsel %vm1060_vm4, 1.0, %v5591_v36 }
 0x1e3   :  { %v5473_v18 = vpack.c.bf16 %v4105_v54, %v4103_v13  ;;  %v4645_v52 = vsel %vm1062_vm5, 1.0, %v5591_v36  ;;  %vm1580_vm6 = vcmp.eq.s32.totalorder %v7508_v56, %v5680_v27  ;;  %vm1582_vm7 = vcmp.eq.s32.totalorder %v7511_v57, %v5680_v27 }
 0x1e4   :  { %v1444_v62 = vadd.f32 %v4643_v17, %v924_v61  ;;  %v1446_v41 = vadd.f32 %v4645_v52, %v926_v40  ;;  %v4771_v42 = vsel %vm1580_vm6, 1.0, %v5591_v36  ;;  %v4773_v11 = vsel %vm1582_vm7, 1.0, %v5591_v36 }
 0x1e5   :  { %5474 = vmatpush1.bf16.msra.mxu0 %v5473_v18  ;;  %vm2100_vm8 = vcmp.eq.s32.totalorder %v7508_v56, %v5684_v29  ;;  %vm2102_vm9 = vcmp.eq.s32.totalorder %v7511_v57, %v5684_v29  ;;  %vm2620_vm10 = vcmp.eq.s32.totalorder %v7508_v56, %v5688_v31  ;;  %vm2622_vm11 = vcmp.eq.s32.totalorder %v7511_v57, %v5688_v31 }
 0x1e6   :  { %v1964_v63 = vadd.f32 %v4771_v42, %v1444_v62  ;;  %v1966_v0 = vadd.f32 %v4773_v11, %v1446_v41  ;;  %v4899_v59 = vsel %vm2100_vm8, 1.0, %v5591_v36  ;;  %v4901_v5 = vsel %vm2102_vm9, 1.0, %v5591_v36 }
 0x1e7   :  { %v5027_v12 = vsel %vm2620_vm10, 1.0, %v5591_v36  ;;  %v5029_v43 = vsel %vm2622_vm11, 1.0, %v5591_v36  ;;  %vm3140_vm12 = vcmp.eq.s32.totalorder %v7508_v56, %v5692_v33  ;;  %vm3142_vm13 = vcmp.eq.s32.totalorder %v7511_v57, %v5692_v33 }
 0x1e8   :  { %v2484_v44 = vadd.f32 %v4899_v59, %v1964_v63  ;;  %v2486_v6 = vadd.f32 %v4901_v5, %v1966_v0  ;;  %v5155_v7 = vsel %vm3140_vm12, 1.0, %v5591_v36  ;;  %v5157_v3 = vsel %vm3142_vm13, 1.0, %v5591_v36 }
 0x1e9   :  { %vm3660_vm14 = vcmp.eq.s32.totalorder %v7508_v56, %v5696_v35  ;;  %vm3662_vm15 = vcmp.eq.s32.totalorder %v7511_v57, %v5696_v35  ;;  %vm212_vm0 = vcmp.eq.s32.totalorder %v7514_v47, %v5668_v21  ;;  %vm214_vm1 = vcmp.eq.s32.totalorder %v7517_v60, %v5668_v21 }
 0x1ea   :  { %v3004_v14 = vadd.f32 %v5027_v12, %v2484_v44  ;;  %v3006_v45 = vadd.f32 %v5029_v43, %v2486_v6  ;;  %v5283_v46 = vsel %vm3660_vm14, 1.0, %v5591_v36  ;;  %v5285_v37 = vsel %vm3662_vm15, 1.0, %v5591_v36 }
 0x1eb   :  { %v4451_v38 = vsel %vm212_vm0, 1.0, %v5591_v36  ;;  %v4453_v19 = vsel %vm214_vm1, 1.0, %v5591_v36  ;;  %vm604_vm2 = vcmp.eq.s32.totalorder %v7514_v47, %v5672_v23  ;;  %vm606_vm3 = vcmp.eq.s32.totalorder %v7517_v60, %v5672_v23 }
 0x1ec   :  { %v3524_v15 = vadd.f32 %v5155_v7, %v3004_v14  ;;  %v3526_v49 = vadd.f32 %v5157_v3, %v3006_v45  ;;  %v4579_v16 = vsel %vm604_vm2, 1.0, %v5591_v36  ;;  %v4581_v50 = vsel %vm606_vm3, 1.0, %v5591_v36 }
 0x1ed   :  { %v988_v10 = vadd.f32 %v4579_v16, %v4451_v38  ;;  %v990_v51 = vadd.f32 %v4581_v50, %v4453_v19  ;;  %vm1124_vm4 = vcmp.eq.s32.totalorder %v7514_v47, %v5676_v25  ;;  %vm1126_vm5 = vcmp.eq.s32.totalorder %v7517_v60, %v5676_v25 }
 0x1ee   :  { %v4044_v53 = vadd.f32 %v5283_v46, %v3524_v15  ;;  %v4046_v55 = vadd.f32 %v5285_v37, %v3526_v49  ;;  %v4707_v58 = vsel %vm1124_vm4, 1.0, %v5591_v36  ;;  %v4709_v2 = vsel %vm1126_vm5, 1.0, %v5591_v36 }
 0x1ef   :  { %v1508_v13 = vadd.f32 %v4707_v58, %v988_v10  ;;  %v1510_v4 = vadd.f32 %v4709_v2, %v990_v51  ;;  %vm1644_vm6 = vcmp.eq.s32.totalorder %v7514_v47, %v5680_v27  ;;  %vm1646_vm7 = vcmp.eq.s32.totalorder %v7517_v60, %v5680_v27 }
 0x1f0   :  { %v5411_v8 = vpack.c.bf16 %v4046_v55, %v4044_v53  ;;  %v4835_v54 = vsel %vm1644_vm6, 1.0, %v5591_v36  ;;  %v4837_v9 = vsel %vm1646_vm7, 1.0, %v5591_v36  ;;  %vm2164_vm8 = vcmp.eq.s32.totalorder %v7514_v47, %v5684_v29 }
 0x1f1   :  { %v2028_v39 = vadd.f32 %v4835_v54, %v1508_v13  ;;  %v2030_v61 = vadd.f32 %v4837_v9, %v1510_v4  ;;  %vm2166_vm9 = vcmp.eq.s32.totalorder %v7517_v60, %v5684_v29  ;;  %v4963_v40 = vsel %vm2164_vm8, 1.0, %v5591_v36 }
 0x1f2   :  { %5412 = vmatprep.subr.bf16.mxu1 %v5411_v8  ;;  %v4965_v17 = vsel %vm2166_vm9, 1.0, %v5591_v36  ;;  %vm2684_vm10 = vcmp.eq.s32.totalorder %v7514_v47, %v5688_v31  ;;  %vm2686_vm11 = vcmp.eq.s32.totalorder %v7517_v60, %v5688_v31  ;;  %vm3204_vm12 = vcmp.eq.s32.totalorder %v7514_v47, %v5692_v33 }
 0x1f3   :  { %v2548_v18 = vadd.f32 %v4963_v40, %v2028_v39  ;;  %v2550_v52 = vadd.f32 %v4965_v17, %v2030_v61  ;;  %v5091_v62 = vsel %vm2684_vm10, 1.0, %v5591_v36  ;;  %v5093_v41 = vsel %vm2686_vm11, 1.0, %v5591_v36 }
 0x1f4   :  { %vm3206_vm13 = vcmp.eq.s32.totalorder %v7517_v60, %v5692_v33  ;;  %v5219_v42 = vsel %vm3204_vm12, 1.0, %v5591_v36  ;;  %vm3724_vm14 = vcmp.eq.s32.totalorder %v7514_v47, %v5696_v35  ;;  %vm3726_vm15 = vcmp.eq.s32.totalorder %v7517_v60, %v5696_v35 }
 0x1f5   :  { %v3068_v11 = vadd.f32 %v5091_v62, %v2548_v18  ;;  %v3070_v63 = vadd.f32 %v5093_v41, %v2550_v52  ;;  %v5221_v0 = vsel %vm3206_vm13, 1.0, %v5591_v36  ;;  %v5347_v59 = vsel %vm3724_vm14, 1.0, %v5591_v36 }
 0x1f6   :  { %v5349_v5 = vsel %vm3726_vm15, 1.0, %v5591_v36  ;;  %vm147_vm0 = vcmp.eq.s32.totalorder %v7508_v56, %v5666_v20  ;;  %vm149_vm1 = vcmp.eq.s32.totalorder %v7511_v57, %v5666_v20  ;;  %vm539_vm2 = vcmp.eq.s32.totalorder %v7508_v56, %v5670_v22 }
 0x1f7   :  { %v3588_v12 = vadd.f32 %v5219_v42, %v3068_v11  ;;  %v3590_v43 = vadd.f32 %v5221_v0, %v3070_v63  ;;  %v4386_v44 = vsel %vm147_vm0, 1.0, %v5591_v36  ;;  %v4388_v6 = vsel %vm149_vm1, 1.0, %v5591_v36 }
 0x1f8   :  { %vm541_vm3 = vcmp.eq.s32.totalorder %v7511_v57, %v5670_v22  ;;  %v4514_v7 = vsel %vm539_vm2, 1.0, %v5591_v36  ;;  %vm1059_vm4 = vcmp.eq.s32.totalorder %v7508_v56, %v5674_v24  ;;  %vm1061_vm5 = vcmp.eq.s32.totalorder %v7511_v57, %v5674_v24 }
 0x1f9   :  { %v4108_v3 = vadd.f32 %v5347_v59, %v3588_v12  ;;  %v4110_v14 = vadd.f32 %v5349_v5, %v3590_v43  ;;  %v4516_v45 = vsel %vm541_vm3, 1.0, %v5591_v36  ;;  %v923_v46 = vadd.f32 %v4514_v7, %v4386_v44 }
 0x1fa   :  { %v925_v37 = vadd.f32 %v4516_v45, %v4388_v6  ;;  %v4642_v38 = vsel %vm1059_vm4, 1.0, %v5591_v36  ;;  %v4644_v19 = vsel %vm1061_vm5, 1.0, %v5591_v36  ;;  %vm1579_vm6 = vcmp.eq.s32.totalorder %v7508_v56, %v5678_v26 }
 0x1fb   :  { %v5475_v15 = vpack.c.bf16 %v4110_v14, %v4108_v3  ;;  %v1443_v49 = vadd.f32 %v4642_v38, %v923_v46  ;;  %vm1581_vm7 = vcmp.eq.s32.totalorder %v7511_v57, %v5678_v26  ;;  %v4770_v16 = vsel %vm1579_vm6, 1.0, %v5591_v36 }
 0x1fc   :  { %v1445_v50 = vadd.f32 %v4644_v19, %v925_v37  ;;  %v4772_v10 = vsel %vm1581_vm7, 1.0, %v5591_v36  ;;  %vm2099_vm8 = vcmp.eq.s32.totalorder %v7508_v56, %v5682_v28  ;;  %vm2101_vm9 = vcmp.eq.s32.totalorder %v7511_v57, %v5682_v28 }
 0x1fd   :  { %5476 = vmatprep.subr.bf16.mxu0 %v5475_v15  ;;  %v1963_v51 = vadd.f32 %v4770_v16, %v1443_v49  ;;  %v4898_v53 = vsel %vm2099_vm8, 1.0, %v5591_v36  ;;  %v4900_v55 = vsel %vm2101_vm9, 1.0, %v5591_v36  ;;  %vm2619_vm10 = vcmp.eq.s32.totalorder %v7508_v56, %v5686_v30 }
 0x1fe   :  { %v1965_v58 = vadd.f32 %v4772_v10, %v1445_v50  ;;  %vm2621_vm11 = vcmp.eq.s32.totalorder %v7511_v57, %v5686_v30  ;;  %v5026_v2 = vsel %vm2619_vm10, 1.0, %v5591_v36  ;;  %vm3139_vm12 = vcmp.eq.s32.totalorder %v7508_v56, %v5690_v32 }
 0x1ff   :  { %v2483_v13 = vadd.f32 %v4898_v53, %v1963_v51  ;;  %v5028_v4 = vsel %vm2621_vm11, 1.0, %v5591_v36  ;;  %vm3141_vm13 = vcmp.eq.s32.totalorder %v7511_v57, %v5690_v32  ;;  %v5154_v8 = vsel %vm3139_vm12, 1.0, %v5591_v36 }
 0x200   :  { %v2485_v54 = vadd.f32 %v4900_v55, %v1965_v58  ;;  %v5156_v9 = vsel %vm3141_vm13, 1.0, %v5591_v36  ;;  %vm3659_vm14 = vcmp.eq.s32.totalorder %v7508_v56, %v5694_v34  ;;  %vm3661_vm15 = vcmp.eq.s32.totalorder %v7511_v57, %v5694_v34 }
 0x201   :  { %v3003_v39 = vadd.f32 %v5026_v2, %v2483_v13  ;;  %v5282_v61 = vsel %vm3659_vm14, 1.0, %v5591_v36  ;;  %v5284_v40 = vsel %vm3661_vm15, 1.0, %v5591_v36  ;;  %vm211_vm0 = vcmp.eq.s32.totalorder %v7514_v47, %v5666_v20 }
 0x202   :  { %v3005_v17 = vadd.f32 %v5028_v4, %v2485_v54  ;;  %vm213_vm1 = vcmp.eq.s32.totalorder %v7517_v60, %v5666_v20  ;;  %v4450_v18 = vsel %vm211_vm0, 1.0, %v5591_v36  ;;  %vm603_vm2 = vcmp.eq.s32.totalorder %v7514_v47, %v5670_v22 }
 0x203   :  { %v3523_v56 = vadd.f32 %v5154_v8, %v3003_v39  ;;  %v4452_v57 = vsel %vm213_vm1, 1.0, %v5591_v36  ;;  %vm605_vm3 = vcmp.eq.s32.totalorder %v7517_v60, %v5670_v22  ;;  %v4578_v52 = vsel %vm603_vm2, 1.0, %v5591_v36 }
 0x204   :  { %v3525_v62 = vadd.f32 %v5156_v9, %v3005_v17  ;;  %v4580_v41 = vsel %vm605_vm3, 1.0, %v5591_v36  ;;  %v987_v42 = vadd.f32 %v4578_v52, %v4450_v18  ;;  %vm1123_vm4 = vcmp.eq.s32.totalorder %v7514_v47, %v5674_v24 }
 0x205   :  { %v4043_v11 = vadd.f32 %v5282_v61, %v3523_v56  ;;  %v989_v63 = vadd.f32 %v4580_v41, %v4452_v57  ;;  %vm1125_vm5 = vcmp.eq.s32.totalorder %v7517_v60, %v5674_v24  ;;  %v4706_v0 = vsel %vm1123_vm4, 1.0, %v5591_v36 }
 0x206   :  { %v4045_v59 = vadd.f32 %v5284_v40, %v3525_v62  ;;  %v4708_v5 = vsel %vm1125_vm5, 1.0, %v5591_v36  ;;  %v1507_v12 = vadd.f32 %v4706_v0, %v987_v42  ;;  %vm1643_vm6 = vcmp.eq.s32.totalorder %v7514_v47, %v5678_v26 }
 0x207   :  { %v1509_v43 = vadd.f32 %v4708_v5, %v989_v63  ;;  %vm1645_vm7 = vcmp.eq.s32.totalorder %v7517_v60, %v5678_v26  ;;  %v4834_v44 = vsel %vm1643_vm6, 1.0, %v5591_v36  ;;  %vm2163_vm8 = vcmp.eq.s32.totalorder %v7514_v47, %v5682_v28 }
 0x208   :  { %v5413_v6 = vpack.c.bf16 %v4045_v59, %v4043_v11  ;;  %v4836_v7 = vsel %vm1645_vm7, 1.0, %v5591_v36  ;;  %v2027_v3 = vadd.f32 %v4834_v44, %v1507_v12  ;;  %vm2165_vm9 = vcmp.eq.s32.totalorder %v7517_v60, %v5682_v28 }
 0x209   :  { %v2029_v14 = vadd.f32 %v4836_v7, %v1509_v43  ;;  %v4962_v45 = vsel %vm2163_vm8, 1.0, %v5591_v36  ;;  %v4964_v46 = vsel %vm2165_vm9, 1.0, %v5591_v36  ;;  %vm2683_vm10 = vcmp.eq.s32.totalorder %v7514_v47, %v5686_v30 }
 0x20a   :  { %5414 = vmatpush1.bf16.msra.mxu1 %v5413_v6  ;;  %v2547_v37 = vadd.f32 %v4962_v45, %v2027_v3  ;;  %vm2685_vm11 = vcmp.eq.s32.totalorder %v7517_v60, %v5686_v30  ;;  %v5090_v38 = vsel %vm2683_vm10, 1.0, %v5591_v36  ;;  %vm3203_vm12 = vcmp.eq.s32.totalorder %v7514_v47, %v5690_v32 }
 0x20b   :  { %v2549_v19 = vadd.f32 %v4964_v46, %v2029_v14  ;;  %v5092_v15 = vsel %vm2685_vm11, 1.0, %v5591_v36  ;;  %vm3205_vm13 = vcmp.eq.s32.totalorder %v7517_v60, %v5690_v32  ;;  %v5218_v49 = vsel %vm3203_vm12, 1.0, %v5591_v36 }
 0x20c   :  { %v3067_v16 = vadd.f32 %v5090_v38, %v2547_v37  ;;  %v5220_v50 = vsel %vm3205_vm13, 1.0, %v5591_v36  ;;  %vm3723_vm14 = vcmp.eq.s32.totalorder %v7514_v47, %v5694_v34  ;;  %vm3725_vm15 = vcmp.eq.s32.totalorder %v7517_v60, %v5694_v34 }
 0x20d   :  { %v3069_v10 = vadd.f32 %v5092_v15, %v2549_v19  ;;  %v5346_v51 = vsel %vm3723_vm14, 1.0, %v5591_v36  ;;  %v5348_v53 = vsel %vm3725_vm15, 1.0, %v5591_v36  ;;  %v7715_v55 = vadd.s32 168, %v5632_v1 }
 0x20e   :  { %v3587_v58 = vadd.f32 %v5218_v49, %v3067_v16  ;;  %vm152_vm0 = vcmp.eq.s32.totalorder %v7520_v48, %v5668_v21  ;;  %vm544_vm1 = vcmp.eq.s32.totalorder %v7520_v48, %v5672_v23  ;;  %vm1064_vm2 = vcmp.eq.s32.totalorder %v7520_v48, %v5676_v25 }
 0x20f   :  { %v3589_v47 = vadd.f32 %v5220_v50, %v3069_v10  ;;  %vm154_vm3 = vcmp.eq.s32.totalorder %v7715_v55, %v5668_v21  ;;  %v4391_v60 = vsel %vm152_vm0, 1.0, %v5591_v36  ;;  %vm546_vm4 = vcmp.eq.s32.totalorder %v7715_v55, %v5672_v23 }
 0x210   :  { %v4107_v2 = vadd.f32 %v5346_v51, %v3587_v58  ;;  %v4393_v13 = vsel %vm154_vm3, 1.0, %v5591_v36  ;;  %v4519_v4 = vsel %vm544_vm1, 1.0, %v5591_v36  ;;  %v4521_v8 = vsel %vm546_vm4, 1.0, %v5591_v36 }
 0x211   :  { %v4109_v54 = vadd.f32 %v5348_v53, %v3589_v47  ;;  %v928_v9 = vadd.f32 %v4519_v4, %v4391_v60  ;;  %v930_v39 = vadd.f32 %v4521_v8, %v4393_v13  ;;  %vm1066_vm5 = vcmp.eq.s32.totalorder %v7715_v55, %v5676_v25 }
 0x212   :  { %v4647_v61 = vsel %vm1064_vm2, 1.0, %v5591_v36  ;;  %v4649_v40 = vsel %vm1066_vm5, 1.0, %v5591_v36  ;;  %vm1584_vm6 = vcmp.eq.s32.totalorder %v7520_v48, %v5680_v27  ;;  %vm1586_vm7 = vcmp.eq.s32.totalorder %v7715_v55, %v5680_v27 }
 0x213   :  { %v5477_v17 = vpack.c.bf16 %v4109_v54, %v4107_v2  ;;  %v1448_v18 = vadd.f32 %v4647_v61, %v928_v9  ;;  %v1450_v56 = vadd.f32 %v4649_v40, %v930_v39  ;;  %v4775_v57 = vsel %vm1584_vm6, 1.0, %v5591_v36 }
 0x214   :  { %v4777_v52 = vsel %vm1586_vm7, 1.0, %v5591_v36  ;;  %vm2104_vm8 = vcmp.eq.s32.totalorder %v7520_v48, %v5684_v29  ;;  %vm2106_vm9 = vcmp.eq.s32.totalorder %v7715_v55, %v5684_v29  ;;  %vm2624_vm10 = vcmp.eq.s32.totalorder %v7520_v48, %v5688_v31 }
 0x215   :  { %5478 = vmatpush1.bf16.msra.mxu0 %v5477_v17  ;;  %v1968_v62 = vadd.f32 %v4775_v57, %v1448_v18  ;;  %v1970_v41 = vadd.f32 %v4777_v52, %v1450_v56  ;;  %v4903_v42 = vsel %vm2104_vm8, 1.0, %v5591_v36  ;;  %v4905_v11 = vsel %vm2106_vm9, 1.0, %v5591_v36 }
 0x216   :  { %vm2626_vm11 = vcmp.eq.s32.totalorder %v7715_v55, %v5688_v31  ;;  %v5031_v63 = vsel %vm2624_vm10, 1.0, %v5591_v36  ;;  %vm3144_vm12 = vcmp.eq.s32.totalorder %v7520_v48, %v5692_v33  ;;  %vm3146_vm13 = vcmp.eq.s32.totalorder %v7715_v55, %v5692_v33 }
 0x217   :  { %v2488_v0 = vadd.f32 %v4903_v42, %v1968_v62  ;;  %v2490_v59 = vadd.f32 %v4905_v11, %v1970_v41  ;;  %v5033_v5 = vsel %vm2626_vm11, 1.0, %v5591_v36  ;;  %v5159_v12 = vsel %vm3144_vm12, 1.0, %v5591_v36 }
 0x218   :  { %v5161_v43 = vsel %vm3146_vm13, 1.0, %v5591_v36  ;;  %vm3664_vm14 = vcmp.eq.s32.totalorder %v7520_v48, %v5696_v35  ;;  %vm3666_vm15 = vcmp.eq.s32.totalorder %v7715_v55, %v5696_v35  ;;  %v7764_v44 = vadd.s32 416, %v5632_v1 }
 0x219   :  { %v3008_v6 = vadd.f32 %v5031_v63, %v2488_v0  ;;  %v3010_v7 = vadd.f32 %v5033_v5, %v2490_v59  ;;  %v5287_v3 = vsel %vm3664_vm14, 1.0, %v5591_v36  ;;  %v5289_v14 = vsel %vm3666_vm15, 1.0, %v5591_v36 }
 0x21a   :  { %v7769_v45 = vadd.s32 424, %v5632_v1  ;;  %vm216_vm0 = vcmp.eq.s32.totalorder %v7764_v44, %v5668_v21  ;;  %vm608_vm1 = vcmp.eq.s32.totalorder %v7764_v44, %v5672_v23  ;;  %vm1128_vm2 = vcmp.eq.s32.totalorder %v7764_v44, %v5676_v25 }
 0x21b   :  { %v3528_v46 = vadd.f32 %v5159_v12, %v3008_v6  ;;  %v3530_v37 = vadd.f32 %v5161_v43, %v3010_v7  ;;  %v4455_v38 = vsel %vm216_vm0, 1.0, %v5591_v36  ;;  %v4583_v19 = vsel %vm608_vm1, 1.0, %v5591_v36 }
 0x21c   :  { %vm218_vm3 = vcmp.eq.s32.totalorder %v7769_v45, %v5668_v21  ;;  %vm610_vm4 = vcmp.eq.s32.totalorder %v7769_v45, %v5672_v23  ;;  %v992_v15 = vadd.f32 %v4583_v19, %v4455_v38  ;;  %vm1130_vm5 = vcmp.eq.s32.totalorder %v7769_v45, %v5676_v25 }
 0x21d   :  { %v4048_v49 = vadd.f32 %v5287_v3, %v3528_v46  ;;  %v4050_v16 = vadd.f32 %v5289_v14, %v3530_v37  ;;  %v4457_v50 = vsel %vm218_vm3, 1.0, %v5591_v36  ;;  %v4585_v10 = vsel %vm610_vm4, 1.0, %v5591_v36 }
 0x21e   :  { %v994_v51 = vadd.f32 %v4585_v10, %v4457_v50  ;;  %v4711_v53 = vsel %vm1128_vm2, 1.0, %v5591_v36  ;;  %v4713_v58 = vsel %vm1130_vm5, 1.0, %v5591_v36  ;;  %vm1648_vm6 = vcmp.eq.s32.totalorder %v7764_v44, %v5680_v27 }
 0x21f   :  { %v5415_v47 = vpack.c.bf16 %v4050_v16, %v4048_v49  ;;  %v1512_v60 = vadd.f32 %v4711_v53, %v992_v15  ;;  %vm1650_vm7 = vcmp.eq.s32.totalorder %v7769_v45, %v5680_v27  ;;  %v4839_v2 = vsel %vm1648_vm6, 1.0, %v5591_v36 }
 0x220   :  { %v1514_v13 = vadd.f32 %v4713_v58, %v994_v51  ;;  %v4841_v4 = vsel %vm1650_vm7, 1.0, %v5591_v36  ;;  %vm2168_vm8 = vcmp.eq.s32.totalorder %v7764_v44, %v5684_v29  ;;  %vm2170_vm9 = vcmp.eq.s32.totalorder %v7769_v45, %v5684_v29 }
 0x221   :  { %5416 = vmatprep.subr.bf16.mxu1 %v5415_v47  ;;  %v2032_v8 = vadd.f32 %v4839_v2, %v1512_v60  ;;  %v4967_v54 = vsel %vm2168_vm8, 1.0, %v5591_v36  ;;  %v4969_v9 = vsel %vm2170_vm9, 1.0, %v5591_v36  ;;  %vm2688_vm10 = vcmp.eq.s32.totalorder %v7764_v44, %v5688_v31 }
 0x222   :  { %v2034_v39 = vadd.f32 %v4841_v4, %v1514_v13  ;;  %vm2690_vm11 = vcmp.eq.s32.totalorder %v7769_v45, %v5688_v31  ;;  %v5095_v61 = vsel %vm2688_vm10, 1.0, %v5591_v36  ;;  %vm3208_vm12 = vcmp.eq.s32.totalorder %v7764_v44, %v5692_v33 }
 0x223   :  { %v2552_v40 = vadd.f32 %v4967_v54, %v2032_v8  ;;  %v5097_v17 = vsel %vm2690_vm11, 1.0, %v5591_v36  ;;  %vm3210_vm13 = vcmp.eq.s32.totalorder %v7769_v45, %v5692_v33  ;;  %v5223_v18 = vsel %vm3208_vm12, 1.0, %v5591_v36 }
 0x224   :  { %v2554_v56 = vadd.f32 %v4969_v9, %v2034_v39  ;;  %v5225_v57 = vsel %vm3210_vm13, 1.0, %v5591_v36  ;;  %vm3728_vm14 = vcmp.eq.s32.totalorder %v7764_v44, %v5696_v35  ;;  %vm3730_vm15 = vcmp.eq.s32.totalorder %v7769_v45, %v5696_v35 }
 0x225   :  { %v3072_v52 = vadd.f32 %v5095_v61, %v2552_v40  ;;  %v5351_v62 = vsel %vm3728_vm14, 1.0, %v5591_v36  ;;  %v5353_v41 = vsel %vm3730_vm15, 1.0, %v5591_v36  ;;  %vm151_vm0 = vcmp.eq.s32.totalorder %v7520_v48, %v5666_v20 }
 0x226   :  { %v3074_v42 = vadd.f32 %v5097_v17, %v2554_v56  ;;  %vm153_vm1 = vcmp.eq.s32.totalorder %v7715_v55, %v5666_v20  ;;  %v4390_v11 = vsel %vm151_vm0, 1.0, %v5591_v36  ;;  %vm543_vm2 = vcmp.eq.s32.totalorder %v7520_v48, %v5670_v22 }
 0x227   :  { %v3592_v63 = vadd.f32 %v5223_v18, %v3072_v52  ;;  %v4392_v0 = vsel %vm153_vm1, 1.0, %v5591_v36  ;;  %vm545_vm3 = vcmp.eq.s32.totalorder %v7715_v55, %v5670_v22  ;;  %v4518_v59 = vsel %vm543_vm2, 1.0, %v5591_v36 }
 0x228   :  { %v3594_v5 = vadd.f32 %v5225_v57, %v3074_v42  ;;  %v4520_v12 = vsel %vm545_vm3, 1.0, %v5591_v36  ;;  %v927_v43 = vadd.f32 %v4518_v59, %v4390_v11  ;;  %vm1063_vm4 = vcmp.eq.s32.totalorder %v7520_v48, %v5674_v24 }
 0x229   :  { %v4112_v6 = vadd.f32 %v5351_v62, %v3592_v63  ;;  %v929_v7 = vadd.f32 %v4520_v12, %v4392_v0  ;;  %vm1065_vm5 = vcmp.eq.s32.totalorder %v7715_v55, %v5674_v24  ;;  %v4646_v3 = vsel %vm1063_vm4, 1.0, %v5591_v36 }
 0x22a   :  { %v4114_v14 = vadd.f32 %v5353_v41, %v3594_v5  ;;  %v4648_v46 = vsel %vm1065_vm5, 1.0, %v5591_v36  ;;  %v1447_v37 = vadd.f32 %v4646_v3, %v927_v43  ;;  %vm1583_vm6 = vcmp.eq.s32.totalorder %v7520_v48, %v5678_v26 }
 0x22b   :  { %v1449_v38 = vadd.f32 %v4648_v46, %v929_v7  ;;  %vm1585_vm7 = vcmp.eq.s32.totalorder %v7715_v55, %v5678_v26  ;;  %v4774_v19 = vsel %vm1583_vm6, 1.0, %v5591_v36  ;;  %vm2103_vm8 = vcmp.eq.s32.totalorder %v7520_v48, %v5682_v28 }
 0x22c   :  { %v5479_v15 = vpack.c.bf16 %v4114_v14, %v4112_v6  ;;  %v4776_v49 = vsel %vm1585_vm7, 1.0, %v5591_v36  ;;  %v1967_v16 = vadd.f32 %v4774_v19, %v1447_v37  ;;  %vm2105_vm9 = vcmp.eq.s32.totalorder %v7715_v55, %v5682_v28 }
 0x22d   :  { %v1969_v50 = vadd.f32 %v4776_v49, %v1449_v38  ;;  %v4902_v10 = vsel %vm2103_vm8, 1.0, %v5591_v36  ;;  %v4904_v51 = vsel %vm2105_vm9, 1.0, %v5591_v36  ;;  %vm2623_vm10 = vcmp.eq.s32.totalorder %v7520_v48, %v5686_v30 }
 0x22e   :  { %5480 = vmatprep.subr.bf16.mxu0 %v5479_v15  ;;  %v2487_v53 = vadd.f32 %v4902_v10, %v1967_v16  ;;  %vm2625_vm11 = vcmp.eq.s32.totalorder %v7715_v55, %v5686_v30  ;;  %v5030_v58 = vsel %vm2623_vm10, 1.0, %v5591_v36  ;;  %vm3143_vm12 = vcmp.eq.s32.totalorder %v7520_v48, %v5690_v32 }
 0x22f   :  { %v2489_v47 = vadd.f32 %v4904_v51, %v1969_v50  ;;  %v5032_v60 = vsel %vm2625_vm11, 1.0, %v5591_v36  ;;  %vm3145_vm13 = vcmp.eq.s32.totalorder %v7715_v55, %v5690_v32  ;;  %v5158_v2 = vsel %vm3143_vm12, 1.0, %v5591_v36 }
 0x230   :  { %v3007_v13 = vadd.f32 %v5030_v58, %v2487_v53  ;;  %v5160_v4 = vsel %vm3145_vm13, 1.0, %v5591_v36  ;;  %vm3663_vm14 = vcmp.eq.s32.totalorder %v7520_v48, %v5694_v34  ;;  %vm3665_vm15 = vcmp.eq.s32.totalorder %v7715_v55, %v5694_v34 }
 0x231   :  { %v3009_v8 = vadd.f32 %v5032_v60, %v2489_v47  ;;  %v5286_v54 = vsel %vm3663_vm14, 1.0, %v5591_v36  ;;  %v5288_v9 = vsel %vm3665_vm15, 1.0, %v5591_v36  ;;  %vm215_vm0 = vcmp.eq.s32.totalorder %v7764_v44, %v5666_v20 }
 0x232   :  { %v3527_v39 = vadd.f32 %v5158_v2, %v3007_v13  ;;  %vm217_vm1 = vcmp.eq.s32.totalorder %v7769_v45, %v5666_v20  ;;  %v4454_v61 = vsel %vm215_vm0, 1.0, %v5591_v36  ;;  %vm607_vm2 = vcmp.eq.s32.totalorder %v7764_v44, %v5670_v22 }
 0x233   :  { %v3529_v48 = vadd.f32 %v5160_v4, %v3009_v8  ;;  %v4456_v55 = vsel %vm217_vm1, 1.0, %v5591_v36  ;;  %vm609_vm3 = vcmp.eq.s32.totalorder %v7769_v45, %v5670_v22  ;;  %v4582_v40 = vsel %vm607_vm2, 1.0, %v5591_v36 }
 0x234   :  { %v4047_v17 = vadd.f32 %v5286_v54, %v3527_v39  ;;  %v4584_v18 = vsel %vm609_vm3, 1.0, %v5591_v36  ;;  %v991_v56 = vadd.f32 %v4582_v40, %v4454_v61  ;;  %vm1127_vm4 = vcmp.eq.s32.totalorder %v7764_v44, %v5674_v24 }
 0x235   :  { %v4049_v57 = vadd.f32 %v5288_v9, %v3529_v48  ;;  %v993_v52 = vadd.f32 %v4584_v18, %v4456_v55  ;;  %vm1129_vm5 = vcmp.eq.s32.totalorder %v7769_v45, %v5674_v24  ;;  %v4710_v62 = vsel %vm1127_vm4, 1.0, %v5591_v36 }
 0x236   :  { %v4712_v41 = vsel %vm1129_vm5, 1.0, %v5591_v36  ;;  %v1511_v42 = vadd.f32 %v4710_v62, %v991_v56  ;;  %vm1647_vm6 = vcmp.eq.s32.totalorder %v7764_v44, %v5678_v26  ;;  %vm1649_vm7 = vcmp.eq.s32.totalorder %v7769_v45, %v5678_v26 }
 0x237   :  { %v5417_v11 = vpack.c.bf16 %v4049_v57, %v4047_v17  ;;  %v1513_v63 = vadd.f32 %v4712_v41, %v993_v52  ;;  %v4838_v0 = vsel %vm1647_vm6, 1.0, %v5591_v36  ;;  %v4840_v59 = vsel %vm1649_vm7, 1.0, %v5591_v36 }
 0x238   :  { %v2031_v5 = vadd.f32 %v4838_v0, %v1511_v42  ;;  %vm2167_vm8 = vcmp.eq.s32.totalorder %v7764_v44, %v5682_v28  ;;  %vm2169_vm9 = vcmp.eq.s32.totalorder %v7769_v45, %v5682_v28  ;;  %vm2687_vm10 = vcmp.eq.s32.totalorder %v7764_v44, %v5686_v30 }
 0x239   :  { %5418 = vmatpush1.bf16.msra.mxu1 %v5417_v11  ;;  %v2033_v12 = vadd.f32 %v4840_v59, %v1513_v63  ;;  %v4966_v43 = vsel %vm2167_vm8, 1.0, %v5591_v36  ;;  %v4968_v6 = vsel %vm2169_vm9, 1.0, %v5591_v36  ;;  %vm2689_vm11 = vcmp.eq.s32.totalorder %v7769_v45, %v5686_v30 }
 0x23a   :  { %v2551_v7 = vadd.f32 %v4966_v43, %v2031_v5  ;;  %v5094_v3 = vsel %vm2687_vm10, 1.0, %v5591_v36  ;;  %v5096_v14 = vsel %vm2689_vm11, 1.0, %v5591_v36  ;;  %vm3207_vm12 = vcmp.eq.s32.totalorder %v7764_v44, %v5690_v32 }
 0x23b   :  { %v2553_v46 = vadd.f32 %v4968_v6, %v2033_v12  ;;  %vm3209_vm13 = vcmp.eq.s32.totalorder %v7769_v45, %v5690_v32  ;;  %v5222_v37 = vsel %vm3207_vm12, 1.0, %v5591_v36  ;;  %vm3727_vm14 = vcmp.eq.s32.totalorder %v7764_v44, %v5694_v34 }
 0x23c   :  { %v3071_v38 = vadd.f32 %v5094_v3, %v2551_v7  ;;  %v5224_v19 = vsel %vm3209_vm13, 1.0, %v5591_v36  ;;  %vm3729_vm15 = vcmp.eq.s32.totalorder %v7769_v45, %v5694_v34  ;;  %v5350_v15 = vsel %vm3727_vm14, 1.0, %v5591_v36 }
 0x23d   :  { %v3073_v49 = vadd.f32 %v5096_v14, %v2553_v46  ;;  %v5352_v16 = vsel %vm3729_vm15, 1.0, %v5591_v36  ;;  %v7916_v50 = vadd.s32 176, %v5632_v1  ;;  %v7919_v10 = vadd.s32 184, %v5632_v1 }
 0x23e   :  { %v3591_v51 = vadd.f32 %v5222_v37, %v3071_v38  ;;  %v7922_v44 = vadd.s32 432, %v5632_v1  ;;  %v7925_v53 = vadd.s32 440, %v5632_v1  ;;  %v7928_v45 = vadd.s32 192, %v5632_v1 }
 0x23f   :  { %v3593_v58 = vadd.f32 %v5224_v19, %v3073_v49  ;;  %vm156_vm0 = vcmp.eq.s32.totalorder %v7916_v50, %v5668_v21  ;;  %vm158_vm1 = vcmp.eq.s32.totalorder %v7919_v10, %v5668_v21  ;;  %vm548_vm2 = vcmp.eq.s32.totalorder %v7916_v50, %v5672_v23 }
 0x240   :  { %v4111_v47 = vadd.f32 %v5350_v15, %v3591_v51  ;;  %v4395_v60 = vsel %vm156_vm0, 1.0, %v5591_v36  ;;  %v4397_v2 = vsel %vm158_vm1, 1.0, %v5591_v36  ;;  %vm550_vm3 = vcmp.eq.s32.totalorder %v7919_v10, %v5672_v23 }
 0x241   :  { %v4113_v13 = vadd.f32 %v5352_v16, %v3593_v58  ;;  %v4523_v4 = vsel %vm548_vm2, 1.0, %v5591_v36  ;;  %v4525_v8 = vsel %vm550_vm3, 1.0, %v5591_v36  ;;  %vm1068_vm4 = vcmp.eq.s32.totalorder %v7916_v50, %v5676_v25 }
 0x242   :  { %v932_v54 = vadd.f32 %v4523_v4, %v4395_v60  ;;  %v934_v9 = vadd.f32 %v4525_v8, %v4397_v2  ;;  %vm1070_vm5 = vcmp.eq.s32.totalorder %v7919_v10, %v5676_v25  ;;  %v4651_v39 = vsel %vm1068_vm4, 1.0, %v5591_v36 }
 0x243   :  { %v5481_v61 = vpack.c.bf16 %v4113_v13, %v4111_v47  ;;  %v4653_v48 = vsel %vm1070_vm5, 1.0, %v5591_v36  ;;  %vm1588_vm6 = vcmp.eq.s32.totalorder %v7916_v50, %v5680_v27  ;;  %vm1590_vm7 = vcmp.eq.s32.totalorder %v7919_v10, %v5680_v27 }
 0x244   :  { %v1452_v55 = vadd.f32 %v4651_v39, %v932_v54  ;;  %v1454_v40 = vadd.f32 %v4653_v48, %v934_v9  ;;  %v4779_v17 = vsel %vm1588_vm6, 1.0, %v5591_v36  ;;  %v4781_v18 = vsel %vm1590_vm7, 1.0, %v5591_v36 }
 0x245   :  { %5482 = vmatpush1.bf16.msra.mxu0 %v5481_v61  ;;  %vm2108_vm8 = vcmp.eq.s32.totalorder %v7916_v50, %v5684_v29  ;;  %vm2110_vm9 = vcmp.eq.s32.totalorder %v7919_v10, %v5684_v29  ;;  %vm2628_vm10 = vcmp.eq.s32.totalorder %v7916_v50, %v5688_v31  ;;  %vm2630_vm11 = vcmp.eq.s32.totalorder %v7919_v10, %v5688_v31 }
 0x246   :  { %v1972_v56 = vadd.f32 %v4779_v17, %v1452_v55  ;;  %v1974_v57 = vadd.f32 %v4781_v18, %v1454_v40  ;;  %v4907_v52 = vsel %vm2108_vm8, 1.0, %v5591_v36  ;;  %v4909_v62 = vsel %vm2110_vm9, 1.0, %v5591_v36 }
 0x247   :  { %v5035_v41 = vsel %vm2628_vm10, 1.0, %v5591_v36  ;;  %v5037_v42 = vsel %vm2630_vm11, 1.0, %v5591_v36  ;;  %vm3148_vm12 = vcmp.eq.s32.totalorder %v7916_v50, %v5692_v33  ;;  %vm3150_vm13 = vcmp.eq.s32.totalorder %v7919_v10, %v5692_v33 }
 0x248   :  { %v2492_v11 = vadd.f32 %v4907_v52, %v1972_v56  ;;  %v2494_v63 = vadd.f32 %v4909_v62, %v1974_v57  ;;  %v5163_v0 = vsel %vm3148_vm12, 1.0, %v5591_v36  ;;  %v5165_v59 = vsel %vm3150_vm13, 1.0, %v5591_v36 }
 0x249   :  { %vm3668_vm14 = vcmp.eq.s32.totalorder %v7916_v50, %v5696_v35  ;;  %vm3670_vm15 = vcmp.eq.s32.totalorder %v7919_v10, %v5696_v35  ;;  %vm220_vm0 = vcmp.eq.s32.totalorder %v7922_v44, %v5668_v21  ;;  %vm222_vm1 = vcmp.eq.s32.totalorder %v7925_v53, %v5668_v21 }
 0x24a   :  { %v3012_v5 = vadd.f32 %v5035_v41, %v2492_v11  ;;  %v3014_v12 = vadd.f32 %v5037_v42, %v2494_v63  ;;  %v5291_v43 = vsel %vm3668_vm14, 1.0, %v5591_v36  ;;  %v5293_v6 = vsel %vm3670_vm15, 1.0, %v5591_v36 }
 0x24b   :  { %v4459_v7 = vsel %vm220_vm0, 1.0, %v5591_v36  ;;  %v4461_v3 = vsel %vm222_vm1, 1.0, %v5591_v36  ;;  %vm612_vm2 = vcmp.eq.s32.totalorder %v7922_v44, %v5672_v23  ;;  %vm614_vm3 = vcmp.eq.s32.totalorder %v7925_v53, %v5672_v23 }
 0x24c   :  { %v3532_v14 = vadd.f32 %v5163_v0, %v3012_v5  ;;  %v3534_v46 = vadd.f32 %v5165_v59, %v3014_v12  ;;  %v4587_v37 = vsel %vm612_vm2, 1.0, %v5591_v36  ;;  %v4589_v38 = vsel %vm614_vm3, 1.0, %v5591_v36 }
 0x24d   :  { %v996_v19 = vadd.f32 %v4587_v37, %v4459_v7  ;;  %v998_v15 = vadd.f32 %v4589_v38, %v4461_v3  ;;  %vm1132_vm4 = vcmp.eq.s32.totalorder %v7922_v44, %v5676_v25  ;;  %vm1134_vm5 = vcmp.eq.s32.totalorder %v7925_v53, %v5676_v25 }
 0x24e   :  { %v4052_v49 = vadd.f32 %v5291_v43, %v3532_v14  ;;  %v4054_v16 = vadd.f32 %v5293_v6, %v3534_v46  ;;  %v4715_v51 = vsel %vm1132_vm4, 1.0, %v5591_v36  ;;  %v4717_v58 = vsel %vm1134_vm5, 1.0, %v5591_v36 }
 0x24f   :  { %v1516_v47 = vadd.f32 %v4715_v51, %v996_v19  ;;  %v1518_v60 = vadd.f32 %v4717_v58, %v998_v15  ;;  %vm1652_vm6 = vcmp.eq.s32.totalorder %v7922_v44, %v5680_v27  ;;  %vm1654_vm7 = vcmp.eq.s32.totalorder %v7925_v53, %v5680_v27 }
 0x250   :  { %v5419_v2 = vpack.c.bf16 %v4054_v16, %v4052_v49  ;;  %v4843_v13 = vsel %vm1652_vm6, 1.0, %v5591_v36  ;;  %v4845_v4 = vsel %vm1654_vm7, 1.0, %v5591_v36  ;;  %vm2172_vm8 = vcmp.eq.s32.totalorder %v7922_v44, %v5684_v29 }
 0x251   :  { %v2036_v8 = vadd.f32 %v4843_v13, %v1516_v47  ;;  %v2038_v54 = vadd.f32 %v4845_v4, %v1518_v60  ;;  %vm2174_vm9 = vcmp.eq.s32.totalorder %v7925_v53, %v5684_v29  ;;  %v4971_v9 = vsel %vm2172_vm8, 1.0, %v5591_v36 }
 0x252   :  { %5420 = vmatprep.subr.bf16.mxu1 %v5419_v2  ;;  %v4973_v39 = vsel %vm2174_vm9, 1.0, %v5591_v36  ;;  %vm2692_vm10 = vcmp.eq.s32.totalorder %v7922_v44, %v5688_v31  ;;  %vm2694_vm11 = vcmp.eq.s32.totalorder %v7925_v53, %v5688_v31  ;;  %vm3212_vm12 = vcmp.eq.s32.totalorder %v7922_v44, %v5692_v33 }
 0x253   :  { %v2556_v61 = vadd.f32 %v4971_v9, %v2036_v8  ;;  %v2558_v48 = vadd.f32 %v4973_v39, %v2038_v54  ;;  %v5099_v55 = vsel %vm2692_vm10, 1.0, %v5591_v36  ;;  %v5101_v40 = vsel %vm2694_vm11, 1.0, %v5591_v36 }
 0x254   :  { %vm3214_vm13 = vcmp.eq.s32.totalorder %v7925_v53, %v5692_v33  ;;  %v5227_v17 = vsel %vm3212_vm12, 1.0, %v5591_v36  ;;  %vm3732_vm14 = vcmp.eq.s32.totalorder %v7922_v44, %v5696_v35  ;;  %vm3734_vm15 = vcmp.eq.s32.totalorder %v7925_v53, %v5696_v35 }
 0x255   :  { %v3076_v18 = vadd.f32 %v5099_v55, %v2556_v61  ;;  %v3078_v56 = vadd.f32 %v5101_v40, %v2558_v48  ;;  %v5229_v57 = vsel %vm3214_vm13, 1.0, %v5591_v36  ;;  %v5355_v52 = vsel %vm3732_vm14, 1.0, %v5591_v36 }
 0x256   :  { %v5357_v62 = vsel %vm3734_vm15, 1.0, %v5591_v36  ;;  %vm155_vm0 = vcmp.eq.s32.totalorder %v7916_v50, %v5666_v20  ;;  %vm157_vm1 = vcmp.eq.s32.totalorder %v7919_v10, %v5666_v20  ;;  %vm547_vm2 = vcmp.eq.s32.totalorder %v7916_v50, %v5670_v22 }
 0x257   :  { %v3596_v41 = vadd.f32 %v5227_v17, %v3076_v18  ;;  %v3598_v42 = vadd.f32 %v5229_v57, %v3078_v56  ;;  %v4394_v11 = vsel %vm155_vm0, 1.0, %v5591_v36  ;;  %v4396_v63 = vsel %vm157_vm1, 1.0, %v5591_v36 }
 0x258   :  { %vm549_vm3 = vcmp.eq.s32.totalorder %v7919_v10, %v5670_v22  ;;  %v4522_v0 = vsel %vm547_vm2, 1.0, %v5591_v36  ;;  %vm1067_vm4 = vcmp.eq.s32.totalorder %v7916_v50, %v5674_v24  ;;  %vm1069_vm5 = vcmp.eq.s32.totalorder %v7919_v10, %v5674_v24 }
 0x259   :  { %v4116_v59 = vadd.f32 %v5355_v52, %v3596_v41  ;;  %v4118_v5 = vadd.f32 %v5357_v62, %v3598_v42  ;;  %v4524_v12 = vsel %vm549_vm3, 1.0, %v5591_v36  ;;  %v931_v43 = vadd.f32 %v4522_v0, %v4394_v11 }
 0x25a   :  { %v933_v6 = vadd.f32 %v4524_v12, %v4396_v63  ;;  %v4650_v7 = vsel %vm1067_vm4, 1.0, %v5591_v36  ;;  %v4652_v3 = vsel %vm1069_vm5, 1.0, %v5591_v36  ;;  %vm1587_vm6 = vcmp.eq.s32.totalorder %v7916_v50, %v5678_v26 }
 0x25b   :  { %v5483_v14 = vpack.c.bf16 %v4118_v5, %v4116_v59  ;;  %v1451_v46 = vadd.f32 %v4650_v7, %v931_v43  ;;  %vm1589_vm7 = vcmp.eq.s32.totalorder %v7919_v10, %v5678_v26  ;;  %v4778_v37 = vsel %vm1587_vm6, 1.0, %v5591_v36 }
 0x25c   :  { %v1453_v38 = vadd.f32 %v4652_v3, %v933_v6  ;;  %v4780_v19 = vsel %vm1589_vm7, 1.0, %v5591_v36  ;;  %vm2107_vm8 = vcmp.eq.s32.totalorder %v7916_v50, %v5682_v28  ;;  %vm2109_vm9 = vcmp.eq.s32.totalorder %v7919_v10, %v5682_v28 }
 0x25d   :  { %5484 = vmatprep.subr.bf16.mxu0 %v5483_v14  ;;  %v1971_v15 = vadd.f32 %v4778_v37, %v1451_v46  ;;  %v4906_v49 = vsel %vm2107_vm8, 1.0, %v5591_v36  ;;  %v4908_v16 = vsel %vm2109_vm9, 1.0, %v5591_v36  ;;  %vm2627_vm10 = vcmp.eq.s32.totalorder %v7916_v50, %v5686_v30 }
 0x25e   :  { %v1973_v51 = vadd.f32 %v4780_v19, %v1453_v38  ;;  %vm2629_vm11 = vcmp.eq.s32.totalorder %v7919_v10, %v5686_v30  ;;  %v5034_v58 = vsel %vm2627_vm10, 1.0, %v5591_v36  ;;  %vm3147_vm12 = vcmp.eq.s32.totalorder %v7916_v50, %v5690_v32 }
 0x25f   :  { %v2491_v47 = vadd.f32 %v4906_v49, %v1971_v15  ;;  %v5036_v60 = vsel %vm2629_vm11, 1.0, %v5591_v36  ;;  %vm3149_vm13 = vcmp.eq.s32.totalorder %v7919_v10, %v5690_v32  ;;  %v5162_v2 = vsel %vm3147_vm12, 1.0, %v5591_v36 }
 0x260   :  { %v2493_v13 = vadd.f32 %v4908_v16, %v1973_v51  ;;  %v5164_v4 = vsel %vm3149_vm13, 1.0, %v5591_v36  ;;  %vm3667_vm14 = vcmp.eq.s32.totalorder %v7916_v50, %v5694_v34  ;;  %vm3669_vm15 = vcmp.eq.s32.totalorder %v7919_v10, %v5694_v34 }
 0x261   :  { %v3011_v8 = vadd.f32 %v5034_v58, %v2491_v47  ;;  %v5290_v54 = vsel %vm3667_vm14, 1.0, %v5591_v36  ;;  %v5292_v9 = vsel %vm3669_vm15, 1.0, %v5591_v36  ;;  %vm219_vm0 = vcmp.eq.s32.totalorder %v7922_v44, %v5666_v20 }
 0x262   :  { %v3013_v39 = vadd.f32 %v5036_v60, %v2493_v13  ;;  %vm221_vm1 = vcmp.eq.s32.totalorder %v7925_v53, %v5666_v20  ;;  %v4458_v61 = vsel %vm219_vm0, 1.0, %v5591_v36  ;;  %vm611_vm2 = vcmp.eq.s32.totalorder %v7922_v44, %v5670_v22 }
 0x263   :  { %v3531_v50 = vadd.f32 %v5162_v2, %v3011_v8  ;;  %v4460_v10 = vsel %vm221_vm1, 1.0, %v5591_v36  ;;  %vm613_vm3 = vcmp.eq.s32.totalorder %v7925_v53, %v5670_v22  ;;  %v4586_v48 = vsel %vm611_vm2, 1.0, %v5591_v36 }
 0x264   :  { %v3533_v55 = vadd.f32 %v5164_v4, %v3013_v39  ;;  %v4588_v40 = vsel %vm613_vm3, 1.0, %v5591_v36  ;;  %v995_v17 = vadd.f32 %v4586_v48, %v4458_v61  ;;  %vm1131_vm4 = vcmp.eq.s32.totalorder %v7922_v44, %v5674_v24 }
 0x265   :  { %v4051_v18 = vadd.f32 %v5290_v54, %v3531_v50  ;;  %v997_v56 = vadd.f32 %v4588_v40, %v4460_v10  ;;  %vm1133_vm5 = vcmp.eq.s32.totalorder %v7925_v53, %v5674_v24  ;;  %v4714_v57 = vsel %vm1131_vm4, 1.0, %v5591_v36 }
 0x266   :  { %v4053_v52 = vadd.f32 %v5292_v9, %v3533_v55  ;;  %v4716_v62 = vsel %vm1133_vm5, 1.0, %v5591_v36  ;;  %v1515_v41 = vadd.f32 %v4714_v57, %v995_v17  ;;  %vm1651_vm6 = vcmp.eq.s32.totalorder %v7922_v44, %v5678_v26 }
 0x267   :  { %v1517_v42 = vadd.f32 %v4716_v62, %v997_v56  ;;  %vm1653_vm7 = vcmp.eq.s32.totalorder %v7925_v53, %v5678_v26  ;;  %v4842_v11 = vsel %vm1651_vm6, 1.0, %v5591_v36  ;;  %vm2171_vm8 = vcmp.eq.s32.totalorder %v7922_v44, %v5682_v28 }
 0x268   :  { %v5421_v63 = vpack.c.bf16 %v4053_v52, %v4051_v18  ;;  %v4844_v0 = vsel %vm1653_vm7, 1.0, %v5591_v36  ;;  %v2035_v59 = vadd.f32 %v4842_v11, %v1515_v41  ;;  %vm2173_vm9 = vcmp.eq.s32.totalorder %v7925_v53, %v5682_v28 }
 0x269   :  { %v2037_v5 = vadd.f32 %v4844_v0, %v1517_v42  ;;  %v4970_v12 = vsel %vm2171_vm8, 1.0, %v5591_v36  ;;  %v4972_v43 = vsel %vm2173_vm9, 1.0, %v5591_v36  ;;  %vm2691_vm10 = vcmp.eq.s32.totalorder %v7922_v44, %v5686_v30 }
 0x26a   :  { %5422 = vmatpush1.bf16.msra.mxu1 %v5421_v63  ;;  %v2555_v6 = vadd.f32 %v4970_v12, %v2035_v59  ;;  %vm2693_vm11 = vcmp.eq.s32.totalorder %v7925_v53, %v5686_v30  ;;  %v5098_v7 = vsel %vm2691_vm10, 1.0, %v5591_v36  ;;  %vm3211_vm12 = vcmp.eq.s32.totalorder %v7922_v44, %v5690_v32 }
 0x26b   :  { %v2557_v3 = vadd.f32 %v4972_v43, %v2037_v5  ;;  %v5100_v14 = vsel %vm2693_vm11, 1.0, %v5591_v36  ;;  %vm3213_vm13 = vcmp.eq.s32.totalorder %v7925_v53, %v5690_v32  ;;  %v5226_v46 = vsel %vm3211_vm12, 1.0, %v5591_v36 }
 0x26c   :  { %v3075_v37 = vadd.f32 %v5098_v7, %v2555_v6  ;;  %v5228_v38 = vsel %vm3213_vm13, 1.0, %v5591_v36  ;;  %vm3731_vm14 = vcmp.eq.s32.totalorder %v7922_v44, %v5694_v34  ;;  %vm3733_vm15 = vcmp.eq.s32.totalorder %v7925_v53, %v5694_v34 }
 0x26d   :  { %v3077_v19 = vadd.f32 %v5100_v14, %v2557_v3  ;;  %v5354_v15 = vsel %vm3731_vm14, 1.0, %v5591_v36  ;;  %v5356_v49 = vsel %vm3733_vm15, 1.0, %v5591_v36  ;;  %v8123_v16 = vadd.s32 200, %v5632_v1 }
 0x26e   :  { %v3595_v51 = vadd.f32 %v5226_v46, %v3075_v37  ;;  %vm160_vm0 = vcmp.eq.s32.totalorder %v7928_v45, %v5668_v21  ;;  %vm552_vm1 = vcmp.eq.s32.totalorder %v7928_v45, %v5672_v23  ;;  %vm1072_vm2 = vcmp.eq.s32.totalorder %v7928_v45, %v5676_v25 }
 0x26f   :  { %v3597_v44 = vadd.f32 %v5228_v38, %v3077_v19  ;;  %vm162_vm3 = vcmp.eq.s32.totalorder %v8123_v16, %v5668_v21  ;;  %v4399_v53 = vsel %vm160_vm0, 1.0, %v5591_v36  ;;  %vm554_vm4 = vcmp.eq.s32.totalorder %v8123_v16, %v5672_v23 }
 0x270   :  { %v4115_v58 = vadd.f32 %v5354_v15, %v3595_v51  ;;  %v4401_v47 = vsel %vm162_vm3, 1.0, %v5591_v36  ;;  %v4527_v60 = vsel %vm552_vm1, 1.0, %v5591_v36  ;;  %v4529_v2 = vsel %vm554_vm4, 1.0, %v5591_v36 }
 0x271   :  { %v4117_v13 = vadd.f32 %v5356_v49, %v3597_v44  ;;  %v936_v4 = vadd.f32 %v4527_v60, %v4399_v53  ;;  %v938_v8 = vadd.f32 %v4529_v2, %v4401_v47  ;;  %vm1074_vm5 = vcmp.eq.s32.totalorder %v8123_v16, %v5676_v25 }
 0x272   :  { %v4655_v54 = vsel %vm1072_vm2, 1.0, %v5591_v36  ;;  %v4657_v9 = vsel %vm1074_vm5, 1.0, %v5591_v36  ;;  %vm1592_vm6 = vcmp.eq.s32.totalorder %v7928_v45, %v5680_v27  ;;  %vm1594_vm7 = vcmp.eq.s32.totalorder %v8123_v16, %v5680_v27 }
 0x273   :  { %v5485_v39 = vpack.c.bf16 %v4117_v13, %v4115_v58  ;;  %v1456_v61 = vadd.f32 %v4655_v54, %v936_v4  ;;  %v1458_v50 = vadd.f32 %v4657_v9, %v938_v8  ;;  %v4783_v10 = vsel %vm1592_vm6, 1.0, %v5591_v36 }
 0x274   :  { %v4785_v48 = vsel %vm1594_vm7, 1.0, %v5591_v36  ;;  %vm2112_vm8 = vcmp.eq.s32.totalorder %v7928_v45, %v5684_v29  ;;  %vm2114_vm9 = vcmp.eq.s32.totalorder %v8123_v16, %v5684_v29  ;;  %vm2632_vm10 = vcmp.eq.s32.totalorder %v7928_v45, %v5688_v31 }
 0x275   :  { %5486 = vmatpush1.bf16.msra.mxu0 %v5485_v39  ;;  %v1976_v55 = vadd.f32 %v4783_v10, %v1456_v61  ;;  %v1978_v40 = vadd.f32 %v4785_v48, %v1458_v50  ;;  %v4911_v17 = vsel %vm2112_vm8, 1.0, %v5591_v36  ;;  %v4913_v18 = vsel %vm2114_vm9, 1.0, %v5591_v36 }
 0x276   :  { %vm2634_vm11 = vcmp.eq.s32.totalorder %v8123_v16, %v5688_v31  ;;  %v5039_v56 = vsel %vm2632_vm10, 1.0, %v5591_v36  ;;  %vm3152_vm12 = vcmp.eq.s32.totalorder %v7928_v45, %v5692_v33  ;;  %vm3154_vm13 = vcmp.eq.s32.totalorder %v8123_v16, %v5692_v33 }
 0x277   :  { %v2496_v57 = vadd.f32 %v4911_v17, %v1976_v55  ;;  %v2498_v52 = vadd.f32 %v4913_v18, %v1978_v40  ;;  %v5041_v62 = vsel %vm2634_vm11, 1.0, %v5591_v36  ;;  %v5167_v41 = vsel %vm3152_vm12, 1.0, %v5591_v36 }
 0x278   :  { %v5169_v42 = vsel %vm3154_vm13, 1.0, %v5591_v36  ;;  %vm3672_vm14 = vcmp.eq.s32.totalorder %v7928_v45, %v5696_v35  ;;  %vm3674_vm15 = vcmp.eq.s32.totalorder %v8123_v16, %v5696_v35  ;;  %v8172_v11 = vadd.s32 448, %v5632_v1 }
 0x279   :  { %v3016_v63 = vadd.f32 %v5039_v56, %v2496_v57  ;;  %v3018_v0 = vadd.f32 %v5041_v62, %v2498_v52  ;;  %v5295_v59 = vsel %vm3672_vm14, 1.0, %v5591_v36  ;;  %v5297_v5 = vsel %vm3674_vm15, 1.0, %v5591_v36 }
 0x27a   :  { %v8177_v12 = vadd.s32 456, %v5632_v1  ;;  %vm224_vm0 = vcmp.eq.s32.totalorder %v8172_v11, %v5668_v21  ;;  %vm616_vm1 = vcmp.eq.s32.totalorder %v8172_v11, %v5672_v23  ;;  %vm1136_vm2 = vcmp.eq.s32.totalorder %v8172_v11, %v5676_v25 }
 0x27b   :  { %v3536_v43 = vadd.f32 %v5167_v41, %v3016_v63  ;;  %v3538_v6 = vadd.f32 %v5169_v42, %v3018_v0  ;;  %v4463_v7 = vsel %vm224_vm0, 1.0, %v5591_v36  ;;  %v4591_v3 = vsel %vm616_vm1, 1.0, %v5591_v36 }
 0x27c   :  { %vm226_vm3 = vcmp.eq.s32.totalorder %v8177_v12, %v5668_v21  ;;  %vm618_vm4 = vcmp.eq.s32.totalorder %v8177_v12, %v5672_v23  ;;  %v1000_v14 = vadd.f32 %v4591_v3, %v4463_v7  ;;  %vm1138_vm5 = vcmp.eq.s32.totalorder %v8177_v12, %v5676_v25 }
 0x27d   :  { %v4056_v46 = vadd.f32 %v5295_v59, %v3536_v43  ;;  %v4058_v37 = vadd.f32 %v5297_v5, %v3538_v6  ;;  %v4465_v38 = vsel %vm226_vm3, 1.0, %v5591_v36  ;;  %v4593_v19 = vsel %vm618_vm4, 1.0, %v5591_v36 }
 0x27e   :  { %v1002_v15 = vadd.f32 %v4593_v19, %v4465_v38  ;;  %v4719_v49 = vsel %vm1136_vm2, 1.0, %v5591_v36  ;;  %v4721_v51 = vsel %vm1138_vm5, 1.0, %v5591_v36  ;;  %vm1656_vm6 = vcmp.eq.s32.totalorder %v8172_v11, %v5680_v27 }
 0x27f   :  { %v5423_v44 = vpack.c.bf16 %v4058_v37, %v4056_v46  ;;  %v1520_v53 = vadd.f32 %v4719_v49, %v1000_v14  ;;  %vm1658_vm7 = vcmp.eq.s32.totalorder %v8177_v12, %v5680_v27  ;;  %v4847_v58 = vsel %vm1656_vm6, 1.0, %v5591_v36 }
 0x280   :  { %v1522_v47 = vadd.f32 %v4721_v51, %v1002_v15  ;;  %v4849_v60 = vsel %vm1658_vm7, 1.0, %v5591_v36  ;;  %vm2176_vm8 = vcmp.eq.s32.totalorder %v8172_v11, %v5684_v29  ;;  %vm2178_vm9 = vcmp.eq.s32.totalorder %v8177_v12, %v5684_v29 }
 0x281   :  { %5424 = vmatprep.subr.bf16.mxu1 %v5423_v44  ;;  %v2040_v2 = vadd.f32 %v4847_v58, %v1520_v53  ;;  %v4975_v13 = vsel %vm2176_vm8, 1.0, %v5591_v36  ;;  %v4977_v4 = vsel %vm2178_vm9, 1.0, %v5591_v36  ;;  %vm2696_vm10 = vcmp.eq.s32.totalorder %v8172_v11, %v5688_v31 }
 0x282   :  { %v2042_v8 = vadd.f32 %v4849_v60, %v1522_v47  ;;  %vm2698_vm11 = vcmp.eq.s32.totalorder %v8177_v12, %v5688_v31  ;;  %v5103_v54 = vsel %vm2696_vm10, 1.0, %v5591_v36  ;;  %vm3216_vm12 = vcmp.eq.s32.totalorder %v8172_v11, %v5692_v33 }
 0x283   :  { %v2560_v9 = vadd.f32 %v4975_v13, %v2040_v2  ;;  %v5105_v39 = vsel %vm2698_vm11, 1.0, %v5591_v36  ;;  %vm3218_vm13 = vcmp.eq.s32.totalorder %v8177_v12, %v5692_v33  ;;  %v5231_v61 = vsel %vm3216_vm12, 1.0, %v5591_v36 }
 0x284   :  { %v2562_v50 = vadd.f32 %v4977_v4, %v2042_v8  ;;  %v5233_v10 = vsel %vm3218_vm13, 1.0, %v5591_v36  ;;  %vm3736_vm14 = vcmp.eq.s32.totalorder %v8172_v11, %v5696_v35  ;;  %vm3738_vm15 = vcmp.eq.s32.totalorder %v8177_v12, %v5696_v35 }
 0x285   :  { %v3080_v48 = vadd.f32 %v5103_v54, %v2560_v9  ;;  %v5359_v55 = vsel %vm3736_vm14, 1.0, %v5591_v36  ;;  %v5361_v40 = vsel %vm3738_vm15, 1.0, %v5591_v36  ;;  %vm159_vm0 = vcmp.eq.s32.totalorder %v7928_v45, %v5666_v20 }
 0x286   :  { %v3082_v17 = vadd.f32 %v5105_v39, %v2562_v50  ;;  %vm161_vm1 = vcmp.eq.s32.totalorder %v8123_v16, %v5666_v20  ;;  %v4398_v18 = vsel %vm159_vm0, 1.0, %v5591_v36  ;;  %vm551_vm2 = vcmp.eq.s32.totalorder %v7928_v45, %v5670_v22 }
 0x287   :  { %v3600_v56 = vadd.f32 %v5231_v61, %v3080_v48  ;;  %v4400_v57 = vsel %vm161_vm1, 1.0, %v5591_v36  ;;  %vm553_vm3 = vcmp.eq.s32.totalorder %v8123_v16, %v5670_v22  ;;  %v4526_v52 = vsel %vm551_vm2, 1.0, %v5591_v36 }
 0x288   :  { %v3602_v62 = vadd.f32 %v5233_v10, %v3082_v17  ;;  %v4528_v41 = vsel %vm553_vm3, 1.0, %v5591_v36  ;;  %v935_v42 = vadd.f32 %v4526_v52, %v4398_v18  ;;  %vm1071_vm4 = vcmp.eq.s32.totalorder %v7928_v45, %v5674_v24 }
 0x289   :  { %v4120_v63 = vadd.f32 %v5359_v55, %v3600_v56  ;;  %v937_v0 = vadd.f32 %v4528_v41, %v4400_v57  ;;  %vm1073_vm5 = vcmp.eq.s32.totalorder %v8123_v16, %v5674_v24  ;;  %v4654_v59 = vsel %vm1071_vm4, 1.0, %v5591_v36 }
 0x28a   :  { %v4122_v5 = vadd.f32 %v5361_v40, %v3602_v62  ;;  %v4656_v43 = vsel %vm1073_vm5, 1.0, %v5591_v36  ;;  %v1455_v6 = vadd.f32 %v4654_v59, %v935_v42  ;;  %vm1591_vm6 = vcmp.eq.s32.totalorder %v7928_v45, %v5678_v26 }
 0x28b   :  { %v1457_v7 = vadd.f32 %v4656_v43, %v937_v0  ;;  %vm1593_vm7 = vcmp.eq.s32.totalorder %v8123_v16, %v5678_v26  ;;  %v4782_v3 = vsel %vm1591_vm6, 1.0, %v5591_v36  ;;  %vm2111_vm8 = vcmp.eq.s32.totalorder %v7928_v45, %v5682_v28 }
 0x28c   :  { %v5487_v14 = vpack.c.bf16 %v4122_v5, %v4120_v63  ;;  %v4784_v46 = vsel %vm1593_vm7, 1.0, %v5591_v36  ;;  %v1975_v37 = vadd.f32 %v4782_v3, %v1455_v6  ;;  %vm2113_vm9 = vcmp.eq.s32.totalorder %v8123_v16, %v5682_v28 }
 0x28d   :  { %v1977_v38 = vadd.f32 %v4784_v46, %v1457_v7  ;;  %v4910_v19 = vsel %vm2111_vm8, 1.0, %v5591_v36  ;;  %v4912_v15 = vsel %vm2113_vm9, 1.0, %v5591_v36  ;;  %vm2631_vm10 = vcmp.eq.s32.totalorder %v7928_v45, %v5686_v30 }
 0x28e   :  { %5488 = vmatprep.subr.bf16.mxu0 %v5487_v14  ;;  %v2495_v49 = vadd.f32 %v4910_v19, %v1975_v37  ;;  %vm2633_vm11 = vcmp.eq.s32.totalorder %v8123_v16, %v5686_v30  ;;  %v5038_v51 = vsel %vm2631_vm10, 1.0, %v5591_v36  ;;  %vm3151_vm12 = vcmp.eq.s32.totalorder %v7928_v45, %v5690_v32 }
 0x28f   :  { %v2497_v44 = vadd.f32 %v4912_v15, %v1977_v38  ;;  %v5040_v53 = vsel %vm2633_vm11, 1.0, %v5591_v36  ;;  %vm3153_vm13 = vcmp.eq.s32.totalorder %v8123_v16, %v5690_v32  ;;  %v5166_v58 = vsel %vm3151_vm12, 1.0, %v5591_v36 }
 0x290   :  { %v3015_v47 = vadd.f32 %v5038_v51, %v2495_v49  ;;  %v5168_v60 = vsel %vm3153_vm13, 1.0, %v5591_v36  ;;  %vm3671_vm14 = vcmp.eq.s32.totalorder %v7928_v45, %v5694_v34  ;;  %vm3673_vm15 = vcmp.eq.s32.totalorder %v8123_v16, %v5694_v34 }
 0x291   :  { %v3017_v2 = vadd.f32 %v5040_v53, %v2497_v44  ;;  %v5294_v13 = vsel %vm3671_vm14, 1.0, %v5591_v36  ;;  %v5296_v4 = vsel %vm3673_vm15, 1.0, %v5591_v36  ;;  %vm223_vm0 = vcmp.eq.s32.totalorder %v8172_v11, %v5666_v20 }
 0x292   :  { %v3535_v8 = vadd.f32 %v5166_v58, %v3015_v47  ;;  %vm225_vm1 = vcmp.eq.s32.totalorder %v8177_v12, %v5666_v20  ;;  %v4462_v54 = vsel %vm223_vm0, 1.0, %v5591_v36  ;;  %vm615_vm2 = vcmp.eq.s32.totalorder %v8172_v11, %v5670_v22 }
 0x293   :  { %v3537_v45 = vadd.f32 %v5168_v60, %v3017_v2  ;;  %v4464_v16 = vsel %vm225_vm1, 1.0, %v5591_v36  ;;  %vm617_vm3 = vcmp.eq.s32.totalorder %v8177_v12, %v5670_v22  ;;  %v4590_v9 = vsel %vm615_vm2, 1.0, %v5591_v36 }
 0x294   :  { %v4055_v39 = vadd.f32 %v5294_v13, %v3535_v8  ;;  %v4592_v61 = vsel %vm617_vm3, 1.0, %v5591_v36  ;;  %v999_v50 = vadd.f32 %v4590_v9, %v4462_v54  ;;  %vm1135_vm4 = vcmp.eq.s32.totalorder %v8172_v11, %v5674_v24 }
 0x295   :  { %v4057_v10 = vadd.f32 %v5296_v4, %v3537_v45  ;;  %v1001_v48 = vadd.f32 %v4592_v61, %v4464_v16  ;;  %vm1137_vm5 = vcmp.eq.s32.totalorder %v8177_v12, %v5674_v24  ;;  %v4718_v55 = vsel %vm1135_vm4, 1.0, %v5591_v36 }
 0x296   :  { %v4720_v40 = vsel %vm1137_vm5, 1.0, %v5591_v36  ;;  %v1519_v17 = vadd.f32 %v4718_v55, %v999_v50  ;;  %vm1655_vm6 = vcmp.eq.s32.totalorder %v8172_v11, %v5678_v26  ;;  %vm1657_vm7 = vcmp.eq.s32.totalorder %v8177_v12, %v5678_v26 }
 0x297   :  { %v5425_v18 = vpack.c.bf16 %v4057_v10, %v4055_v39  ;;  %v1521_v56 = vadd.f32 %v4720_v40, %v1001_v48  ;;  %v4846_v57 = vsel %vm1655_vm6, 1.0, %v5591_v36  ;;  %v4848_v52 = vsel %vm1657_vm7, 1.0, %v5591_v36 }
 0x298   :  { %v2039_v62 = vadd.f32 %v4846_v57, %v1519_v17  ;;  %vm2175_vm8 = vcmp.eq.s32.totalorder %v8172_v11, %v5682_v28  ;;  %vm2177_vm9 = vcmp.eq.s32.totalorder %v8177_v12, %v5682_v28  ;;  %vm2695_vm10 = vcmp.eq.s32.totalorder %v8172_v11, %v5686_v30 }
 0x299   :  { %5426 = vmatpush1.bf16.msra.mxu1 %v5425_v18  ;;  %v2041_v41 = vadd.f32 %v4848_v52, %v1521_v56  ;;  %v4974_v42 = vsel %vm2175_vm8, 1.0, %v5591_v36  ;;  %v4976_v63 = vsel %vm2177_vm9, 1.0, %v5591_v36  ;;  %vm2697_vm11 = vcmp.eq.s32.totalorder %v8177_v12, %v5686_v30 }
 0x29a   :  { %v2559_v0 = vadd.f32 %v4974_v42, %v2039_v62  ;;  %v5102_v59 = vsel %vm2695_vm10, 1.0, %v5591_v36  ;;  %v5104_v5 = vsel %vm2697_vm11, 1.0, %v5591_v36  ;;  %vm3215_vm12 = vcmp.eq.s32.totalorder %v8172_v11, %v5690_v32 }
 0x29b   :  { %v2561_v43 = vadd.f32 %v4976_v63, %v2041_v41  ;;  %vm3217_vm13 = vcmp.eq.s32.totalorder %v8177_v12, %v5690_v32  ;;  %v5230_v6 = vsel %vm3215_vm12, 1.0, %v5591_v36  ;;  %vm3735_vm14 = vcmp.eq.s32.totalorder %v8172_v11, %v5694_v34 }
 0x29c   :  { %v3079_v7 = vadd.f32 %v5102_v59, %v2559_v0  ;;  %v5232_v3 = vsel %vm3217_vm13, 1.0, %v5591_v36  ;;  %vm3737_vm15 = vcmp.eq.s32.totalorder %v8177_v12, %v5694_v34  ;;  %v5358_v14 = vsel %vm3735_vm14, 1.0, %v5591_v36 }
 0x29d   :  { %v3081_v46 = vadd.f32 %v5104_v5, %v2561_v43  ;;  %v5360_v37 = vsel %vm3737_vm15, 1.0, %v5591_v36  ;;  %v8324_v38 = vadd.s32 208, %v5632_v1  ;;  %v8327_v19 = vadd.s32 216, %v5632_v1 }
 0x29e   :  { %v3599_v15 = vadd.f32 %v5230_v6, %v3079_v7  ;;  %v8330_v11 = vadd.s32 464, %v5632_v1  ;;  %v8333_v49 = vadd.s32 472, %v5632_v1  ;;  %v8336_v12 = vadd.s32 224, %v5632_v1 }
 0x29f   :  { %v3601_v51 = vadd.f32 %v5232_v3, %v3081_v46  ;;  %vm164_vm0 = vcmp.eq.s32.totalorder %v8324_v38, %v5668_v21  ;;  %vm166_vm1 = vcmp.eq.s32.totalorder %v8327_v19, %v5668_v21  ;;  %vm556_vm2 = vcmp.eq.s32.totalorder %v8324_v38, %v5672_v23 }
 0x2a0   :  { %v4119_v44 = vadd.f32 %v5358_v14, %v3599_v15  ;;  %v4403_v53 = vsel %vm164_vm0, 1.0, %v5591_v36  ;;  %v4405_v58 = vsel %vm166_vm1, 1.0, %v5591_v36  ;;  %vm558_vm3 = vcmp.eq.s32.totalorder %v8327_v19, %v5672_v23 }
 0x2a1   :  { %v4121_v47 = vadd.f32 %v5360_v37, %v3601_v51  ;;  %v4531_v60 = vsel %vm556_vm2, 1.0, %v5591_v36  ;;  %v4533_v2 = vsel %vm558_vm3, 1.0, %v5591_v36  ;;  %vm1076_vm4 = vcmp.eq.s32.totalorder %v8324_v38, %v5676_v25 }
 0x2a2   :  { %v940_v13 = vadd.f32 %v4531_v60, %v4403_v53  ;;  %v942_v4 = vadd.f32 %v4533_v2, %v4405_v58  ;;  %vm1078_vm5 = vcmp.eq.s32.totalorder %v8327_v19, %v5676_v25  ;;  %v4659_v8 = vsel %vm1076_vm4, 1.0, %v5591_v36 }
 0x2a3   :  { %v5489_v54 = vpack.c.bf16 %v4121_v47, %v4119_v44  ;;  %v4661_v45 = vsel %vm1078_vm5, 1.0, %v5591_v36  ;;  %vm1596_vm6 = vcmp.eq.s32.totalorder %v8324_v38, %v5680_v27  ;;  %vm1598_vm7 = vcmp.eq.s32.totalorder %v8327_v19, %v5680_v27 }
 0x2a4   :  { %v1460_v16 = vadd.f32 %v4659_v8, %v940_v13  ;;  %v1462_v9 = vadd.f32 %v4661_v45, %v942_v4  ;;  %v4787_v39 = vsel %vm1596_vm6, 1.0, %v5591_v36  ;;  %v4789_v61 = vsel %vm1598_vm7, 1.0, %v5591_v36 }
 0x2a5   :  { %5490 = vmatpush1.bf16.msra.mxu0 %v5489_v54  ;;  %vm2116_vm8 = vcmp.eq.s32.totalorder %v8324_v38, %v5684_v29  ;;  %vm2118_vm9 = vcmp.eq.s32.totalorder %v8327_v19, %v5684_v29  ;;  %vm2636_vm10 = vcmp.eq.s32.totalorder %v8324_v38, %v5688_v31  ;;  %vm2638_vm11 = vcmp.eq.s32.totalorder %v8327_v19, %v5688_v31 }
 0x2a6   :  { %v1980_v50 = vadd.f32 %v4787_v39, %v1460_v16  ;;  %v1982_v10 = vadd.f32 %v4789_v61, %v1462_v9  ;;  %v4915_v48 = vsel %vm2116_vm8, 1.0, %v5591_v36  ;;  %v4917_v55 = vsel %vm2118_vm9, 1.0, %v5591_v36 }
 0x2a7   :  { %v5043_v40 = vsel %vm2636_vm10, 1.0, %v5591_v36  ;;  %v5045_v17 = vsel %vm2638_vm11, 1.0, %v5591_v36  ;;  %vm3156_vm12 = vcmp.eq.s32.totalorder %v8324_v38, %v5692_v33  ;;  %vm3158_vm13 = vcmp.eq.s32.totalorder %v8327_v19, %v5692_v33 }
 0x2a8   :  { %v2500_v18 = vadd.f32 %v4915_v48, %v1980_v50  ;;  %v2502_v56 = vadd.f32 %v4917_v55, %v1982_v10  ;;  %v5171_v57 = vsel %vm3156_vm12, 1.0, %v5591_v36  ;;  %v5173_v52 = vsel %vm3158_vm13, 1.0, %v5591_v36  ;;  %v4136_v55 = vld [vmem:[#allocation5 + $0x8] sm:$0xff] }
 0x2a9   :  { %vm3676_vm14 = vcmp.eq.s32.totalorder %v8324_v38, %v5696_v35  ;;  %vm3678_vm15 = vcmp.eq.s32.totalorder %v8327_v19, %v5696_v35  ;;  %vm228_vm0 = vcmp.eq.s32.totalorder %v8330_v11, %v5668_v21  ;;  %vm230_vm1 = vcmp.eq.s32.totalorder %v8333_v49, %v5668_v21  ;;  %4203 = vmatprep.mubr.f32.mxu1 %v4136_v55 }
 0x2aa   :  { %v3020_v62 = vadd.f32 %v5043_v40, %v2500_v18  ;;  %v3022_v41 = vadd.f32 %v5045_v17, %v2502_v56  ;;  %v5299_v42 = vsel %vm3676_vm14, 1.0, %v5591_v36  ;;  %v5301_v63 = vsel %vm3678_vm15, 1.0, %v5591_v36  ;;  %v4138_v40 = vld [vmem:[#allocation5 + $0x18] sm:$0xff] }
 0x2ab   :  { %v4467_v0 = vsel %vm228_vm0, 1.0, %v5591_v36  ;;  %v4469_v59 = vsel %vm230_vm1, 1.0, %v5591_v36  ;;  %vm620_vm2 = vcmp.eq.s32.totalorder %v8330_v11, %v5672_v23  ;;  %vm622_vm3 = vcmp.eq.s32.totalorder %v8333_v49, %v5672_v23  ;;  %4274 = vmatprep.mubr.f32.mxu0 %v4138_v40 }
 0x2ac   :  { %v3540_v5 = vadd.f32 %v5171_v57, %v3020_v62  ;;  %v3542_v43 = vadd.f32 %v5173_v52, %v3022_v41  ;;  %v4595_v6 = vsel %vm620_vm2, 1.0, %v5591_v36  ;;  %v4597_v7 = vsel %vm622_vm3, 1.0, %v5591_v36 }
 0x2ad   :  { %v1004_v3 = vadd.f32 %v4595_v6, %v4467_v0  ;;  %v1006_v14 = vadd.f32 %v4597_v7, %v4469_v59  ;;  %vm1140_vm4 = vcmp.eq.s32.totalorder %v8330_v11, %v5676_v25  ;;  %vm1142_vm5 = vcmp.eq.s32.totalorder %v8333_v49, %v5676_v25 }
 0x2ae   :  { %v4060_v46 = vadd.f32 %v5299_v42, %v3540_v5  ;;  %v4062_v37 = vadd.f32 %v5301_v63, %v3542_v43  ;;  %v4723_v15 = vsel %vm1140_vm4, 1.0, %v5591_v36  ;;  %v4725_v51 = vsel %vm1142_vm5, 1.0, %v5591_v36 }
 0x2af   :  { %v1524_v44 = vadd.f32 %v4723_v15, %v1004_v3  ;;  %v1526_v53 = vadd.f32 %v4725_v51, %v1006_v14  ;;  %vm1660_vm6 = vcmp.eq.s32.totalorder %v8330_v11, %v5680_v27  ;;  %vm1662_vm7 = vcmp.eq.s32.totalorder %v8333_v49, %v5680_v27 }
 0x2b0   :  { %v5427_v58 = vpack.c.bf16 %v4062_v37, %v4060_v46  ;;  %v4851_v47 = vsel %vm1660_vm6, 1.0, %v5591_v36  ;;  %v4853_v60 = vsel %vm1662_vm7, 1.0, %v5591_v36  ;;  %vm2180_vm8 = vcmp.eq.s32.totalorder %v8330_v11, %v5684_v29 }
 0x2b1   :  { %v2044_v2 = vadd.f32 %v4851_v47, %v1524_v44  ;;  %v2046_v13 = vadd.f32 %v4853_v60, %v1526_v53  ;;  %vm2182_vm9 = vcmp.eq.s32.totalorder %v8333_v49, %v5684_v29  ;;  %v4979_v4 = vsel %vm2180_vm8, 1.0, %v5591_v36 }
 0x2b2   :  { %5428 = vmatprep.subr.bf16.mxu1 %v5427_v58  ;;  %v4981_v8 = vsel %vm2182_vm9, 1.0, %v5591_v36  ;;  %vm2700_vm10 = vcmp.eq.s32.totalorder %v8330_v11, %v5688_v31  ;;  %vm2702_vm11 = vcmp.eq.s32.totalorder %v8333_v49, %v5688_v31  ;;  %vm3220_vm12 = vcmp.eq.s32.totalorder %v8330_v11, %v5692_v33 }
 0x2b3   :  { %v2564_v54 = vadd.f32 %v4979_v4, %v2044_v2  ;;  %v2566_v45 = vadd.f32 %v4981_v8, %v2046_v13  ;;  %v5107_v16 = vsel %vm2700_vm10, 1.0, %v5591_v36  ;;  %v5109_v9 = vsel %vm2702_vm11, 1.0, %v5591_v36 }
 0x2b4   :  { %vm3222_vm13 = vcmp.eq.s32.totalorder %v8333_v49, %v5692_v33  ;;  %v5235_v39 = vsel %vm3220_vm12, 1.0, %v5591_v36  ;;  %vm3740_vm14 = vcmp.eq.s32.totalorder %v8330_v11, %v5696_v35  ;;  %vm3742_vm15 = vcmp.eq.s32.totalorder %v8333_v49, %v5696_v35 }
 0x2b5   :  { %v3084_v61 = vadd.f32 %v5107_v16, %v2564_v54  ;;  %v3086_v50 = vadd.f32 %v5109_v9, %v2566_v45  ;;  %v5237_v10 = vsel %vm3222_vm13, 1.0, %v5591_v36  ;;  %v5363_v48 = vsel %vm3740_vm14, 1.0, %v5591_v36 }
 0x2b6   :  { %v5365_v17 = vsel %vm3742_vm15, 1.0, %v5591_v36  ;;  %vm163_vm0 = vcmp.eq.s32.totalorder %v8324_v38, %v5666_v20  ;;  %vm165_vm1 = vcmp.eq.s32.totalorder %v8327_v19, %v5666_v20  ;;  %vm555_vm2 = vcmp.eq.s32.totalorder %v8324_v38, %v5670_v22 }
 0x2b7   :  { %v3604_v18 = vadd.f32 %v5235_v39, %v3084_v61  ;;  %v3606_v56 = vadd.f32 %v5237_v10, %v3086_v50  ;;  %v4402_v57 = vsel %vm163_vm0, 1.0, %v5591_v36  ;;  %v4404_v52 = vsel %vm165_vm1, 1.0, %v5591_v36 }
 0x2b8   :  { %vm557_vm3 = vcmp.eq.s32.totalorder %v8327_v19, %v5670_v22  ;;  %v4530_v62 = vsel %vm555_vm2, 1.0, %v5591_v36  ;;  %vm1075_vm4 = vcmp.eq.s32.totalorder %v8324_v38, %v5674_v24  ;;  %vm1077_vm5 = vcmp.eq.s32.totalorder %v8327_v19, %v5674_v24 }
 0x2b9   :  { %v4124_v41 = vadd.f32 %v5363_v48, %v3604_v18  ;;  %v4126_v42 = vadd.f32 %v5365_v17, %v3606_v56  ;;  %v4532_v63 = vsel %vm557_vm3, 1.0, %v5591_v36  ;;  %v939_v0 = vadd.f32 %v4530_v62, %v4402_v57 }
 0x2ba   :  { %v941_v59 = vadd.f32 %v4532_v63, %v4404_v52  ;;  %v4658_v5 = vsel %vm1075_vm4, 1.0, %v5591_v36  ;;  %v4660_v43 = vsel %vm1077_vm5, 1.0, %v5591_v36  ;;  %vm1595_vm6 = vcmp.eq.s32.totalorder %v8324_v38, %v5678_v26 }
 0x2bb   :  { %v5491_v6 = vpack.c.bf16 %v4126_v42, %v4124_v41  ;;  %v1459_v7 = vadd.f32 %v4658_v5, %v939_v0  ;;  %vm1597_vm7 = vcmp.eq.s32.totalorder %v8327_v19, %v5678_v26  ;;  %v4786_v3 = vsel %vm1595_vm6, 1.0, %v5591_v36 }
 0x2bc   :  { %v1461_v14 = vadd.f32 %v4660_v43, %v941_v59  ;;  %v4788_v46 = vsel %vm1597_vm7, 1.0, %v5591_v36  ;;  %vm2115_vm8 = vcmp.eq.s32.totalorder %v8324_v38, %v5682_v28  ;;  %vm2117_vm9 = vcmp.eq.s32.totalorder %v8327_v19, %v5682_v28 }
 0x2bd   :  { %5492 = vmatprep.subr.bf16.mxu0 %v5491_v6  ;;  %v1979_v37 = vadd.f32 %v4786_v3, %v1459_v7  ;;  %v4914_v15 = vsel %vm2115_vm8, 1.0, %v5591_v36  ;;  %v4916_v51 = vsel %vm2117_vm9, 1.0, %v5591_v36  ;;  %vm2635_vm10 = vcmp.eq.s32.totalorder %v8324_v38, %v5686_v30 }
 0x2be   :  { %v1981_v44 = vadd.f32 %v4788_v46, %v1461_v14  ;;  %vm2637_vm11 = vcmp.eq.s32.totalorder %v8327_v19, %v5686_v30  ;;  %v5042_v53 = vsel %vm2635_vm10, 1.0, %v5591_v36  ;;  %vm3155_vm12 = vcmp.eq.s32.totalorder %v8324_v38, %v5690_v32 }
 0x2bf   :  { %v2499_v58 = vadd.f32 %v4914_v15, %v1979_v37  ;;  %v5044_v47 = vsel %vm2637_vm11, 1.0, %v5591_v36  ;;  %vm3157_vm13 = vcmp.eq.s32.totalorder %v8327_v19, %v5690_v32  ;;  %v5170_v60 = vsel %vm3155_vm12, 1.0, %v5591_v36 }
 0x2c0   :  { %v2501_v2 = vadd.f32 %v4916_v51, %v1981_v44  ;;  %v5172_v13 = vsel %vm3157_vm13, 1.0, %v5591_v36  ;;  %vm3675_vm14 = vcmp.eq.s32.totalorder %v8324_v38, %v5694_v34  ;;  %vm3677_vm15 = vcmp.eq.s32.totalorder %v8327_v19, %v5694_v34 }
 0x2c1   :  { %v3019_v4 = vadd.f32 %v5042_v53, %v2499_v58  ;;  %v5298_v8 = vsel %vm3675_vm14, 1.0, %v5591_v36  ;;  %v5300_v54 = vsel %vm3677_vm15, 1.0, %v5591_v36  ;;  %vm227_vm0 = vcmp.eq.s32.totalorder %v8330_v11, %v5666_v20 }
 0x2c2   :  { %v3021_v45 = vadd.f32 %v5044_v47, %v2501_v2  ;;  %vm229_vm1 = vcmp.eq.s32.totalorder %v8333_v49, %v5666_v20  ;;  %v4466_v16 = vsel %vm227_vm0, 1.0, %v5591_v36  ;;  %vm619_vm2 = vcmp.eq.s32.totalorder %v8330_v11, %v5670_v22 }
 0x2c3   :  { %v3539_v38 = vadd.f32 %v5170_v60, %v3019_v4  ;;  %v4468_v19 = vsel %vm229_vm1, 1.0, %v5591_v36  ;;  %vm621_vm3 = vcmp.eq.s32.totalorder %v8333_v49, %v5670_v22  ;;  %v4594_v9 = vsel %vm619_vm2, 1.0, %v5591_v36 }
 0x2c4   :  { %v3541_v39 = vadd.f32 %v5172_v13, %v3021_v45  ;;  %v4596_v61 = vsel %vm621_vm3, 1.0, %v5591_v36  ;;  %v1003_v50 = vadd.f32 %v4594_v9, %v4466_v16  ;;  %vm1139_vm4 = vcmp.eq.s32.totalorder %v8330_v11, %v5674_v24 }
 0x2c5   :  { %v4059_v10 = vadd.f32 %v5298_v8, %v3539_v38  ;;  %v1005_v48 = vadd.f32 %v4596_v61, %v4468_v19  ;;  %vm1141_vm5 = vcmp.eq.s32.totalorder %v8333_v49, %v5674_v24  ;;  %v4722_v55 = vsel %vm1139_vm4, 1.0, %v5591_v36 }
 0x2c6   :  { %v4061_v40 = vadd.f32 %v5300_v54, %v3541_v39  ;;  %v4724_v17 = vsel %vm1141_vm5, 1.0, %v5591_v36  ;;  %v1523_v18 = vadd.f32 %v4722_v55, %v1003_v50  ;;  %vm1659_vm6 = vcmp.eq.s32.totalorder %v8330_v11, %v5678_v26 }
 0x2c7   :  { %v1525_v56 = vadd.f32 %v4724_v17, %v1005_v48  ;;  %vm1661_vm7 = vcmp.eq.s32.totalorder %v8333_v49, %v5678_v26  ;;  %v4850_v57 = vsel %vm1659_vm6, 1.0, %v5591_v36  ;;  %vm2179_vm8 = vcmp.eq.s32.totalorder %v8330_v11, %v5682_v28 }
 0x2c8   :  { %v5429_v52 = vpack.c.bf16 %v4061_v40, %v4059_v10  ;;  %v4852_v62 = vsel %vm1661_vm7, 1.0, %v5591_v36  ;;  %v2043_v41 = vadd.f32 %v4850_v57, %v1523_v18  ;;  %vm2181_vm9 = vcmp.eq.s32.totalorder %v8333_v49, %v5682_v28 }
 0x2c9   :  { %v2045_v42 = vadd.f32 %v4852_v62, %v1525_v56  ;;  %v4978_v63 = vsel %vm2179_vm8, 1.0, %v5591_v36  ;;  %v4980_v0 = vsel %vm2181_vm9, 1.0, %v5591_v36  ;;  %vm2699_vm10 = vcmp.eq.s32.totalorder %v8330_v11, %v5686_v30 }
 0x2ca   :  { %5430 = vmatpush1.bf16.msra.mxu1 %v5429_v52  ;;  %v2563_v59 = vadd.f32 %v4978_v63, %v2043_v41  ;;  %vm2701_vm11 = vcmp.eq.s32.totalorder %v8333_v49, %v5686_v30  ;;  %v5106_v5 = vsel %vm2699_vm10, 1.0, %v5591_v36  ;;  %vm3219_vm12 = vcmp.eq.s32.totalorder %v8330_v11, %v5690_v32 }
 0x2cb   :  { %v2565_v43 = vadd.f32 %v4980_v0, %v2045_v42  ;;  %v5108_v6 = vsel %vm2701_vm11, 1.0, %v5591_v36  ;;  %vm3221_vm13 = vcmp.eq.s32.totalorder %v8333_v49, %v5690_v32  ;;  %v5234_v7 = vsel %vm3219_vm12, 1.0, %v5591_v36 }
 0x2cc   :  { %v3083_v3 = vadd.f32 %v5106_v5, %v2563_v59  ;;  %v5236_v14 = vsel %vm3221_vm13, 1.0, %v5591_v36  ;;  %vm3739_vm14 = vcmp.eq.s32.totalorder %v8330_v11, %v5694_v34  ;;  %vm3741_vm15 = vcmp.eq.s32.totalorder %v8333_v49, %v5694_v34 }
 0x2cd   :  { %v3085_v46 = vadd.f32 %v5108_v6, %v2565_v43  ;;  %v5362_v37 = vsel %vm3739_vm14, 1.0, %v5591_v36  ;;  %v5364_v15 = vsel %vm3741_vm15, 1.0, %v5591_v36  ;;  %v8531_v51 = vadd.s32 232, %v5632_v1 }
 0x2ce   :  { %v3603_v44 = vadd.f32 %v5234_v7, %v3083_v3  ;;  %vm168_vm0 = vcmp.eq.s32.totalorder %v8336_v12, %v5668_v21  ;;  %vm560_vm1 = vcmp.eq.s32.totalorder %v8336_v12, %v5672_v23  ;;  %vm1080_vm2 = vcmp.eq.s32.totalorder %v8336_v12, %v5676_v25 }
 0x2cf   :  { %v3605_v11 = vadd.f32 %v5236_v14, %v3085_v46  ;;  %vm170_vm3 = vcmp.eq.s32.totalorder %v8531_v51, %v5668_v21  ;;  %v4407_v49 = vsel %vm168_vm0, 1.0, %v5591_v36  ;;  %vm562_vm4 = vcmp.eq.s32.totalorder %v8531_v51, %v5672_v23 }
 0x2d0   :  { %v4123_v53 = vadd.f32 %v5362_v37, %v3603_v44  ;;  %v4409_v58 = vsel %vm170_vm3, 1.0, %v5591_v36  ;;  %v4535_v47 = vsel %vm560_vm1, 1.0, %v5591_v36  ;;  %v4537_v60 = vsel %vm562_vm4, 1.0, %v5591_v36 }
 0x2d1   :  { %v4125_v2 = vadd.f32 %v5364_v15, %v3605_v11  ;;  %v944_v13 = vadd.f32 %v4535_v47, %v4407_v49  ;;  %v946_v4 = vadd.f32 %v4537_v60, %v4409_v58  ;;  %vm1082_vm5 = vcmp.eq.s32.totalorder %v8531_v51, %v5676_v25 }
 0x2d2   :  { %v4663_v8 = vsel %vm1080_vm2, 1.0, %v5591_v36  ;;  %v4665_v54 = vsel %vm1082_vm5, 1.0, %v5591_v36  ;;  %vm1600_vm6 = vcmp.eq.s32.totalorder %v8336_v12, %v5680_v27  ;;  %vm1602_vm7 = vcmp.eq.s32.totalorder %v8531_v51, %v5680_v27 }
 0x2d3   :  { %v5493_v45 = vpack.c.bf16 %v4125_v2, %v4123_v53  ;;  %v1464_v16 = vadd.f32 %v4663_v8, %v944_v13  ;;  %v1466_v38 = vadd.f32 %v4665_v54, %v946_v4  ;;  %v4791_v19 = vsel %vm1600_vm6, 1.0, %v5591_v36 }
 0x2d4   :  { %v4793_v9 = vsel %vm1602_vm7, 1.0, %v5591_v36  ;;  %vm2120_vm8 = vcmp.eq.s32.totalorder %v8336_v12, %v5684_v29  ;;  %vm2122_vm9 = vcmp.eq.s32.totalorder %v8531_v51, %v5684_v29  ;;  %vm2640_vm10 = vcmp.eq.s32.totalorder %v8336_v12, %v5688_v31 }
 0x2d5   :  { %5494 = vmatpush1.bf16.msra.mxu0 %v5493_v45  ;;  %v1984_v39 = vadd.f32 %v4791_v19, %v1464_v16  ;;  %v1986_v61 = vadd.f32 %v4793_v9, %v1466_v38  ;;  %v4919_v50 = vsel %vm2120_vm8, 1.0, %v5591_v36  ;;  %v4921_v10 = vsel %vm2122_vm9, 1.0, %v5591_v36 }
 0x2d6   :  { %vm2642_vm11 = vcmp.eq.s32.totalorder %v8531_v51, %v5688_v31  ;;  %v5047_v48 = vsel %vm2640_vm10, 1.0, %v5591_v36  ;;  %vm3160_vm12 = vcmp.eq.s32.totalorder %v8336_v12, %v5692_v33  ;;  %vm3162_vm13 = vcmp.eq.s32.totalorder %v8531_v51, %v5692_v33 }
 0x2d7   :  { %v2504_v55 = vadd.f32 %v4919_v50, %v1984_v39  ;;  %v2506_v40 = vadd.f32 %v4921_v10, %v1986_v61  ;;  %v5049_v17 = vsel %vm2642_vm11, 1.0, %v5591_v36  ;;  %v5175_v18 = vsel %vm3160_vm12, 1.0, %v5591_v36 }
 0x2d8   :  { %v5177_v56 = vsel %vm3162_vm13, 1.0, %v5591_v36  ;;  %vm3680_vm14 = vcmp.eq.s32.totalorder %v8336_v12, %v5696_v35  ;;  %vm3682_vm15 = vcmp.eq.s32.totalorder %v8531_v51, %v5696_v35  ;;  %v8580_v57 = vadd.s32 480, %v5632_v1 }
 0x2d9   :  { %v3024_v52 = vadd.f32 %v5047_v48, %v2504_v55  ;;  %v3026_v62 = vadd.f32 %v5049_v17, %v2506_v40  ;;  %v5303_v41 = vsel %vm3680_vm14, 1.0, %v5591_v36  ;;  %v5305_v42 = vsel %vm3682_vm15, 1.0, %v5591_v36 }
 0x2da   :  { %v8585_v63 = vadd.s32 488, %v5632_v1  ;;  %vm232_vm0 = vcmp.eq.s32.totalorder %v8580_v57, %v5668_v21  ;;  %vm624_vm1 = vcmp.eq.s32.totalorder %v8580_v57, %v5672_v23  ;;  %vm1144_vm2 = vcmp.eq.s32.totalorder %v8580_v57, %v5676_v25 }
 0x2db   :  { %v3544_v0 = vadd.f32 %v5175_v18, %v3024_v52  ;;  %v3546_v59 = vadd.f32 %v5177_v56, %v3026_v62  ;;  %v4471_v5 = vsel %vm232_vm0, 1.0, %v5591_v36  ;;  %v4599_v43 = vsel %vm624_vm1, 1.0, %v5591_v36 }
 0x2dc   :  { %vm234_vm3 = vcmp.eq.s32.totalorder %v8585_v63, %v5668_v21  ;;  %vm626_vm4 = vcmp.eq.s32.totalorder %v8585_v63, %v5672_v23  ;;  %v1008_v6 = vadd.f32 %v4599_v43, %v4471_v5  ;;  %vm1146_vm5 = vcmp.eq.s32.totalorder %v8585_v63, %v5676_v25 }
 0x2dd   :  { %v4064_v7 = vadd.f32 %v5303_v41, %v3544_v0  ;;  %v4066_v3 = vadd.f32 %v5305_v42, %v3546_v59  ;;  %v4473_v14 = vsel %vm234_vm3, 1.0, %v5591_v36  ;;  %v4601_v46 = vsel %vm626_vm4, 1.0, %v5591_v36 }
 0x2de   :  { %v1010_v37 = vadd.f32 %v4601_v46, %v4473_v14  ;;  %v4727_v15 = vsel %vm1144_vm2, 1.0, %v5591_v36  ;;  %v4729_v44 = vsel %vm1146_vm5, 1.0, %v5591_v36  ;;  %vm1664_vm6 = vcmp.eq.s32.totalorder %v8580_v57, %v5680_v27 }
 0x2df   :  { %v5431_v11 = vpack.c.bf16 %v4066_v3, %v4064_v7  ;;  %v1528_v49 = vadd.f32 %v4727_v15, %v1008_v6  ;;  %vm1666_vm7 = vcmp.eq.s32.totalorder %v8585_v63, %v5680_v27  ;;  %v4855_v53 = vsel %vm1664_vm6, 1.0, %v5591_v36 }
 0x2e0   :  { %v1530_v58 = vadd.f32 %v4729_v44, %v1010_v37  ;;  %v4857_v47 = vsel %vm1666_vm7, 1.0, %v5591_v36  ;;  %vm2184_vm8 = vcmp.eq.s32.totalorder %v8580_v57, %v5684_v29  ;;  %vm2186_vm9 = vcmp.eq.s32.totalorder %v8585_v63, %v5684_v29 }
 0x2e1   :  { %5432 = vmatprep.subr.bf16.mxu1 %v5431_v11  ;;  %v2048_v60 = vadd.f32 %v4855_v53, %v1528_v49  ;;  %v4983_v2 = vsel %vm2184_vm8, 1.0, %v5591_v36  ;;  %v4985_v13 = vsel %vm2186_vm9, 1.0, %v5591_v36  ;;  %vm2704_vm10 = vcmp.eq.s32.totalorder %v8580_v57, %v5688_v31 }
 0x2e2   :  { %v2050_v4 = vadd.f32 %v4857_v47, %v1530_v58  ;;  %vm2706_vm11 = vcmp.eq.s32.totalorder %v8585_v63, %v5688_v31  ;;  %v5111_v8 = vsel %vm2704_vm10, 1.0, %v5591_v36  ;;  %vm3224_vm12 = vcmp.eq.s32.totalorder %v8580_v57, %v5692_v33 }
 0x2e3   :  { %v2568_v54 = vadd.f32 %v4983_v2, %v2048_v60  ;;  %v5113_v45 = vsel %vm2706_vm11, 1.0, %v5591_v36  ;;  %vm3226_vm13 = vcmp.eq.s32.totalorder %v8585_v63, %v5692_v33  ;;  %v5239_v16 = vsel %vm3224_vm12, 1.0, %v5591_v36 }
 0x2e4   :  { %v2570_v38 = vadd.f32 %v4985_v13, %v2050_v4  ;;  %v5241_v19 = vsel %vm3226_vm13, 1.0, %v5591_v36  ;;  %vm3744_vm14 = vcmp.eq.s32.totalorder %v8580_v57, %v5696_v35  ;;  %vm3746_vm15 = vcmp.eq.s32.totalorder %v8585_v63, %v5696_v35 }
 0x2e5   :  { %v3088_v9 = vadd.f32 %v5111_v8, %v2568_v54  ;;  %v5367_v39 = vsel %vm3744_vm14, 1.0, %v5591_v36  ;;  %v5369_v61 = vsel %vm3746_vm15, 1.0, %v5591_v36  ;;  %vm167_vm0 = vcmp.eq.s32.totalorder %v8336_v12, %v5666_v20 }
 0x2e6   :  { %v3090_v50 = vadd.f32 %v5113_v45, %v2570_v38  ;;  %vm169_vm1 = vcmp.eq.s32.totalorder %v8531_v51, %v5666_v20  ;;  %v4406_v10 = vsel %vm167_vm0, 1.0, %v5591_v36  ;;  %vm559_vm2 = vcmp.eq.s32.totalorder %v8336_v12, %v5670_v22 }
 0x2e7   :  { %v3608_v48 = vadd.f32 %v5239_v16, %v3088_v9  ;;  %v4408_v55 = vsel %vm169_vm1, 1.0, %v5591_v36  ;;  %vm561_vm3 = vcmp.eq.s32.totalorder %v8531_v51, %v5670_v22  ;;  %v4534_v40 = vsel %vm559_vm2, 1.0, %v5591_v36 }
 0x2e8   :  { %v3610_v17 = vadd.f32 %v5241_v19, %v3090_v50  ;;  %v4536_v18 = vsel %vm561_vm3, 1.0, %v5591_v36  ;;  %v943_v56 = vadd.f32 %v4534_v40, %v4406_v10  ;;  %vm1079_vm4 = vcmp.eq.s32.totalorder %v8336_v12, %v5674_v24 }
 0x2e9   :  { %v4128_v52 = vadd.f32 %v5367_v39, %v3608_v48  ;;  %v945_v62 = vadd.f32 %v4536_v18, %v4408_v55  ;;  %vm1081_vm5 = vcmp.eq.s32.totalorder %v8531_v51, %v5674_v24  ;;  %v4662_v41 = vsel %vm1079_vm4, 1.0, %v5591_v36 }
 0x2ea   :  { %v4130_v42 = vadd.f32 %v5369_v61, %v3610_v17  ;;  %v4664_v0 = vsel %vm1081_vm5, 1.0, %v5591_v36  ;;  %v1463_v59 = vadd.f32 %v4662_v41, %v943_v56  ;;  %vm1599_vm6 = vcmp.eq.s32.totalorder %v8336_v12, %v5678_v26 }
 0x2eb   :  { %v1465_v5 = vadd.f32 %v4664_v0, %v945_v62  ;;  %vm1601_vm7 = vcmp.eq.s32.totalorder %v8531_v51, %v5678_v26  ;;  %v4790_v43 = vsel %vm1599_vm6, 1.0, %v5591_v36  ;;  %vm2119_vm8 = vcmp.eq.s32.totalorder %v8336_v12, %v5682_v28 }
 0x2ec   :  { %v5495_v6 = vpack.c.bf16 %v4130_v42, %v4128_v52  ;;  %v4792_v7 = vsel %vm1601_vm7, 1.0, %v5591_v36  ;;  %v1983_v3 = vadd.f32 %v4790_v43, %v1463_v59  ;;  %vm2121_vm9 = vcmp.eq.s32.totalorder %v8531_v51, %v5682_v28 }
 0x2ed   :  { %v1985_v14 = vadd.f32 %v4792_v7, %v1465_v5  ;;  %v4918_v46 = vsel %vm2119_vm8, 1.0, %v5591_v36  ;;  %v4920_v37 = vsel %vm2121_vm9, 1.0, %v5591_v36  ;;  %vm2639_vm10 = vcmp.eq.s32.totalorder %v8336_v12, %v5686_v30 }
 0x2ee   :  { %5496 = vmatprep.subr.bf16.mxu0 %v5495_v6  ;;  %v2503_v15 = vadd.f32 %v4918_v46, %v1983_v3  ;;  %vm2641_vm11 = vcmp.eq.s32.totalorder %v8531_v51, %v5686_v30  ;;  %v5046_v44 = vsel %vm2639_vm10, 1.0, %v5591_v36  ;;  %vm3159_vm12 = vcmp.eq.s32.totalorder %v8336_v12, %v5690_v32 }
 0x2ef   :  { %v2505_v11 = vadd.f32 %v4920_v37, %v1985_v14  ;;  %v5048_v49 = vsel %vm2641_vm11, 1.0, %v5591_v36  ;;  %vm3161_vm13 = vcmp.eq.s32.totalorder %v8531_v51, %v5690_v32  ;;  %v5174_v53 = vsel %vm3159_vm12, 1.0, %v5591_v36 }
 0x2f0   :  { %v3023_v58 = vadd.f32 %v5046_v44, %v2503_v15  ;;  %v5176_v47 = vsel %vm3161_vm13, 1.0, %v5591_v36  ;;  %vm3679_vm14 = vcmp.eq.s32.totalorder %v8336_v12, %v5694_v34  ;;  %vm3681_vm15 = vcmp.eq.s32.totalorder %v8531_v51, %v5694_v34 }
 0x2f1   :  { %v3025_v60 = vadd.f32 %v5048_v49, %v2505_v11  ;;  %v5302_v2 = vsel %vm3679_vm14, 1.0, %v5591_v36  ;;  %v5304_v13 = vsel %vm3681_vm15, 1.0, %v5591_v36  ;;  %vm231_vm0 = vcmp.eq.s32.totalorder %v8580_v57, %v5666_v20 }
 0x2f2   :  { %v3543_v4 = vadd.f32 %v5174_v53, %v3023_v58  ;;  %vm233_vm1 = vcmp.eq.s32.totalorder %v8585_v63, %v5666_v20  ;;  %v4470_v8 = vsel %vm231_vm0, 1.0, %v5591_v36  ;;  %vm623_vm2 = vcmp.eq.s32.totalorder %v8580_v57, %v5670_v22 }
 0x2f3   :  { %v3545_v12 = vadd.f32 %v5176_v47, %v3025_v60  ;;  %v4472_v51 = vsel %vm233_vm1, 1.0, %v5591_v36  ;;  %vm625_vm3 = vcmp.eq.s32.totalorder %v8585_v63, %v5670_v22  ;;  %v4598_v54 = vsel %vm623_vm2, 1.0, %v5591_v36 }
 0x2f4   :  { %v4063_v45 = vadd.f32 %v5302_v2, %v3543_v4  ;;  %v4600_v16 = vsel %vm625_vm3, 1.0, %v5591_v36  ;;  %v1007_v38 = vadd.f32 %v4598_v54, %v4470_v8  ;;  %vm1143_vm4 = vcmp.eq.s32.totalorder %v8580_v57, %v5674_v24 }
 0x2f5   :  { %v4065_v19 = vadd.f32 %v5304_v13, %v3545_v12  ;;  %v1009_v9 = vadd.f32 %v4600_v16, %v4472_v51  ;;  %vm1145_vm5 = vcmp.eq.s32.totalorder %v8585_v63, %v5674_v24  ;;  %v4726_v39 = vsel %vm1143_vm4, 1.0, %v5591_v36 }
 0x2f6   :  { %v4728_v61 = vsel %vm1145_vm5, 1.0, %v5591_v36  ;;  %v1527_v50 = vadd.f32 %v4726_v39, %v1007_v38  ;;  %vm1663_vm6 = vcmp.eq.s32.totalorder %v8580_v57, %v5678_v26  ;;  %vm1665_vm7 = vcmp.eq.s32.totalorder %v8585_v63, %v5678_v26 }
 0x2f7   :  { %v5433_v10 = vpack.c.bf16 %v4065_v19, %v4063_v45  ;;  %v1529_v48 = vadd.f32 %v4728_v61, %v1009_v9  ;;  %v4854_v55 = vsel %vm1663_vm6, 1.0, %v5591_v36  ;;  %v4856_v40 = vsel %vm1665_vm7, 1.0, %v5591_v36 }
 0x2f8   :  { %v2047_v17 = vadd.f32 %v4854_v55, %v1527_v50  ;;  %vm2183_vm8 = vcmp.eq.s32.totalorder %v8580_v57, %v5682_v28  ;;  %vm2185_vm9 = vcmp.eq.s32.totalorder %v8585_v63, %v5682_v28  ;;  %vm2703_vm10 = vcmp.eq.s32.totalorder %v8580_v57, %v5686_v30 }
 0x2f9   :  { %5434 = vmatpush1.bf16.msra.mxu1 %v5433_v10  ;;  %v2049_v18 = vadd.f32 %v4856_v40, %v1529_v48  ;;  %v4982_v56 = vsel %vm2183_vm8, 1.0, %v5591_v36  ;;  %v4984_v52 = vsel %vm2185_vm9, 1.0, %v5591_v36  ;;  %vm2705_vm11 = vcmp.eq.s32.totalorder %v8585_v63, %v5686_v30 }
 0x2fa   :  { %v2567_v62 = vadd.f32 %v4982_v56, %v2047_v17  ;;  %v5110_v41 = vsel %vm2703_vm10, 1.0, %v5591_v36  ;;  %v5112_v42 = vsel %vm2705_vm11, 1.0, %v5591_v36  ;;  %vm3223_vm12 = vcmp.eq.s32.totalorder %v8580_v57, %v5690_v32 }
 0x2fb   :  { %v2569_v0 = vadd.f32 %v4984_v52, %v2049_v18  ;;  %vm3225_vm13 = vcmp.eq.s32.totalorder %v8585_v63, %v5690_v32  ;;  %v5238_v59 = vsel %vm3223_vm12, 1.0, %v5591_v36  ;;  %vm3743_vm14 = vcmp.eq.s32.totalorder %v8580_v57, %v5694_v34 }
 0x2fc   :  { %v3087_v5 = vadd.f32 %v5110_v41, %v2567_v62  ;;  %v5240_v43 = vsel %vm3225_vm13, 1.0, %v5591_v36  ;;  %vm3745_vm15 = vcmp.eq.s32.totalorder %v8585_v63, %v5694_v34  ;;  %v5366_v7 = vsel %vm3743_vm14, 1.0, %v5591_v36 }
 0x2fd   :  { %v3089_v6 = vadd.f32 %v5112_v42, %v2569_v0  ;;  %v8731_v3 = vadd.s32 240, %v5632_v1  ;;  %v8734_v14 = vadd.s32 248, %v5632_v1  ;;  %v5368_v37 = vsel %vm3745_vm15, 1.0, %v5591_v36 }
 0x2fe   :  { %v3607_v46 = vadd.f32 %v5238_v59, %v3087_v5  ;;  %v8738_v57 = vadd.s32 496, %v5632_v1  ;;  %v8741_v15 = vadd.s32 504, %v5632_v1 }
 0x2ff   :  { %v3609_v44 = vadd.f32 %v5240_v43, %v3089_v6  ;;  %vm172_vm0 = vcmp.eq.s32.totalorder %v8731_v3, %v5668_v21  ;;  %vm174_vm1 = vcmp.eq.s32.totalorder %v8734_v14, %v5668_v21  ;;  %vm564_vm2 = vcmp.eq.s32.totalorder %v8731_v3, %v5672_v23 }
 0x300   :  { %v4127_v63 = vadd.f32 %v5366_v7, %v3607_v46  ;;  %v4411_v11 = vsel %vm172_vm0, 1.0, %v5591_v36  ;;  %v4413_v49 = vsel %vm174_vm1, 1.0, %v5591_v36  ;;  %vm566_vm3 = vcmp.eq.s32.totalorder %v8734_v14, %v5672_v23 }
 0x301   :  { %v4129_v1 = vadd.f32 %v5368_v37, %v3609_v44  ;;  %v4539_v53 = vsel %vm564_vm2, 1.0, %v5591_v36  ;;  %v4541_v58 = vsel %vm566_vm3, 1.0, %v5591_v36  ;;  %vm1084_vm4 = vcmp.eq.s32.totalorder %v8731_v3, %v5676_v25 }
 0x302   :  { %v948_v47 = vadd.f32 %v4539_v53, %v4411_v11  ;;  %v950_v60 = vadd.f32 %v4541_v58, %v4413_v49  ;;  %vm1086_vm5 = vcmp.eq.s32.totalorder %v8734_v14, %v5676_v25  ;;  %v4667_v2 = vsel %vm1084_vm4, 1.0, %v5591_v36 }
 0x303   :  { %v5497_v13 = vpack.c.bf16 %v4129_v1, %v4127_v63  ;;  %v4669_v4 = vsel %vm1086_vm5, 1.0, %v5591_v36  ;;  %vm1604_vm6 = vcmp.eq.s32.totalorder %v8731_v3, %v5680_v27  ;;  %vm1606_vm7 = vcmp.eq.s32.totalorder %v8734_v14, %v5680_v27 }
 0x304   :  { %v1468_v8 = vadd.f32 %v4667_v2, %v948_v47  ;;  %v1470_v12 = vadd.f32 %v4669_v4, %v950_v60  ;;  %v4795_v51 = vsel %vm1604_vm6, 1.0, %v5591_v36  ;;  %v4797_v54 = vsel %vm1606_vm7, 1.0, %v5591_v36 }
 0x305   :  { %5498 = vmatpush1.bf16.msra.mxu0 %v5497_v13  ;;  %vm2124_vm8 = vcmp.eq.s32.totalorder %v8731_v3, %v5684_v29  ;;  %vm2126_vm9 = vcmp.eq.s32.totalorder %v8734_v14, %v5684_v29  ;;  %vm2644_vm10 = vcmp.eq.s32.totalorder %v8731_v3, %v5688_v31  ;;  %vm2646_vm11 = vcmp.eq.s32.totalorder %v8734_v14, %v5688_v31 }
 0x306   :  { %v1988_v45 = vadd.f32 %v4795_v51, %v1468_v8  ;;  %v1990_v16 = vadd.f32 %v4797_v54, %v1470_v12  ;;  %v4923_v38 = vsel %vm2124_vm8, 1.0, %v5591_v36  ;;  %v4925_v19 = vsel %vm2126_vm9, 1.0, %v5591_v36 }
 0x307   :  { %v5051_v9 = vsel %vm2644_vm10, 1.0, %v5591_v36  ;;  %v5053_v39 = vsel %vm2646_vm11, 1.0, %v5591_v36  ;;  %vm3164_vm12 = vcmp.eq.s32.totalorder %v8731_v3, %v5692_v33  ;;  %vm3166_vm13 = vcmp.eq.s32.totalorder %v8734_v14, %v5692_v33 }
 0x308   :  { %v2508_v61 = vadd.f32 %v4923_v38, %v1988_v45  ;;  %v2510_v50 = vadd.f32 %v4925_v19, %v1990_v16  ;;  %v5179_v10 = vsel %vm3164_vm12, 1.0, %v5591_v36  ;;  %v5181_v48 = vsel %vm3166_vm13, 1.0, %v5591_v36 }
 0x309   :  { %vm3684_vm14 = vcmp.eq.s32.totalorder %v8731_v3, %v5696_v35  ;;  %vm3686_vm15 = vcmp.eq.s32.totalorder %v8734_v14, %v5696_v35  ;;  %vm236_vm0 = vcmp.eq.s32.totalorder %v8738_v57, %v5668_v21  ;;  %vm238_vm1 = vcmp.eq.s32.totalorder %v8741_v15, %v5668_v21 }
 0x30a   :  { %v3028_v55 = vadd.f32 %v5051_v9, %v2508_v61  ;;  %v3030_v40 = vadd.f32 %v5053_v39, %v2510_v50  ;;  %v5307_v17 = vsel %vm3684_vm14, 1.0, %v5591_v36  ;;  %v5309_v18 = vsel %vm3686_vm15, 1.0, %v5591_v36 }
 0x30b   :  { %v4475_v56 = vsel %vm236_vm0, 1.0, %v5591_v36  ;;  %v4477_v52 = vsel %vm238_vm1, 1.0, %v5591_v36  ;;  %vm628_vm2 = vcmp.eq.s32.totalorder %v8738_v57, %v5672_v23  ;;  %vm630_vm3 = vcmp.eq.s32.totalorder %v8741_v15, %v5672_v23 }
 0x30c   :  { %v3548_v62 = vadd.f32 %v5179_v10, %v3028_v55  ;;  %v3550_v41 = vadd.f32 %v5181_v48, %v3030_v40  ;;  %v4603_v21 = vsel %vm628_vm2, 1.0, %v5591_v36  ;;  %v4605_v42 = vsel %vm630_vm3, 1.0, %v5591_v36 }
 0x30d   :  { %v1012_v0 = vadd.f32 %v4603_v21, %v4475_v56  ;;  %v1014_v59 = vadd.f32 %v4605_v42, %v4477_v52  ;;  %vm1148_vm4 = vcmp.eq.s32.totalorder %v8738_v57, %v5676_v25  ;;  %vm1150_vm5 = vcmp.eq.s32.totalorder %v8741_v15, %v5676_v25 }
 0x30e   :  { %v4068_v5 = vadd.f32 %v5307_v17, %v3548_v62  ;;  %v4070_v43 = vadd.f32 %v5309_v18, %v3550_v41  ;;  %v4731_v6 = vsel %vm1148_vm4, 1.0, %v5591_v36  ;;  %v4733_v23 = vsel %vm1150_vm5, 1.0, %v5591_v36 }
 0x30f   :  { %v1532_v7 = vadd.f32 %v4731_v6, %v1012_v0  ;;  %v1534_v46 = vadd.f32 %v4733_v23, %v1014_v59  ;;  %vm1668_vm6 = vcmp.eq.s32.totalorder %v8738_v57, %v5680_v27  ;;  %vm1670_vm7 = vcmp.eq.s32.totalorder %v8741_v15, %v5680_v27 }
 0x310   :  { %v5435_v37 = vpack.c.bf16 %v4070_v43, %v4068_v5  ;;  %v4859_v44 = vsel %vm1668_vm6, 1.0, %v5591_v36  ;;  %v4861_v63 = vsel %vm1670_vm7, 1.0, %v5591_v36  ;;  %vm2188_vm8 = vcmp.eq.s32.totalorder %v8738_v57, %v5684_v29 }
 0x311   :  { %v2052_v25 = vadd.f32 %v4859_v44, %v1532_v7  ;;  %v2054_v11 = vadd.f32 %v4861_v63, %v1534_v46  ;;  %vm2190_vm9 = vcmp.eq.s32.totalorder %v8741_v15, %v5684_v29  ;;  %v4987_v49 = vsel %vm2188_vm8, 1.0, %v5591_v36 }
 0x312   :  { %5436 = vmatprep.subr.bf16.mxu1 %v5435_v37  ;;  %v4989_v1 = vsel %vm2190_vm9, 1.0, %v5591_v36  ;;  %vm2708_vm10 = vcmp.eq.s32.totalorder %v8738_v57, %v5688_v31  ;;  %vm2710_vm11 = vcmp.eq.s32.totalorder %v8741_v15, %v5688_v31  ;;  %vm3228_vm12 = vcmp.eq.s32.totalorder %v8738_v57, %v5692_v33 }
 0x313   :  { %v2572_v27 = vadd.f32 %v4987_v49, %v2052_v25  ;;  %v2574_v53 = vadd.f32 %v4989_v1, %v2054_v11  ;;  %v5115_v58 = vsel %vm2708_vm10, 1.0, %v5591_v36  ;;  %v5117_v29 = vsel %vm2710_vm11, 1.0, %v5591_v36 }
 0x314   :  { %vm3230_vm13 = vcmp.eq.s32.totalorder %v8741_v15, %v5692_v33  ;;  %v5243_v47 = vsel %vm3228_vm12, 1.0, %v5591_v36  ;;  %vm3748_vm14 = vcmp.eq.s32.totalorder %v8738_v57, %v5696_v35  ;;  %vm3750_vm15 = vcmp.eq.s32.totalorder %v8741_v15, %v5696_v35 }
 0x315   :  { %v3092_v31 = vadd.f32 %v5115_v58, %v2572_v27  ;;  %v3094_v60 = vadd.f32 %v5117_v29, %v2574_v53  ;;  %v5245_v2 = vsel %vm3230_vm13, 1.0, %v5591_v36  ;;  %v5371_v13 = vsel %vm3748_vm14, 1.0, %v5591_v36 }
 0x316   :  { %v5373_v4 = vsel %vm3750_vm15, 1.0, %v5591_v36  ;;  %vm171_vm0 = vcmp.eq.s32.totalorder %v8731_v3, %v5666_v20  ;;  %vm173_vm1 = vcmp.eq.s32.totalorder %v8734_v14, %v5666_v20  ;;  %vm563_vm2 = vcmp.eq.s32.totalorder %v8731_v3, %v5670_v22 }
 0x317   :  { %v3612_v33 = vadd.f32 %v5243_v47, %v3092_v31  ;;  %v3614_v8 = vadd.f32 %v5245_v2, %v3094_v60  ;;  %v4410_v35 = vsel %vm171_vm0, 1.0, %v5591_v36  ;;  %v4412_v12 = vsel %vm173_vm1, 1.0, %v5591_v36  ;;  %v4135_v2 = vld [vmem:[#allocation5] sm:$0xff] }
 0x318   :  { %vm565_vm3 = vcmp.eq.s32.totalorder %v8734_v14, %v5670_v22  ;;  %v4538_v51 = vsel %vm563_vm2, 1.0, %v5591_v36  ;;  %vm1083_vm4 = vcmp.eq.s32.totalorder %v8731_v3, %v5674_v24  ;;  %vm1085_vm5 = vcmp.eq.s32.totalorder %v8734_v14, %v5674_v24 }
 0x319   :  { %v4132_v54 = vadd.f32 %v5371_v13, %v3612_v33  ;;  %v4134_v45 = vadd.f32 %v5373_v4, %v3614_v8  ;;  %v4540_v16 = vsel %vm565_vm3, 1.0, %v5591_v36  ;;  %v947_v38 = vadd.f32 %v4538_v51, %v4410_v35 }
 0x31a   :  { %v949_v19 = vadd.f32 %v4540_v16, %v4412_v12  ;;  %v4666_v9 = vsel %vm1083_vm4, 1.0, %v5591_v36  ;;  %v4668_v39 = vsel %vm1085_vm5, 1.0, %v5591_v36  ;;  %vm1603_vm6 = vcmp.eq.s32.totalorder %v8731_v3, %v5678_v26 }
 0x31b   :  { %v5499_v61 = vpack.c.bf16 %v4134_v45, %v4132_v54  ;;  %v1467_v50 = vadd.f32 %v4666_v9, %v947_v38  ;;  %vm1605_vm7 = vcmp.eq.s32.totalorder %v8734_v14, %v5678_v26  ;;  %v4794_v10 = vsel %vm1603_vm6, 1.0, %v5591_v36  ;;  %v4137_v38 = vld [vmem:[#allocation5 + $0x10] sm:$0xff] }
 0x31c   :  { %v1469_v48 = vadd.f32 %v4668_v39, %v949_v19  ;;  %v4796_v55 = vsel %vm1605_vm7, 1.0, %v5591_v36  ;;  %vm2123_vm8 = vcmp.eq.s32.totalorder %v8731_v3, %v5682_v28  ;;  %vm2125_vm9 = vcmp.eq.s32.totalorder %v8734_v14, %v5682_v28 }
 0x31d   :  { %5500 = vmatprep.subr.bf16.mxu0 %v5499_v61  ;;  %v1987_v40 = vadd.f32 %v4794_v10, %v1467_v50  ;;  %v4922_v17 = vsel %vm2123_vm8, 1.0, %v5591_v36  ;;  %v4924_v18 = vsel %vm2125_vm9, 1.0, %v5591_v36  ;;  %vm2643_vm10 = vcmp.eq.s32.totalorder %v8731_v3, %v5686_v30 }
 0x31e   :  { %v1989_v56 = vadd.f32 %v4796_v55, %v1469_v48  ;;  %vm2645_vm11 = vcmp.eq.s32.totalorder %v8734_v14, %v5686_v30  ;;  %v5050_v52 = vsel %vm2643_vm10, 1.0, %v5591_v36  ;;  %vm3163_vm12 = vcmp.eq.s32.totalorder %v8731_v3, %v5690_v32 }
 0x31f   :  { %v2507_v62 = vadd.f32 %v4922_v17, %v1987_v40  ;;  %v5052_v41 = vsel %vm2645_vm11, 1.0, %v5591_v36  ;;  %vm3165_vm13 = vcmp.eq.s32.totalorder %v8734_v14, %v5690_v32  ;;  %v5178_v21 = vsel %vm3163_vm12, 1.0, %v5591_v36 }
 0x320   :  { %v2509_v42 = vadd.f32 %v4924_v18, %v1989_v56  ;;  %v5180_v0 = vsel %vm3165_vm13, 1.0, %v5591_v36  ;;  %vm3683_vm14 = vcmp.eq.s32.totalorder %v8731_v3, %v5694_v34  ;;  %vm3685_vm15 = vcmp.eq.s32.totalorder %v8734_v14, %v5694_v34 }
 0x321   :  { %v3027_v59 = vadd.f32 %v5050_v52, %v2507_v62  ;;  %v5306_v5 = vsel %vm3683_vm14, 1.0, %v5591_v36  ;;  %v5308_v43 = vsel %vm3685_vm15, 1.0, %v5591_v36  ;;  %vm235_vm0 = vcmp.eq.s32.totalorder %v8738_v57, %v5666_v20 }
 0x322   :  { %v3029_v6 = vadd.f32 %v5052_v41, %v2509_v42  ;;  %vm237_vm1 = vcmp.eq.s32.totalorder %v8741_v15, %v5666_v20  ;;  %v4474_v23 = vsel %vm235_vm0, 1.0, %v5591_v36  ;;  %vm627_vm2 = vcmp.eq.s32.totalorder %v8738_v57, %v5670_v22 }
 0x323   :  { %v3547_v3 = vadd.f32 %v5178_v21, %v3027_v59  ;;  %v4476_v14 = vsel %vm237_vm1, 1.0, %v5591_v36  ;;  %vm629_vm3 = vcmp.eq.s32.totalorder %v8741_v15, %v5670_v22  ;;  %v4602_v7 = vsel %vm627_vm2, 1.0, %v5591_v36 }
 0x324   :  { %v3549_v46 = vadd.f32 %v5180_v0, %v3029_v6  ;;  %v4604_v37 = vsel %vm629_vm3, 1.0, %v5591_v36  ;;  %v1011_v44 = vadd.f32 %v4602_v7, %v4474_v23  ;;  %vm1147_vm4 = vcmp.eq.s32.totalorder %v8738_v57, %v5674_v24 }
 0x325   :  { %v4067_v20 = vadd.f32 %v5306_v5, %v3547_v3  ;;  %v1013_v63 = vadd.f32 %v4604_v37, %v4476_v14  ;;  %vm1149_vm5 = vcmp.eq.s32.totalorder %v8741_v15, %v5674_v24  ;;  %v4730_v25 = vsel %vm1147_vm4, 1.0, %v5591_v36 }
 0x326   :  { %v4069_v11 = vadd.f32 %v5308_v43, %v3549_v46  ;;  %v4732_v49 = vsel %vm1149_vm5, 1.0, %v5591_v36  ;;  %v1531_v22 = vadd.f32 %v4730_v25, %v1011_v44  ;;  %vm1667_vm6 = vcmp.eq.s32.totalorder %v8738_v57, %v5678_v26 }
 0x327   :  { %v1533_v1 = vadd.f32 %v4732_v49, %v1013_v63  ;;  %vm1669_vm7 = vcmp.eq.s32.totalorder %v8741_v15, %v5678_v26  ;;  %v4858_v27 = vsel %vm1667_vm6, 1.0, %v5591_v36  ;;  %vm2187_vm8 = vcmp.eq.s32.totalorder %v8738_v57, %v5682_v28 }
 0x328   :  { %v5437_v53 = vpack.c.bf16 %v4069_v11, %v4067_v20  ;;  %v4860_v24 = vsel %vm1669_vm7, 1.0, %v5591_v36  ;;  %v2051_v58 = vadd.f32 %v4858_v27, %v1531_v22  ;;  %vm2189_vm9 = vcmp.eq.s32.totalorder %v8741_v15, %v5682_v28 }
 0x329   :  { %v2053_v29 = vadd.f32 %v4860_v24, %v1533_v1  ;;  %v4986_v47 = vsel %vm2187_vm8, 1.0, %v5591_v36  ;;  %v4988_v31 = vsel %vm2189_vm9, 1.0, %v5591_v36  ;;  %vm2707_vm10 = vcmp.eq.s32.totalorder %v8738_v57, %v5686_v30 }
 0x32a   :  { %5438 = vmatpush1.bf16.msra.mxu1 %v5437_v53  ;;  %v2571_v26 = vadd.f32 %v4986_v47, %v2051_v58  ;;  %vm2709_vm11 = vcmp.eq.s32.totalorder %v8741_v15, %v5686_v30  ;;  %v5114_v60 = vsel %vm2707_vm10, 1.0, %v5591_v36  ;;  %vm3227_vm12 = vcmp.eq.s32.totalorder %v8738_v57, %v5690_v32 }
 0x32b   :  { %v2573_v28 = vadd.f32 %v4988_v31, %v2053_v29  ;;  %v5116_v13 = vsel %vm2709_vm11, 1.0, %v5591_v36  ;;  %vm3229_vm13 = vcmp.eq.s32.totalorder %v8741_v15, %v5690_v32  ;;  %v5242_v4 = vsel %vm3227_vm12, 1.0, %v5591_v36 }
 0x32c   :  { %v3091_v33 = vadd.f32 %v5114_v60, %v2571_v26  ;;  %v5244_v8 = vsel %vm3229_vm13, 1.0, %v5591_v36  ;;  %vm3747_vm14 = vcmp.eq.s32.totalorder %v8738_v57, %v5694_v34  ;;  %vm3749_vm15 = vcmp.eq.s32.totalorder %v8741_v15, %v5694_v34 }
 0x32d   :  { %v3093_v30 = vadd.f32 %v5116_v13, %v2573_v28  ;;  %v5370_v35 = vsel %vm3747_vm14, 1.0, %v5591_v36  ;;  %4204 = vmatmul.mubr.f32.vlgmr.msra.gmra.mrb[0].mxu1 %v4135_v2  ;;  %v5372_v51 = vsel %vm3749_vm15, 1.0, %v5591_v36  ;;  %vm4281_vm0 = vcmask 1041408  }
 0x32e   :  { %v3611_v12 = vadd.f32 %v5242_v4, %v3091_v33 }
 0x32f   :  { %v3613_v54 = vadd.f32 %v5244_v8, %v3093_v30 }
 0x330   :  { %v4131_v32 = vadd.f32 %v5370_v35, %v3611_v12 }
 0x331   :  { %v4133_v45 = vadd.f32 %v5372_v51, %v3613_v54 }
 0x333   :  { %v5501_v16 = vpack.c.bf16 %v4133_v45, %v4131_v32 }
 0x335   :  { %5502 = vmatpush1.bf16.msra.mxu0 %v5501_v16 }
 0x338   :  { %4275 = vmatmul.mubr.f32.vlgmr.msra.gmra.mrb[0].mxu0 %v4137_v38 }
 0x400   :  { %v4205_v19 = vpop.f32.mrb[0].mxu1 }
 0x401   :  { %v4207_v9 = vpop.f32.mrb[1].mxu1 }
 0x40b   :  { %v4276_v57 = vpop.f32.mrb[0].mxu0 }
 0x40c   :  { %v4277_v39 = vadd.f32 %v4276_v57, %v4205_v19  ;;  %v4278_v34 = vpop.f32.mrb[1].mxu0 }
 0x40d   :  { %v4279_v15 = vadd.f32 %v4278_v34, %v4207_v9 }
 0x40e   :  { %v4282_v61 = vsel %vm4281_vm0, %v4277_v39, -inf }
 0x40f   :  { %v4283_v50 = vrot.slane %v4282_v61, 4  ;;  %v4289_v10 = vsel %vm4281_vm0, %v4279_v15, -inf }
 0x410   :  { %v4290_v36 = vrot.slane %v4289_v10, 4 }
 0x411   :  { %v4284_v48 = vmax.f32 %v4282_v61, %v4283_v50 }
 0x412   :  { %v4291_v55 = vmax.f32 %v4289_v10, %v4290_v36 }
 0x413   :  { %v4285_v40 = vrot.slane %v4284_v48, 2 }
 0x414   :  { %v4292_v17 = vrot.slane %v4291_v55, 2 }
 0x415   :  { %v4286_v18 = vmax.f32 %v4284_v48, %v4285_v40 }
 0x416   :  { %v4293_v56 = vmax.f32 %v4291_v55, %v4292_v17 }
 0x417   :  { %v4287_v52 = vrot.slane %v4286_v18, 1 }
 0x418   :  { %v4294_v62 = vrot.slane %v4293_v56, 1 }
 0x419   :  { %v4288_v41 = vmax.f32 %v4286_v18, %v4287_v52 }
 0x41a   :  { %v4295_v21 = vmax.f32 %v4293_v56, %v4294_v62 }
 0x41b   :  { %v4296_v42 = vsub.f32 %v4277_v39, %v4288_v41 }
 0x41c   :  { %v4297_v0 = vsub.f32 %v4279_v15, %v4295_v21 }
 0x41d   :  { %v4298_v59 = vmul.f32 1.442695, %v4296_v42 }
 0x41e   :  { %v4300_v5 = vmul.f32 1.442695, %v4297_v0 }
 0x41f   :  { %5509 = vpow2.f32 %v4298_v59 }
 0x420   :  { %5511 = vpow2.f32 %v4300_v5 }
 0x429   :  { %v5510_v43 = vpop.eup %5509 }
 0x42a   :  { %v5512_v6 = vpop.eup %5511  ;;  %v4302_v23 = vsel %vm4281_vm0, %v5510_v43, 0.0 }
 0x42b   :  { %v4303_v3 = vrot.slane %v4302_v23, 4  ;;  %v4309_v14 = vsel %vm4281_vm0, %v5512_v6, 0.0 }
 0x42c   :  { %v4310_v7 = vrot.slane %v4309_v14, 4 }
 0x42d   :  { %v4304_v46 = vadd.f32 %v4303_v3, %v4302_v23 }
 0x42e   :  { %v4311_v37 = vadd.f32 %v4310_v7, %v4309_v14 }
 0x42f   :  { %v4305_v44 = vrot.slane %v4304_v46, 2 }
 0x430   :  { %v4312_v20 = vrot.slane %v4311_v37, 2 }
 0x431   :  { %v4306_v63 = vadd.f32 %v4305_v44, %v4304_v46 }
 0x432   :  { %v4313_v25 = vadd.f32 %v4312_v20, %v4311_v37 }
 0x433   :  { %v4307_v11 = vrot.slane %v4306_v63, 1 }
 0x434   :  { %v4314_v49 = vrot.slane %v4313_v25, 1 }
 0x435   :  { %v4308_v22 = vadd.f32 %v4307_v11, %v4306_v63 }
 0x436   :  { %v4315_v1 = vadd.f32 %v4314_v49, %v4313_v25 }
 0x437   :  { %5513 = vlog2.f32 %v4308_v22 }
 0x438   :  { %5515 = vlog2.f32 %v4315_v1 }
 0x441   :  { %v5514_v27 = vpop.eup %5513 }
 0x442   :  { %v5516_v53 = vpop.eup %5515  ;;  %v4317_v24 = vmul.f32 0.6931472, %v5514_v27 }
 0x443   :  { %v4319_v58 = vmul.f32 0.6931472, %v5516_v53 }
 0x444   :  { %v4320_v29 = vsub.f32 %v4296_v42, %v4317_v24 }
 0x445   :  { %v4321_v47 = vsub.f32 %v4297_v0, %v4319_v58 }
 0x447   :  { %v4324_v31 = vcombine.low %v4320_v29, %v4321_v47 }
 0x449   :  { %5374 = vst.sshfl [vmem:[#allocation7] sm:$0x33 pattern:$0x76325410] %v4324_v31 }
 0x44a   :  { %5572 = shalt.err (!%p5569_p6)
}
 0x44b   :  { %s5573_s8 = scalar_lea.hbm %s8953_s2, 64 }
 0x44c   :  { %p5574_p7 = scmp.ne.s32.totalorder %s8953_s2, %s5573_s8  ;;  %p5577_p8 = scmp.lt.u32.totalorder %s5573_s8, %s8953_s2 }
 0x44e   :  { %p5579_p9 = pnand %p5577_p8, %p5574_p7 }
 0x450   :  { %5582 = shalt.err (!%p5579_p9)
}
 0x451   :  { %4343 = dma.vmem_to_hbm [thread:$0]  %s4341_s4, 64, %s8953_s2, [#allocation4]  }
 0x452   :  { %5587 = dma.done.wait [#allocation4], 64  }
 0x453   :  { %5588 = vsyncadd [#allocation4], 4294967232 }
 0x454   :  { %4347 = vsyncpa [#allocation3], 1 }
 0x455   :  { %4348 = vsyncpa [#allocation6], 1 }
 0x456   :  { %4349 = vsyncpa [#allocation4], 1 }

</bundles_post_ra>
